<compile_context>
chip_gen: v7x
topology: tpu7x:2x2x1
jax: 0.10.0
libtpu: 0.0.40
codegen_flags: <defaults>
</compile_context>

<pallas_src>
import functools
import math

import jax
import jax.numpy as jnp
from jax.experimental import pallas as pl
from jax.experimental.pallas import tpu as pltpu


def _round_up(x, m):
    return ((x + m - 1) // m) * m


# ----------------------------------------------------------------------------
# Pallas kernels
# ----------------------------------------------------------------------------

def matmul_bias_act_kernel(a_ref, b_ref, bias_ref, o_ref, *, activation, valid_n):
    """o = act( A @ B + bias ).  Full-K single tile: no k-loop / accumulator."""
    acc = jnp.dot(a_ref[...], b_ref[...], preferred_element_type=jnp.float32)
    out = acc + bias_ref[...]
    if activation == "relu":
        out = jnp.maximum(out, 0.0)
    elif activation == "log_softmax":
        # Row-wise log-softmax over the first `valid_n` (real) columns; the
        # remaining columns are zero-padding and must not enter the sum.
        cols = jax.lax.broadcasted_iota(jnp.int32, out.shape, 1)
        mask = cols < valid_n
        masked = jnp.where(mask, out, -jnp.inf)
        m = jnp.max(masked, axis=-1, keepdims=True)
        ex = jnp.where(mask, jnp.exp(out - m), 0.0)
        lse = m + jnp.log(jnp.sum(ex, axis=-1, keepdims=True))
        out = out - lse
    o_ref[...] = out.astype(o_ref.dtype)


def max4_kernel(a_ref, b_ref, c_ref, d_ref, o_ref):
    """Elementwise max of the 4 shifted 2x2 pooling windows."""
    o_ref[...] = jnp.maximum(jnp.maximum(a_ref[...], b_ref[...]),
                             jnp.maximum(c_ref[...], d_ref[...]))


# ----------------------------------------------------------------------------
# Kernel wrappers
# ----------------------------------------------------------------------------

def matmul_bias_act(a, b, bias, *, activation="none", valid_n=None,
                    out_dtype=jnp.bfloat16, max_block_m=512):
    """a: (M, K) float.  b: (K, Np) bf16, pre-transposed/padded.  bias: (1, Np) f32.

    Single full-K tile per grid step; grid only over M, with the M tile sized
    to the real row count (balanced, rounded up to a multiple of 8).
    """
    M, K = a.shape
    Kb, Np = b.shape
    assert K == Kb, (K, Kb)

    num_m = max(1, -(-M // max_block_m))           # ceil(M / max_block_m)
    tm = _round_up(-(-M // num_m), 8)              # balanced tile, mult of 8
    mp = tm * num_m

    a = a.astype(jnp.bfloat16)
    if mp != M:
        a = jnp.pad(a, ((0, mp - M), (0, 0)))

    out = pl.pallas_call(
        functools.partial(matmul_bias_act_kernel,
                          activation=activation, valid_n=valid_n),
        out_shape=jax.ShapeDtypeStruct((mp, Np), out_dtype),
        grid_spec=pltpu.PrefetchScalarGridSpec(
            num_scalar_prefetch=0,
            grid=(num_m,),
            in_specs=[
                pl.BlockSpec((tm, K), lambda i: (i, 0)),
                pl.BlockSpec((K, Np), lambda i: (0, 0)),
                pl.BlockSpec((1, Np), lambda i: (0, 0)),
            ],
            out_specs=pl.BlockSpec((tm, Np), lambda i: (i, 0)),
        ),
        compiler_params=pltpu.CompilerParams(
            dimension_semantics=("parallel",)),
    )(a, b, bias)
    return out[:M] if mp != M else out


def conv2d_bias_relu(x, b_mat, bias, kh, kw):
    """Valid (no-pad) stride-1 conv.  x: (N,H,W,Cin) bf16 NHWC,
    b_mat: (kh*kw*Cin, Cout) bf16 pre-baked from the PyTorch OIHW weight."""
    n, h, w, cin = x.shape
    oh, ow = h - kh + 1, w - kw + 1
    # TODO(synk): for large inputs fold the (dy,dx) patch loop into the kernel
    # K axis instead of materializing the im2col tensor in HBM.
    cols = []
    for dy in range(kh):
        for dx in range(kw):
            cols.append(x[:, dy:dy + oh, dx:dx + ow, :])
    patches = jnp.stack(cols, axis=3)                    # (N, OH, OW, KH*KW, Cin)
    a = patches.reshape(n * oh * ow, kh * kw * cin)
    out = matmul_bias_act(a, b_mat, bias, activation="relu",
                          out_dtype=jnp.bfloat16)
    return out.reshape(n, oh, ow, b_mat.shape[1])


def maxpool2x2(x):
    """2x2 / stride-2 max pool.  x: (N, H, W, C) with H, W even."""
    n, h, w, c = x.shape
    oh, ow = h // 2, w // 2
    wins = [x[:, dy::2, dx::2, :] for dy in range(2) for dx in range(2)]
    total = n * oh * ow * c
    if total % 128 == 0:                 # lane-dense slab for unmasked stores
        rows, lanes = total // 128, 128
    else:
        rows, lanes = n * oh * ow, c
    wins = [wi.reshape(rows, lanes) for wi in wins]
    out = pl.pallas_call(                # tensors are tiny -> single block
        max4_kernel,
        out_shape=jax.ShapeDtypeStruct((rows, lanes), x.dtype),
    )(*wins)
    return out.reshape(n, oh, ow, c)


# ----------------------------------------------------------------------------
# Lenet5 parameters + forward
# ----------------------------------------------------------------------------

def init_params(key, num_classes=10):
    ks = jax.random.split(key, 10)

    def uniform(k, shape, fan_in):       # PyTorch-style default init scale
        bound = 1.0 / math.sqrt(fan_in)
        return jax.random.uniform(k, shape, jnp.float32, -bound, bound)

    w1 = uniform(ks[0], (64, 3, 5, 5), 3 * 5 * 5)
    b1 = uniform(ks[1], (64,), 3 * 5 * 5)
    w2 = uniform(ks[2], (64, 64, 5, 5), 64 * 5 * 5)
    b2 = uniform(ks[3], (64,), 64 * 5 * 5)
    fc1_w = uniform(ks[4], (384, 1600), 1600)
    fc1_b = uniform(ks[5], (384,), 1600)
    fc2_w = uniform(ks[6], (192, 384), 384)
    fc2_b = uniform(ks[7], (192,), 384)
    fc3_w = uniform(ks[8], (num_classes, 192), 192)
    fc3_b = uniform(ks[9], (num_classes,), 192)

    def conv_mat(w):
        # (Cout, Cin, KH, KW) -> (KH*KW*Cin, Cout) matching im2col patch order.
        cout, cin, khh, kww = w.shape
        return (jnp.transpose(w, (2, 3, 1, 0))
                   .reshape(khh * kww * cin, cout).astype(jnp.bfloat16))

    # fc1 weight columns pre-permuted so it consumes the NHWC flatten with the
    # same semantics as PyTorch's NCHW x.view(-1, 64*5*5) @ fc1.weight.T.
    fc1_mat = (fc1_w.reshape(384, 64, 5, 5)
                    .transpose(2, 3, 1, 0)              # (5, 5, 64, 384)
                    .reshape(1600, 384).astype(jnp.bfloat16))

    nc_pad = _round_up(num_classes, 128)
    fc3_mat = (jnp.zeros((192, nc_pad), jnp.float32)
               .at[:, :num_classes].set(fc3_w.T).astype(jnp.bfloat16))
    fc3_bias = jnp.zeros((1, nc_pad), jnp.float32).at[0, :num_classes].set(fc3_b)

    return {
        "conv1_mat": conv_mat(w1), "conv1_b": b1.reshape(1, 64),
        "conv2_mat": conv_mat(w2), "conv2_b": b2.reshape(1, 64),
        "fc1_mat": fc1_mat, "fc1_b": fc1_b.reshape(1, 384),
        "fc2_mat": fc2_w.T.astype(jnp.bfloat16), "fc2_b": fc2_b.reshape(1, 192),
        "fc3_mat": fc3_mat, "fc3_b": fc3_bias,
    }


def lenet5_forward(params, x_nchw, num_classes=10):
    # NCHW (PyTorch) -> NHWC, cast once to bf16 for the MXU operands.
    x = jnp.transpose(x_nchw, (0, 2, 3, 1)).astype(jnp.bfloat16)

    x = conv2d_bias_relu(x, params["conv1_mat"], params["conv1_b"], 5, 5)  # (N,28,28,64)
    x = maxpool2x2(x)                                                      # (N,14,14,64)
    x = conv2d_bias_relu(x, params["conv2_mat"], params["conv2_b"], 5, 5)  # (N,10,10,64)
    x = maxpool2x2(x)                                                      # (N, 5, 5,64)

    n = x.shape[0]
    feat = x.reshape(n, 5 * 5 * 64)      # fc1_mat is pre-permuted to match

    h1 = matmul_bias_act(feat, params["fc1_mat"], params["fc1_b"],
                         activation="relu")
    h2 = matmul_bias_act(h1, params["fc2_mat"], params["fc2_b"],
                         activation="relu")
    logp = matmul_bias_act(h2, params["fc3_mat"], params["fc3_b"],
                           activation="log_softmax", valid_n=num_classes,
                           out_dtype=jnp.float32)                 # fused fc3+log_softmax
    return logp[:, :num_classes]


# ----------------------------------------------------------------------------
# main
# ----------------------------------------------------------------------------

if __name__ == "__main__":
    key = jax.random.PRNGKey(0)
    pkey, xkey = jax.random.split(key)

    params = init_params(pkey, num_classes=10)
    # CIFAR-shaped input (the 64*5*5 flatten implies 3x32x32), batch=2, NCHW.
    x = jax.random.normal(xkey, (2, 3, 32, 32), jnp.float32)

    fwd = jax.jit(lenet5_forward)
    logits = fwd(params, x)
    jax.block_until_ready(logits)

    assert logits.shape == (2, 10), logits.shape
    assert bool(jnp.all(jnp.isfinite(logits)))
    # log_softmax rows must exponentiate-sum to 1 (computed in f32 in-kernel).
    row_sums = jnp.exp(logits).sum(axis=-1)
    assert bool(jnp.allclose(row_sums, 1.0, atol=1e-3)), row_sums
    print("KERNEL_OK")
</pallas_src>

<mosaic_0001>
module attributes {stable_mosaic.version = 11 : i64} {
  func.func @matmul_bias_act_kernel(%arg0: i32, %arg1: memref<392x75xbf16, #tpu.memory_space<vmem>>, %arg2: memref<75x64xbf16, #tpu.memory_space<vmem>>, %arg3: memref<1x64xf32, #tpu.memory_space<vmem>>, %arg4: memref<392x64xbf16, #tpu.memory_space<vmem>>) attributes {dimension_semantics = [#tpu.dimension_semantics<parallel>], iteration_bounds = array<i64: 4>, scalar_prefetch = 0 : i64, scratch_operands = 0 : i64, tpu.core_type = #tpu.core_type<tc>, window_params = [{transform_indices = @transform_0, window_bounds = array<i64: 392, 75>}, {pipeline_mode = #tpu.pipeline_mode<synchronous>, transform_indices = @transform_1, window_bounds = array<i64: 75, 64>}, {pipeline_mode = #tpu.pipeline_mode<synchronous>, transform_indices = @transform_2, window_bounds = array<i64: 1, 64>}, {transform_indices = @transform_3, window_bounds = array<i64: 392, 64>}]} {
    %c0 = arith.constant 0 : index
    %c0_0 = arith.constant 0 : index
    %0 = vector.load %arg1[%c0, %c0_0] : memref<392x75xbf16, #tpu.memory_space<vmem>>, vector<392x75xbf16>
    %c0_1 = arith.constant 0 : index
    %c0_2 = arith.constant 0 : index
    %1 = vector.load %arg2[%c0_1, %c0_2] : memref<75x64xbf16, #tpu.memory_space<vmem>>, vector<75x64xbf16>
    %cst = arith.constant dense<0.000000e+00> : vector<392x64xf32>
    %2 = tpu.matmul %0, %1, %cst {dimension_numbers = #tpu.dot_dimension_numbers<[1], [0], [0], [1], [0, 0, 1, 1], [], []>} : vector<392x75xbf16>, vector<75x64xbf16>, vector<392x64xf32> -> vector<392x64xf32>
    %c0_3 = arith.constant 0 : index
    %c0_4 = arith.constant 0 : index
    %3 = vector.load %arg3[%c0_3, %c0_4] : memref<1x64xf32, #tpu.memory_space<vmem>>, vector<1x64xf32>
    %4 = vector.broadcast %3 : vector<1x64xf32> to vector<392x64xf32>
    %5 = arith.addf %2, %4 : vector<392x64xf32>
    %cst_5 = arith.constant 0.000000e+00 : f32
    %6 = vector.broadcast %cst_5 : f32 to vector<392x64xf32>
    %7 = arith.maximumf %5, %6 : vector<392x64xf32>
    %8 = arith.truncf %7 : vector<392x64xf32> to vector<392x64xbf16>
    %c0_6 = arith.constant 0 : index
    %c0_7 = arith.constant 0 : index
    %9 = vector.load %arg4[%c0_6, %c0_7] : memref<392x64xbf16, #tpu.memory_space<vmem>>, vector<392x64xbf16>
    tpu.vector_store %arg4[%c0_6, %c0_7], %8 {strides = array<i32>} : memref<392x64xbf16, #tpu.memory_space<vmem>>, vector<392x64xbf16>,
    return
  }
  func.func @transform_0(%arg0: i32) -> (i32, i32) {
    %c0_i32 = arith.constant 0 : i32
    %c0_i32_0 = arith.constant 0 : i32
    return %arg0, %c0_i32 : i32, i32
  }
  func.func @transform_1(%arg0: i32) -> (i32, i32) {
    %c0_i32 = arith.constant 0 : i32
    %c0_i32_0 = arith.constant 0 : i32
    %c0_i32_1 = arith.constant 0 : i32
    return %c0_i32, %c0_i32_0 : i32, i32
  }
  func.func @transform_2(%arg0: i32) -> (i32, i32) {
    %c0_i32 = arith.constant 0 : i32
    %c0_i32_0 = arith.constant 0 : i32
    %c0_i32_1 = arith.constant 0 : i32
    return %c0_i32, %c0_i32_0 : i32, i32
  }
  func.func @transform_3(%arg0: i32) -> (i32, i32) {
    %c0_i32 = arith.constant 0 : i32
    %c0_i32_0 = arith.constant 0 : i32
    return %arg0, %c0_i32 : i32, i32
  }
}

module attributes {stable_mosaic.version = 11 : i64} {
  func.func @max4_kernel(%arg0: memref<196x128xbf16, #tpu.memory_space<vmem>>, %arg1: memref<196x128xbf16, #tpu.memory_space<vmem>>, %arg2: memref<196x128xbf16, #tpu.memory_space<vmem>>, %arg3: memref<196x128xbf16, #tpu.memory_space<vmem>>, %arg4: memref<196x128xbf16, #tpu.memory_space<vmem>>) attributes {dimension_semantics = [], scalar_prefetch = 0 : i64, scratch_operands = 0 : i64, tpu.core_type = #tpu.core_type<tc>} {
    %c0 = arith.constant 0 : index
    %c0_0 = arith.constant 0 : index
    %0 = vector.load %arg0[%c0, %c0_0] : memref<196x128xbf16, #tpu.memory_space<vmem>>, vector<196x128xbf16>
    %c0_1 = arith.constant 0 : index
    %c0_2 = arith.constant 0 : index
    %1 = vector.load %arg1[%c0_1, %c0_2] : memref<196x128xbf16, #tpu.memory_space<vmem>>, vector<196x128xbf16>
    %2 = arith.maximumf %0, %1 : vector<196x128xbf16>
    %c0_3 = arith.constant 0 : index
    %c0_4 = arith.constant 0 : index
    %3 = vector.load %arg2[%c0_3, %c0_4] : memref<196x128xbf16, #tpu.memory_space<vmem>>, vector<196x128xbf16>
    %c0_5 = arith.constant 0 : index
    %c0_6 = arith.constant 0 : index
    %4 = vector.load %arg3[%c0_5, %c0_6] : memref<196x128xbf16, #tpu.memory_space<vmem>>, vector<196x128xbf16>
    %5 = arith.maximumf %3, %4 : vector<196x128xbf16>
    %6 = arith.maximumf %2, %5 : vector<196x128xbf16>
    %c0_7 = arith.constant 0 : index
    %c0_8 = arith.constant 0 : index
    %7 = vector.load %arg4[%c0_7, %c0_8] : memref<196x128xbf16, #tpu.memory_space<vmem>>, vector<196x128xbf16>
    tpu.vector_store %arg4[%c0_7, %c0_8], %6 {strides = array<i32>} : memref<196x128xbf16, #tpu.memory_space<vmem>>, vector<196x128xbf16>,
    return
  }
}

module attributes {stable_mosaic.version = 11 : i64} {
  func.func @matmul_bias_act_kernel(%arg0: i32, %arg1: memref<200x1600xbf16, #tpu.memory_space<vmem>>, %arg2: memref<1600x64xbf16, #tpu.memory_space<vmem>>, %arg3: memref<1x64xf32, #tpu.memory_space<vmem>>, %arg4: memref<200x64xbf16, #tpu.memory_space<vmem>>) attributes {dimension_semantics = [#tpu.dimension_semantics<parallel>], iteration_bounds = array<i64: 1>, scalar_prefetch = 0 : i64, scratch_operands = 0 : i64, tpu.core_type = #tpu.core_type<tc>, window_params = [{transform_indices = @transform_0, window_bounds = array<i64: 200, 1600>}, {pipeline_mode = #tpu.pipeline_mode<synchronous>, transform_indices = @transform_1, window_bounds = array<i64: 1600, 64>}, {pipeline_mode = #tpu.pipeline_mode<synchronous>, transform_indices = @transform_2, window_bounds = array<i64: 1, 64>}, {transform_indices = @transform_3, window_bounds = array<i64: 200, 64>}]} {
    %c0 = arith.constant 0 : index
    %c0_0 = arith.constant 0 : index
    %0 = vector.load %arg1[%c0, %c0_0] : memref<200x1600xbf16, #tpu.memory_space<vmem>>, vector<200x1600xbf16>
    %c0_1 = arith.constant 0 : index
    %c0_2 = arith.constant 0 : index
    %1 = vector.load %arg2[%c0_1, %c0_2] : memref<1600x64xbf16, #tpu.memory_space<vmem>>, vector<1600x64xbf16>
    %cst = arith.constant dense<0.000000e+00> : vector<200x64xf32>
    %2 = tpu.matmul %0, %1, %cst {dimension_numbers = #tpu.dot_dimension_numbers<[1], [0], [0], [1], [0, 0, 1, 1], [], []>} : vector<200x1600xbf16>, vector<1600x64xbf16>, vector<200x64xf32> -> vector<200x64xf32>
    %c0_3 = arith.constant 0 : index
    %c0_4 = arith.constant 0 : index
    %3 = vector.load %arg3[%c0_3, %c0_4] : memref<1x64xf32, #tpu.memory_space<vmem>>, vector<1x64xf32>
    %4 = vector.broadcast %3 : vector<1x64xf32> to vector<200x64xf32>
    %5 = arith.addf %2, %4 : vector<200x64xf32>
    %cst_5 = arith.constant 0.000000e+00 : f32
    %6 = vector.broadcast %cst_5 : f32 to vector<200x64xf32>
    %7 = arith.maximumf %5, %6 : vector<200x64xf32>
    %8 = arith.truncf %7 : vector<200x64xf32> to vector<200x64xbf16>
    %c0_6 = arith.constant 0 : index
    %c0_7 = arith.constant 0 : index
    %9 = vector.load %arg4[%c0_6, %c0_7] : memref<200x64xbf16, #tpu.memory_space<vmem>>, vector<200x64xbf16>
    tpu.vector_store %arg4[%c0_6, %c0_7], %8 {strides = array<i32>} : memref<200x64xbf16, #tpu.memory_space<vmem>>, vector<200x64xbf16>,
    return
  }
  func.func @transform_0(%arg0: i32) -> (i32, i32) {
    %c0_i32 = arith.constant 0 : i32
    %c0_i32_0 = arith.constant 0 : i32
    return %arg0, %c0_i32 : i32, i32
  }
  func.func @transform_1(%arg0: i32) -> (i32, i32) {
    %c0_i32 = arith.constant 0 : i32
    %c0_i32_0 = arith.constant 0 : i32
    %c0_i32_1 = arith.constant 0 : i32
    return %c0_i32, %c0_i32_0 : i32, i32
  }
  func.func @transform_2(%arg0: i32) -> (i32, i32) {
    %c0_i32 = arith.constant 0 : i32
    %c0_i32_0 = arith.constant 0 : i32
    %c0_i32_1 = arith.constant 0 : i32
    return %c0_i32, %c0_i32_0 : i32, i32
  }
  func.func @transform_3(%arg0: i32) -> (i32, i32) {
    %c0_i32 = arith.constant 0 : i32
    %c0_i32_0 = arith.constant 0 : i32
    return %arg0, %c0_i32 : i32, i32
  }
}

module attributes {stable_mosaic.version = 11 : i64} {
  func.func @max4_kernel(%arg0: memref<25x128xbf16, #tpu.memory_space<vmem>>, %arg1: memref<25x128xbf16, #tpu.memory_space<vmem>>, %arg2: memref<25x128xbf16, #tpu.memory_space<vmem>>, %arg3: memref<25x128xbf16, #tpu.memory_space<vmem>>, %arg4: memref<25x128xbf16, #tpu.memory_space<vmem>>) attributes {dimension_semantics = [], scalar_prefetch = 0 : i64, scratch_operands = 0 : i64, tpu.core_type = #tpu.core_type<tc>} {
    %c0 = arith.constant 0 : index
    %c0_0 = arith.constant 0 : index
    %0 = vector.load %arg0[%c0, %c0_0] : memref<25x128xbf16, #tpu.memory_space<vmem>>, vector<25x128xbf16>
    %c0_1 = arith.constant 0 : index
    %c0_2 = arith.constant 0 : index
    %1 = vector.load %arg1[%c0_1, %c0_2] : memref<25x128xbf16, #tpu.memory_space<vmem>>, vector<25x128xbf16>
    %2 = arith.maximumf %0, %1 : vector<25x128xbf16>
    %c0_3 = arith.constant 0 : index
    %c0_4 = arith.constant 0 : index
    %3 = vector.load %arg2[%c0_3, %c0_4] : memref<25x128xbf16, #tpu.memory_space<vmem>>, vector<25x128xbf16>
    %c0_5 = arith.constant 0 : index
    %c0_6 = arith.constant 0 : index
    %4 = vector.load %arg3[%c0_5, %c0_6] : memref<25x128xbf16, #tpu.memory_space<vmem>>, vector<25x128xbf16>
    %5 = arith.maximumf %3, %4 : vector<25x128xbf16>
    %6 = arith.maximumf %2, %5 : vector<25x128xbf16>
    %c0_7 = arith.constant 0 : index
    %c0_8 = arith.constant 0 : index
    %7 = vector.load %arg4[%c0_7, %c0_8] : memref<25x128xbf16, #tpu.memory_space<vmem>>, vector<25x128xbf16>
    tpu.vector_store %arg4[%c0_7, %c0_8], %6 {strides = array<i32>} : memref<25x128xbf16, #tpu.memory_space<vmem>>, vector<25x128xbf16>,
    return
  }
}

module attributes {stable_mosaic.version = 11 : i64} {
  func.func @matmul_bias_act_kernel(%arg0: i32, %arg1: memref<8x1600xbf16, #tpu.memory_space<vmem>>, %arg2: memref<1600x384xbf16, #tpu.memory_space<vmem>>, %arg3: memref<1x384xf32, #tpu.memory_space<vmem>>, %arg4: memref<8x384xbf16, #tpu.memory_space<vmem>>) attributes {dimension_semantics = [#tpu.dimension_semantics<parallel>], iteration_bounds = array<i64: 1>, scalar_prefetch = 0 : i64, scratch_operands = 0 : i64, tpu.core_type = #tpu.core_type<tc>, window_params = [{transform_indices = @transform_0, window_bounds = array<i64: 8, 1600>}, {pipeline_mode = #tpu.pipeline_mode<synchronous>, transform_indices = @transform_1, window_bounds = array<i64: 1600, 384>}, {pipeline_mode = #tpu.pipeline_mode<synchronous>, transform_indices = @transform_2, window_bounds = array<i64: 1, 384>}, {transform_indices = @transform_3, window_bounds = array<i64: 8, 384>}]} {
    %c0 = arith.constant 0 : index
    %c0_0 = arith.constant 0 : index
    %0 = vector.load %arg1[%c0, %c0_0] : memref<8x1600xbf16, #tpu.memory_space<vmem>>, vector<8x1600xbf16>
    %c0_1 = arith.constant 0 : index
    %c0_2 = arith.constant 0 : index
    %1 = vector.load %arg2[%c0_1, %c0_2] : memref<1600x384xbf16, #tpu.memory_space<vmem>>, vector<1600x384xbf16>
    %cst = arith.constant dense<0.000000e+00> : vector<8x384xf32>
    %2 = tpu.matmul %0, %1, %cst {dimension_numbers = #tpu.dot_dimension_numbers<[1], [0], [0], [1], [0, 0, 1, 1], [], []>} : vector<8x1600xbf16>, vector<1600x384xbf16>, vector<8x384xf32> -> vector<8x384xf32>
    %c0_3 = arith.constant 0 : index
    %c0_4 = arith.constant 0 : index
    %3 = vector.load %arg3[%c0_3, %c0_4] : memref<1x384xf32, #tpu.memory_space<vmem>>, vector<1x384xf32>
    %4 = vector.broadcast %3 : vector<1x384xf32> to vector<8x384xf32>
    %5 = arith.addf %2, %4 : vector<8x384xf32>
    %cst_5 = arith.constant 0.000000e+00 : f32
    %6 = vector.broadcast %cst_5 : f32 to vector<8x384xf32>
    %7 = arith.maximumf %5, %6 : vector<8x384xf32>
    %8 = arith.truncf %7 : vector<8x384xf32> to vector<8x384xbf16>
    %c0_6 = arith.constant 0 : index
    %c0_7 = arith.constant 0 : index
    %9 = vector.load %arg4[%c0_6, %c0_7] : memref<8x384xbf16, #tpu.memory_space<vmem>>, vector<8x384xbf16>
    tpu.vector_store %arg4[%c0_6, %c0_7], %8 {strides = array<i32>} : memref<8x384xbf16, #tpu.memory_space<vmem>>, vector<8x384xbf16>,
    return
  }
  func.func @transform_0(%arg0: i32) -> (i32, i32) {
    %c0_i32 = arith.constant 0 : i32
    %c0_i32_0 = arith.constant 0 : i32
    return %arg0, %c0_i32 : i32, i32
  }
  func.func @transform_1(%arg0: i32) -> (i32, i32) {
    %c0_i32 = arith.constant 0 : i32
    %c0_i32_0 = arith.constant 0 : i32
    %c0_i32_1 = arith.constant 0 : i32
    return %c0_i32, %c0_i32_0 : i32, i32
  }
  func.func @transform_2(%arg0: i32) -> (i32, i32) {
    %c0_i32 = arith.constant 0 : i32
    %c0_i32_0 = arith.constant 0 : i32
    %c0_i32_1 = arith.constant 0 : i32
    return %c0_i32, %c0_i32_0 : i32, i32
  }
  func.func @transform_3(%arg0: i32) -> (i32, i32) {
    %c0_i32 = arith.constant 0 : i32
    %c0_i32_0 = arith.constant 0 : i32
    return %arg0, %c0_i32 : i32, i32
  }
}

module attributes {stable_mosaic.version = 11 : i64} {
  func.func @matmul_bias_act_kernel(%arg0: i32, %arg1: memref<8x384xbf16, #tpu.memory_space<vmem>>, %arg2: memref<384x192xbf16, #tpu.memory_space<vmem>>, %arg3: memref<1x192xf32, #tpu.memory_space<vmem>>, %arg4: memref<8x192xbf16, #tpu.memory_space<vmem>>) attributes {dimension_semantics = [#tpu.dimension_semantics<parallel>], iteration_bounds = array<i64: 1>, scalar_prefetch = 0 : i64, scratch_operands = 0 : i64, tpu.core_type = #tpu.core_type<tc>, window_params = [{transform_indices = @transform_0, window_bounds = array<i64: 8, 384>}, {pipeline_mode = #tpu.pipeline_mode<synchronous>, transform_indices = @transform_1, window_bounds = array<i64: 384, 192>}, {pipeline_mode = #tpu.pipeline_mode<synchronous>, transform_indices = @transform_2, window_bounds = array<i64: 1, 192>}, {transform_indices = @transform_3, window_bounds = array<i64: 8, 192>}]} {
    %c0 = arith.constant 0 : index
    %c0_0 = arith.constant 0 : index
    %0 = vector.load %arg1[%c0, %c0_0] : memref<8x384xbf16, #tpu.memory_space<vmem>>, vector<8x384xbf16>
    %c0_1 = arith.constant 0 : index
    %c0_2 = arith.constant 0 : index
    %1 = vector.load %arg2[%c0_1, %c0_2] : memref<384x192xbf16, #tpu.memory_space<vmem>>, vector<384x192xbf16>
    %cst = arith.constant dense<0.000000e+00> : vector<8x192xf32>
    %2 = tpu.matmul %0, %1, %cst {dimension_numbers = #tpu.dot_dimension_numbers<[1], [0], [0], [1], [0, 0, 1, 1], [], []>} : vector<8x384xbf16>, vector<384x192xbf16>, vector<8x192xf32> -> vector<8x192xf32>
    %c0_3 = arith.constant 0 : index
    %c0_4 = arith.constant 0 : index
    %3 = vector.load %arg3[%c0_3, %c0_4] : memref<1x192xf32, #tpu.memory_space<vmem>>, vector<1x192xf32>
    %4 = vector.broadcast %3 : vector<1x192xf32> to vector<8x192xf32>
    %5 = arith.addf %2, %4 : vector<8x192xf32>
    %cst_5 = arith.constant 0.000000e+00 : f32
    %6 = vector.broadcast %cst_5 : f32 to vector<8x192xf32>
    %7 = arith.maximumf %5, %6 : vector<8x192xf32>
    %8 = arith.truncf %7 : vector<8x192xf32> to vector<8x192xbf16>
    %c0_6 = arith.constant 0 : index
    %c0_7 = arith.constant 0 : index
    %9 = vector.load %arg4[%c0_6, %c0_7] : memref<8x192xbf16, #tpu.memory_space<vmem>>, vector<8x192xbf16>
    tpu.vector_store %arg4[%c0_6, %c0_7], %8 {strides = array<i32>} : memref<8x192xbf16, #tpu.memory_space<vmem>>, vector<8x192xbf16>,
    return
  }
  func.func @transform_0(%arg0: i32) -> (i32, i32) {
    %c0_i32 = arith.constant 0 : i32
    %c0_i32_0 = arith.constant 0 : i32
    return %arg0, %c0_i32 : i32, i32
  }
  func.func @transform_1(%arg0: i32) -> (i32, i32) {
    %c0_i32 = arith.constant 0 : i32
    %c0_i32_0 = arith.constant 0 : i32
    %c0_i32_1 = arith.constant 0 : i32
    return %c0_i32, %c0_i32_0 : i32, i32
  }
  func.func @transform_2(%arg0: i32) -> (i32, i32) {
    %c0_i32 = arith.constant 0 : i32
    %c0_i32_0 = arith.constant 0 : i32
    %c0_i32_1 = arith.constant 0 : i32
    return %c0_i32, %c0_i32_0 : i32, i32
  }
  func.func @transform_3(%arg0: i32) -> (i32, i32) {
    %c0_i32 = arith.constant 0 : i32
    %c0_i32_0 = arith.constant 0 : i32
    return %arg0, %c0_i32 : i32, i32
  }
}

module attributes {stable_mosaic.version = 11 : i64} {
  func.func @matmul_bias_act_kernel(%arg0: i32, %arg1: memref<8x192xbf16, #tpu.memory_space<vmem>>, %arg2: memref<192x128xbf16, #tpu.memory_space<vmem>>, %arg3: memref<1x128xf32, #tpu.memory_space<vmem>>, %arg4: memref<8x128xf32, #tpu.memory_space<vmem>>) attributes {dimension_semantics = [#tpu.dimension_semantics<parallel>], iteration_bounds = array<i64: 1>, scalar_prefetch = 0 : i64, scratch_operands = 0 : i64, tpu.core_type = #tpu.core_type<tc>, window_params = [{transform_indices = @transform_0, window_bounds = array<i64: 8, 192>}, {pipeline_mode = #tpu.pipeline_mode<synchronous>, transform_indices = @transform_1, window_bounds = array<i64: 192, 128>}, {pipeline_mode = #tpu.pipeline_mode<synchronous>, transform_indices = @transform_2, window_bounds = array<i64: 1, 128>}, {transform_indices = @transform_3, window_bounds = array<i64: 8, 128>}]} {
    %c0 = arith.constant 0 : index
    %c0_0 = arith.constant 0 : index
    %0 = vector.load %arg1[%c0, %c0_0] : memref<8x192xbf16, #tpu.memory_space<vmem>>, vector<8x192xbf16>
    %c0_1 = arith.constant 0 : index
    %c0_2 = arith.constant 0 : index
    %1 = vector.load %arg2[%c0_1, %c0_2] : memref<192x128xbf16, #tpu.memory_space<vmem>>, vector<192x128xbf16>
    %cst = arith.constant dense<0.000000e+00> : vector<8x128xf32>
    %2 = tpu.matmul %0, %1, %cst {dimension_numbers = #tpu.dot_dimension_numbers<[1], [0], [0], [1], [0, 0, 1, 1], [], []>} : vector<8x192xbf16>, vector<192x128xbf16>, vector<8x128xf32> -> vector<8x128xf32>
    %c0_3 = arith.constant 0 : index
    %c0_4 = arith.constant 0 : index
    %3 = vector.load %arg3[%c0_3, %c0_4] : memref<1x128xf32, #tpu.memory_space<vmem>>, vector<1x128xf32>
    %4 = vector.broadcast %3 : vector<1x128xf32> to vector<8x128xf32>
    %5 = arith.addf %2, %4 : vector<8x128xf32>
    %6 = tpu.iota {dimensions = array<i32: 1>} : vector<8x128xi32>
    %c10_i32 = arith.constant 10 : i32
    %7 = vector.broadcast %c10_i32 : i32 to vector<8x128xi32>
    %8 = arith.cmpi slt, %6, %7 : vector<8x128xi32>
    %cst_5 = arith.constant 0xFF800000 : f32
    %9 = vector.broadcast %cst_5 : f32 to vector<8x128xf32>
    %10 = arith.select %8, %5, %9 : vector<8x128xi1>, vector<8x128xf32>
    %cst_6 = arith.constant dense<0xFF800000> : vector<8xf32>
    %11 = vector.multi_reduction <maximumf>, %10, %cst_6 [1] : vector<8x128xf32> to vector<8xf32>
    %12 = vector.shape_cast %11 : vector<8xf32> to vector<8x1xf32>
    %13 = vector.broadcast %12 : vector<8x1xf32> to vector<8x128xf32>
    %14 = arith.subf %5, %13 : vector<8x128xf32>
    %15 = math.exp %14 : vector<8x128xf32>
    %cst_7 = arith.constant 0.000000e+00 : f32
    %16 = vector.broadcast %cst_7 : f32 to vector<8x128xf32>
    %17 = arith.select %8, %15, %16 : vector<8x128xi1>, vector<8x128xf32>
    %cst_8 = arith.constant dense<0.000000e+00> : vector<8xf32>
    %18 = vector.multi_reduction <add>, %17, %cst_8 [1] : vector<8x128xf32> to vector<8xf32>
    %19 = vector.shape_cast %18 : vector<8xf32> to vector<8x1xf32>
    %20 = math.log %19 : vector<8x1xf32>
    %21 = arith.addf %12, %20 : vector<8x1xf32>
    %22 = vector.broadcast %21 : vector<8x1xf32> to vector<8x128xf32>
    %23 = arith.subf %5, %22 : vector<8x128xf32>
    %c0_9 = arith.constant 0 : index
    %c0_10 = arith.constant 0 : index
    %24 = vector.load %arg4[%c0_9, %c0_10] : memref<8x128xf32, #tpu.memory_space<vmem>>, vector<8x128xf32>
    tpu.vector_store %arg4[%c0_9, %c0_10], %23 {strides = array<i32>} : memref<8x128xf32, #tpu.memory_space<vmem>>, vector<8x128xf32>,
    return
  }
  func.func @transform_0(%arg0: i32) -> (i32, i32) {
    %c0_i32 = arith.constant 0 : i32
    %c0_i32_0 = arith.constant 0 : i32
    return %arg0, %c0_i32 : i32, i32
  }
  func.func @transform_1(%arg0: i32) -> (i32, i32) {
    %c0_i32 = arith.constant 0 : i32
    %c0_i32_0 = arith.constant 0 : i32
    %c0_i32_1 = arith.constant 0 : i32
    return %c0_i32, %c0_i32_0 : i32, i32
  }
  func.func @transform_2(%arg0: i32) -> (i32, i32) {
    %c0_i32 = arith.constant 0 : i32
    %c0_i32_0 = arith.constant 0 : i32
    %c0_i32_1 = arith.constant 0 : i32
    return %c0_i32, %c0_i32_0 : i32, i32
  }
  func.func @transform_3(%arg0: i32) -> (i32, i32) {
    %c0_i32 = arith.constant 0 : i32
    %c0_i32_0 = arith.constant 0 : i32
    return %arg0, %c0_i32 : i32, i32
  }
}

</mosaic_0001>

<bundles_post_ra>
// kernel: lenet5_forward.7
= control target key start
LH: loop header
LB: loop body
LE: loop exit
PB: predicated region body
PF: predicated region fallthrough
CT: control target
= control target key end

     0   :  { %s1445_s12 = smov 0   ;;  %s1750_s0 = inlined_call_operand.vmem [shape: bf16[1568,75], index: 0, kind: input, shape index: {}]   ;;  %s1751_s1 = inlined_call_operand.vmem [shape: bf16[75,64], index: 1, kind: input, shape index: {}]   ;;  %s1752_s2 = inlined_call_operand.vmem [shape: f32[1,64], index: 2, kind: input, shape index: {}]   ;;  %s1753_s3 = inlined_call_operand.vmem [shape: bf16[1568,64], index: 3, kind: output, shape index: {}]  }
   0x1 LB: > { %s1060_s13 = sadd.s32 4294967295, %s1420_s12   ;;  %p1064_p0 = scmp.ge.s32.totalorder %s1420_s12, 1  ;;  %s1420_s12 = sphi %s1445_s12, %s13_s12  }
   0x2   : > { %p138_p1 = scmp.lt.s32.totalorder %s1420_s12, 5 }
   0x4   : > { %p139_p2 = pnand %p1064_p0, %p138_p1 }
   0x5   : > { %v1384_v0 = vld [vmem:[%s1751_s1] sm:$0xff] (!%p139_p2)   ;;  %v1422_v1 = vmov (!%p139_p2), 0.0   ;;  %v1385_v2 = vld [vmem:[%s1751_s1 + $0x8] sm:$0xff] (!%p139_p2)   ;;  %vm469_vm0 = vcmask (!%p139_p2), 1044480   ;;  %s162_s18 = smul.u32 (!%p139_p2), 49, %s1060_s13  ;;  %v1386_v3 = vld [vmem:[%s1751_s1 + $0x10] sm:$0xff] (!%p139_p2)  }
   0x6   : > { %142 = sbr.rel (%p139_p2) target bundleno = 343 (0x157), region = 32  ;;  %1253 = vmatprep.subr.bf16.mxu0 (!%p139_p2), %v1422_v1  ;;  %1363 = vmatprep.subr.bf16.mxu1 (!%p139_p2), %v1422_v1  ;;  %vm470_vm1 = vcmask (!%p139_p2), 1045504   ;;  %v1423_v4 = vmov (!%p139_p2), 65535   ;;  %vm1424_vm2 = vmmov (!%p139_p2), 0   ;;  %v1387_v6 = vld [vmem:[%s1751_s1 + $0x18] sm:$0xff] (!%p139_p2)   ;;  %vm393_vm3 = vcmask (!%p139_p2), 613376  }
   0x7   : > { %1254 = vmatpush3.bf16.msra.mxu0 (!%p139_p2), %v1384_v0  ;;  %1368 = vmatpush3.bf16.msra.mxu1 (!%p139_p2), %v1384_v0  ;;  %p163_p3 = scmp.lt.s32.totalorder (!%p139_p2), %s162_s18, 195  ;;  %v471_v5 = vsel (!%p139_p2), %vm469_vm0, 4294967295, %v1423_v4  ;;  %v1388_v7 = vld [vmem:[%s1751_s1 + $0x20] sm:$0x3f] (!%p139_p2)   ;;  %vm954_vm4 = vcmask (!%p139_p2), 519168  }
   0x8   : > { %1255 = vmatprep.subr.bf16.mxu0 (!%p139_p2), %v1422_v1  ;;  %1364 = vmatprep.subr.bf16.mxu1 (!%p139_p2), %v1422_v1  ;;  %v472_v8 = vsel (!%p139_p2), %vm470_vm1, %v471_v5, 0  ;;  %v1591_v35 = vld [vmem:[%s1752_s2] ss:$0 sm:$0xff] (!%p139_p2) }
   0x9   : > { %1263 = vmatprep.mubr.msk.bf16.mxu0 (!%p139_p2), %vm1424_vm2, %v1422_v1  ;;  %1315 = vmatprep.mubr.msk.bf16.mxu1 (!%p139_p2), %vm1424_vm2, %v1422_v1  ;;  %v474_v9 = vand.u32 (!%p139_p2), %v1388_v7, %v472_v8 }
   0xb   : > { %1256 = vmatpush3.bf16.msra.mxu0 (!%p139_p2), %v1385_v2  ;;  %1369 = vmatpush3.bf16.msra.mxu1 (!%p139_p2), %v1385_v2 }
   0xc   : > { %1257 = vmatprep.subr.bf16.mxu0 (!%p139_p2), %v1422_v1  ;;  %1365 = vmatprep.subr.bf16.mxu1 (!%p139_p2), %v1422_v1 }
   0xd   : > { %s1755_s18 = smov (!%p163_p3, %s162_s18), 195 }
   0xe   : > { %s1065_s25 = sshll.u32 %s1755_s18, 2 }
   0xf   : > { %1258 = vmatpush3.bf16.msra.mxu0 %v1386_v3  ;;  %1370 = vmatpush3.bf16.msra.mxu1 %v1386_v3  ;;  %s1488_s28 = scalar_lea.vmem %s1750_s0, %s1065_s25  ;;  %s1602_s6 = scalar_lea.vmem %s1753_s3, %s1065_s25 }
  0x10   : > { %1259 = vmatprep.subr.bf16.mxu0 %v1422_v1  ;;  %1366 = vmatprep.subr.bf16.mxu1 %v1422_v1  ;;  %v1389_v10 = vld [vmem:[%s1488_s28] sm:$0xff]   ;;  %v1390_v11 = vld [vmem:[%s1488_s28 + $0x68] sm:$0xff]   ;;  %v1392_v13 = vld [vmem:[%s1488_s28 + $0x70] sm:$0xff]  }
  0x11   : > { %v1391_v12 = vld [vmem:[%s1488_s28 + $0x8] sm:$0xff]   ;;  %v1393_v14 = vld [vmem:[%s1488_s28 + $0x10] sm:$0xff]   ;;  %v1394_v15 = vld [vmem:[%s1488_s28 + $0x78] sm:$0xff]  }
  0x12   : > { %v1395_v16 = vld [vmem:[%s1488_s28 + $0x18] sm:$0xff]   ;;  %v1396_v17 = vld [vmem:[%s1488_s28 + $0x80] sm:$0xff]   ;;  %v1398_v19 = vld [vmem:[%s1488_s28 + $0x88] sm:$0xff]  }
  0x13   : > { %1260 = vmatpush3.bf16.msra.mxu0 %v1387_v6  ;;  %1371 = vmatpush3.bf16.msra.mxu1 %v1387_v6  ;;  %v1397_v18 = vld [vmem:[%s1488_s28 + $0x20] sm:$0xff]   ;;  %v1399_v20 = vld [vmem:[%s1488_s28 + $0x28] sm:$0xff]   ;;  %v1400_v21 = vld [vmem:[%s1488_s28 + $0x90] sm:$0xff]  }
  0x14   : > { %1261 = vmatprep.subr.bf16.mxu0 %v1422_v1  ;;  %1367 = vmatprep.subr.bf16.mxu1 %v1422_v1  ;;  %v1401_v22 = vld [vmem:[%s1488_s28 + $0x30] sm:$0xff]   ;;  %v1402_v23 = vld [vmem:[%s1488_s28 + $0x98] sm:$0xff]   ;;  %v1404_v25 = vld [vmem:[%s1488_s28 + $0xa0] sm:$0xff]  }
  0x15   : > { %v1403_v24 = vld [vmem:[%s1488_s28 + $0x38] sm:$0xff]   ;;  %v1405_v26 = vld [vmem:[%s1488_s28 + $0x40] sm:$0xff]   ;;  %v1406_v27 = vld [vmem:[%s1488_s28 + $0xa8] sm:$0xff]  }
  0x16   : > { %v1407_v28 = vld [vmem:[%s1488_s28 + $0x48] sm:$0xff]   ;;  %v1408_v29 = vld [vmem:[%s1488_s28 + $0xb0] sm:$0xff]   ;;  %v1410_v31 = vld [vmem:[%s1488_s28 + $0xb8] sm:$0xff]  }
  0x17   : > { %1262 = vmatpush3.bf16.msra.mxu0 %v474_v9  ;;  %1372 = vmatpush3.bf16.msra.mxu1 %v474_v9  ;;  %v1409_v30 = vld [vmem:[%s1488_s28 + $0x50] sm:$0xff]   ;;  %v1411_v32 = vld [vmem:[%s1488_s28 + $0x58] sm:$0xff]   ;;  %v1412_v33 = vld [vmem:[%s1488_s28 + $0xc0] ss:$0 sps:$4 sm:$0xff]  }
  0x18   : > { %v1413_v34 = vld [vmem:[%s1488_s28 + $0x60] sm:$0xff]  }
  0x1a   : > { %1264 = vmatmul.mubr.msk.bf16.vlgmr.msra.gmra.mrb[0].mxu0 %vm393_vm3, %v1389_v10  ;;  %1316 = vmatmul.mubr.msk.bf16.vlgmr.msra.gmra.mrb[0].mxu1 %vm393_vm3, %v1390_v11 }
  0x1b   : > { %1267 = vmatprep.mubr.msk.bf16.mxu0 %vm1424_vm2, %v1422_v1  ;;  %1319 = vmatprep.mubr.msk.bf16.mxu1 %vm1424_vm2, %v1422_v1 }
  0x22   : > { %1268 = vmatmul.mubr.msk.bf16.gmra.mrb[4].mxu0 %vm393_vm3, %v1391_v12  ;;  %1320 = vmatmul.mubr.msk.bf16.gmra.mrb[4].mxu1 %vm393_vm3, %v1392_v13 }
  0x23   : > { %1271 = vmatprep.mubr.msk.bf16.mxu0 %vm1424_vm2, %v1422_v1  ;;  %1323 = vmatprep.mubr.msk.bf16.mxu1 %vm1424_vm2, %v1422_v1 }
  0x2a   : > { %1272 = vmatmul.mubr.msk.bf16.gmra.mrb[8].mxu0 %vm393_vm3, %v1393_v14  ;;  %1324 = vmatmul.mubr.msk.bf16.gmra.mrb[8].mxu1 %vm393_vm3, %v1394_v15 }
  0x2b   : > { %1275 = vmatprep.mubr.msk.bf16.mxu0 %vm1424_vm2, %v1422_v1  ;;  %1327 = vmatprep.mubr.msk.bf16.mxu1 %vm1424_vm2, %v1422_v1 }
  0x32   : > { %1276 = vmatmul.mubr.msk.bf16.gmra.mrb[12].mxu0 %vm393_vm3, %v1395_v16  ;;  %1328 = vmatmul.mubr.msk.bf16.gmra.mrb[12].mxu1 %vm393_vm3, %v1396_v17 }
  0x33   : > { %1279 = vmatprep.mubr.msk.bf16.mxu0 %vm1424_vm2, %v1422_v1  ;;  %1331 = vmatprep.mubr.msk.bf16.mxu1 %vm1424_vm2, %v1422_v1 }
  0x3a   : > { %1280 = vmatmul.mubr.msk.bf16.gmra.mrb[16].mxu0 %vm393_vm3, %v1397_v18  ;;  %1332 = vmatmul.mubr.msk.bf16.gmra.mrb[16].mxu1 %vm393_vm3, %v1398_v19 }
  0x3b   : > { %1283 = vmatprep.mubr.msk.bf16.mxu0 %vm1424_vm2, %v1422_v1  ;;  %1335 = vmatprep.mubr.msk.bf16.mxu1 %vm1424_vm2, %v1422_v1 }
  0x42   : > { %1284 = vmatmul.mubr.msk.bf16.gmra.mrb[20].mxu0 %vm393_vm3, %v1399_v20  ;;  %1336 = vmatmul.mubr.msk.bf16.gmra.mrb[20].mxu1 %vm393_vm3, %v1400_v21 }
  0x43   : > { %1287 = vmatprep.mubr.msk.bf16.mxu0 %vm1424_vm2, %v1422_v1  ;;  %1339 = vmatprep.mubr.msk.bf16.mxu1 %vm1424_vm2, %v1422_v1 }
  0x4a   : > { %1288 = vmatmul.mubr.msk.bf16.gmra.mrb[24].mxu0 %vm393_vm3, %v1401_v22  ;;  %1340 = vmatmul.mubr.msk.bf16.gmra.mrb[24].mxu1 %vm393_vm3, %v1402_v23 }
  0x4b   : > { %1291 = vmatprep.mubr.msk.bf16.mxu0 %vm1424_vm2, %v1422_v1  ;;  %1343 = vmatprep.mubr.msk.bf16.mxu1 %vm1424_vm2, %v1422_v1 }
  0x52   : > { %1292 = vmatmul.mubr.msk.bf16.gmra.mrb[28].mxu0 %vm393_vm3, %v1403_v24  ;;  %1344 = vmatmul.mubr.msk.bf16.gmra.mrb[28].mxu1 %vm393_vm3, %v1404_v25 }
  0x53   : > { %1295 = vmatprep.mubr.msk.bf16.mxu0 %vm1424_vm2, %v1422_v1  ;;  %1347 = vmatprep.mubr.msk.bf16.mxu1 %vm1424_vm2, %v1422_v1 }
  0x5a   : > { %1296 = vmatmul.mubr.msk.bf16.gmra.mrb[32].mxu0 %vm393_vm3, %v1405_v26  ;;  %1348 = vmatmul.mubr.msk.bf16.gmra.mrb[32].mxu1 %vm393_vm3, %v1406_v27 }
  0x5b   : > { %1299 = vmatprep.mubr.msk.bf16.mxu0 %vm1424_vm2, %v1422_v1  ;;  %1351 = vmatprep.mubr.msk.bf16.mxu1 %vm1424_vm2, %v1422_v1 }
  0x62   : > { %1300 = vmatmul.mubr.msk.bf16.gmra.mrb[36].mxu0 %vm393_vm3, %v1407_v28  ;;  %1352 = vmatmul.mubr.msk.bf16.gmra.mrb[36].mxu1 %vm393_vm3, %v1408_v29 }
  0x63   : > { %1303 = vmatprep.mubr.msk.bf16.mxu0 %vm1424_vm2, %v1422_v1  ;;  %1355 = vmatprep.mubr.msk.bf16.mxu1 %vm1424_vm2, %v1422_v1 }
  0x6a   : > { %1304 = vmatmul.mubr.msk.bf16.gmra.mrb[40].mxu0 %vm393_vm3, %v1409_v30  ;;  %1356 = vmatmul.mubr.msk.bf16.gmra.mrb[40].mxu1 %vm393_vm3, %v1410_v31 }
  0x6b   : > { %1307 = vmatprep.mubr.msk.bf16.mxu0 %vm1424_vm2, %v1422_v1  ;;  %1359 = vmatprep.mubr.msk.bf16.mxu1 %vm1424_vm2, %v1422_v1 }
  0x72   : > { %1308 = vmatmul.mubr.msk.bf16.gmra.mrb[44].mxu0 %vm393_vm3, %v1411_v32  ;;  %1360 = vmatmul.mubr.msk.bf16.gmra.mrb[44].mxu1 %vm393_vm3, %v1412_v33 }
  0x73   : > { %1311 = vmatprep.mubr.msk.bf16.mxu0 %vm1424_vm2, %v1422_v1 }
  0x7a   : > { %1312 = vmatmul.mubr.msk.bf16.gmra.mrb[48].mxu0 %vm393_vm3, %v1413_v34 }
  0xed   : > { %v510_v36 = vpop.f32.mrb[0].mxu0  ;;  %v614_v37 = vpop.f32.mrb[0].mxu1 }
  0xee   : > { %v511_v38 = vadd.f32 %v1591_v35, %v510_v36  ;;  %v1265_v39 = vpop.f32.mrb[1].mxu0  ;;  %v615_v40 = vadd.f32 %v1591_v35, %v614_v37  ;;  %v1317_v41 = vpop.f32.mrb[1].mxu1 }
  0xef   : > { %v513_v42 = vpop.f32.mrb[2].mxu0  ;;  %v617_v43 = vpop.f32.mrb[2].mxu1 }
  0xf0   : > { %v708_v44 = vmax.f32 %v511_v38, 0.0  ;;  %v514_v45 = vadd.f32 %v1591_v35, %v513_v42  ;;  %v1266_v46 = vpop.f32.mrb[3].mxu0  ;;  %v734_v47 = vmax.f32 %v615_v40, 0.0  ;;  %v618_v48 = vadd.f32 %v1591_v35, %v617_v43  ;;  %v1318_v49 = vpop.f32.mrb[3].mxu1 }
  0xf2   : > { %v1174_v50 = vpack.c.bf16 %v708_v44, %v708_v44  ;;  %v709_v51 = vmax.f32 %v514_v45, 0.0  ;;  %v1200_v52 = vpack.c.bf16 %v734_v47, %v734_v47  ;;  %v735_v53 = vmax.f32 %v618_v48, 0.0 }
  0xf4   : > { %955 = vst.msk [vmem:[%s1602_s6] sm:$0xf] %vm954_vm4, %v1174_v50  ;;  %v1175_v54 = vpack.c.bf16 %v709_v51, %v709_v51  ;;  %981 = vst.msk [vmem:[%s1602_s6 + $0x68] sm:$0xf] %vm954_vm4, %v1200_v52  ;;  %v1201_v55 = vpack.c.bf16 %v735_v53, %v735_v53 }
  0xf5   : > { %v518_v56 = vpop.f32.mrb[4].mxu0  ;;  %v622_v57 = vpop.f32.mrb[4].mxu1 }
  0xf6   : > { %956 = vst.msk [vmem:[%s1602_s6 + $0x4] sm:$0xf] %vm954_vm4, %v1175_v54  ;;  %v519_v58 = vadd.f32 %v1591_v35, %v518_v56  ;;  %v1269_v59 = vpop.f32.mrb[5].mxu0  ;;  %982 = vst.msk [vmem:[%s1602_s6 + $0x6c] sm:$0xf] %vm954_vm4, %v1201_v55  ;;  %v623_v60 = vadd.f32 %v1591_v35, %v622_v57  ;;  %v1321_v61 = vpop.f32.mrb[5].mxu1 }
  0xf7   : > { %v521_v62 = vpop.f32.mrb[6].mxu0  ;;  %v625_v63 = vpop.f32.mrb[6].mxu1 }
  0xf8   : > { %v710_v0 = vmax.f32 %v519_v58, 0.0  ;;  %v522_v1 = vadd.f32 %v1591_v35, %v521_v62  ;;  %v1270_v2 = vpop.f32.mrb[7].mxu0  ;;  %v736_v3 = vmax.f32 %v623_v60, 0.0  ;;  %v626_v4 = vadd.f32 %v1591_v35, %v625_v63  ;;  %v1322_v5 = vpop.f32.mrb[7].mxu1 }
  0xfa   : > { %v1176_v6 = vpack.c.bf16 %v710_v0, %v710_v0  ;;  %v711_v7 = vmax.f32 %v522_v1, 0.0  ;;  %v1202_v8 = vpack.c.bf16 %v736_v3, %v736_v3  ;;  %v737_v9 = vmax.f32 %v626_v4, 0.0 }
  0xfc   : > { %957 = vst.msk [vmem:[%s1602_s6 + $0x8] sm:$0xf] %vm954_vm4, %v1176_v6  ;;  %v1177_v10 = vpack.c.bf16 %v711_v7, %v711_v7  ;;  %983 = vst.msk [vmem:[%s1602_s6 + $0x70] sm:$0xf] %vm954_vm4, %v1202_v8  ;;  %v1203_v11 = vpack.c.bf16 %v737_v9, %v737_v9 }
  0xfd   : > { %v526_v12 = vpop.f32.mrb[8].mxu0  ;;  %v630_v13 = vpop.f32.mrb[8].mxu1 }
  0xfe   : > { %958 = vst.msk [vmem:[%s1602_s6 + $0xc] sm:$0xf] %vm954_vm4, %v1177_v10  ;;  %v527_v14 = vadd.f32 %v1591_v35, %v526_v12  ;;  %v1273_v15 = vpop.f32.mrb[9].mxu0  ;;  %984 = vst.msk [vmem:[%s1602_s6 + $0x74] sm:$0xf] %vm954_vm4, %v1203_v11  ;;  %v631_v16 = vadd.f32 %v1591_v35, %v630_v13  ;;  %v1325_v17 = vpop.f32.mrb[9].mxu1 }
  0xff   : > { %v529_v18 = vpop.f32.mrb[10].mxu0  ;;  %v633_v19 = vpop.f32.mrb[10].mxu1 }
 0x100   : > { %v712_v20 = vmax.f32 %v527_v14, 0.0  ;;  %v530_v21 = vadd.f32 %v1591_v35, %v529_v18  ;;  %v1274_v22 = vpop.f32.mrb[11].mxu0  ;;  %v738_v23 = vmax.f32 %v631_v16, 0.0  ;;  %v634_v24 = vadd.f32 %v1591_v35, %v633_v19  ;;  %v1326_v25 = vpop.f32.mrb[11].mxu1 }
 0x102   : > { %v1178_v26 = vpack.c.bf16 %v712_v20, %v712_v20  ;;  %v713_v27 = vmax.f32 %v530_v21, 0.0  ;;  %v1204_v28 = vpack.c.bf16 %v738_v23, %v738_v23  ;;  %v739_v29 = vmax.f32 %v634_v24, 0.0 }
 0x104   : > { %959 = vst.msk [vmem:[%s1602_s6 + $0x10] sm:$0xf] %vm954_vm4, %v1178_v26  ;;  %v1179_v30 = vpack.c.bf16 %v713_v27, %v713_v27  ;;  %985 = vst.msk [vmem:[%s1602_s6 + $0x78] sm:$0xf] %vm954_vm4, %v1204_v28  ;;  %v1205_v31 = vpack.c.bf16 %v739_v29, %v739_v29 }
 0x105   : > { %v534_v32 = vpop.f32.mrb[12].mxu0  ;;  %v638_v33 = vpop.f32.mrb[12].mxu1 }
 0x106   : > { %960 = vst.msk [vmem:[%s1602_s6 + $0x14] sm:$0xf] %vm954_vm4, %v1179_v30  ;;  %v535_v34 = vadd.f32 %v1591_v35, %v534_v32  ;;  %v1277_v36 = vpop.f32.mrb[13].mxu0  ;;  %986 = vst.msk [vmem:[%s1602_s6 + $0x7c] sm:$0xf] %vm954_vm4, %v1205_v31  ;;  %v639_v37 = vadd.f32 %v1591_v35, %v638_v33  ;;  %v1329_v38 = vpop.f32.mrb[13].mxu1 }
 0x107   : > { %v537_v39 = vpop.f32.mrb[14].mxu0  ;;  %v641_v40 = vpop.f32.mrb[14].mxu1 }
 0x108   : > { %v714_v41 = vmax.f32 %v535_v34, 0.0  ;;  %v538_v42 = vadd.f32 %v1591_v35, %v537_v39  ;;  %v1278_v43 = vpop.f32.mrb[15].mxu0  ;;  %v740_v44 = vmax.f32 %v639_v37, 0.0  ;;  %v642_v45 = vadd.f32 %v1591_v35, %v641_v40  ;;  %v1330_v46 = vpop.f32.mrb[15].mxu1 }
 0x10a   : > { %v1180_v47 = vpack.c.bf16 %v714_v41, %v714_v41  ;;  %v715_v48 = vmax.f32 %v538_v42, 0.0  ;;  %v1206_v49 = vpack.c.bf16 %v740_v44, %v740_v44  ;;  %v741_v50 = vmax.f32 %v642_v45, 0.0 }
 0x10c   : > { %961 = vst.msk [vmem:[%s1602_s6 + $0x18] sm:$0xf] %vm954_vm4, %v1180_v47  ;;  %v1181_v51 = vpack.c.bf16 %v715_v48, %v715_v48  ;;  %987 = vst.msk [vmem:[%s1602_s6 + $0x80] sm:$0xf] %vm954_vm4, %v1206_v49  ;;  %v1207_v52 = vpack.c.bf16 %v741_v50, %v741_v50 }
 0x10d   : > { %v542_v53 = vpop.f32.mrb[16].mxu0  ;;  %v646_v54 = vpop.f32.mrb[16].mxu1 }
 0x10e   : > { %962 = vst.msk [vmem:[%s1602_s6 + $0x1c] sm:$0xf] %vm954_vm4, %v1181_v51  ;;  %v543_v55 = vadd.f32 %v1591_v35, %v542_v53  ;;  %v1281_v56 = vpop.f32.mrb[17].mxu0  ;;  %988 = vst.msk [vmem:[%s1602_s6 + $0x84] sm:$0xf] %vm954_vm4, %v1207_v52  ;;  %v647_v57 = vadd.f32 %v1591_v35, %v646_v54  ;;  %v1333_v58 = vpop.f32.mrb[17].mxu1 }
 0x10f   : > { %v545_v59 = vpop.f32.mrb[18].mxu0  ;;  %v649_v60 = vpop.f32.mrb[18].mxu1 }
 0x110   : > { %v716_v61 = vmax.f32 %v543_v55, 0.0  ;;  %v546_v62 = vadd.f32 %v1591_v35, %v545_v59  ;;  %v1282_v63 = vpop.f32.mrb[19].mxu0  ;;  %v742_v0 = vmax.f32 %v647_v57, 0.0  ;;  %v650_v1 = vadd.f32 %v1591_v35, %v649_v60  ;;  %v1334_v2 = vpop.f32.mrb[19].mxu1 }
 0x112   : > { %v1182_v3 = vpack.c.bf16 %v716_v61, %v716_v61  ;;  %v717_v4 = vmax.f32 %v546_v62, 0.0  ;;  %v1208_v5 = vpack.c.bf16 %v742_v0, %v742_v0  ;;  %v743_v6 = vmax.f32 %v650_v1, 0.0 }
 0x114   : > { %963 = vst.msk [vmem:[%s1602_s6 + $0x20] sm:$0xf] %vm954_vm4, %v1182_v3  ;;  %v1183_v7 = vpack.c.bf16 %v717_v4, %v717_v4  ;;  %989 = vst.msk [vmem:[%s1602_s6 + $0x88] sm:$0xf] %vm954_vm4, %v1208_v5  ;;  %v1209_v8 = vpack.c.bf16 %v743_v6, %v743_v6 }
 0x115   : > { %v550_v9 = vpop.f32.mrb[20].mxu0  ;;  %v654_v10 = vpop.f32.mrb[20].mxu1 }
 0x116   : > { %964 = vst.msk [vmem:[%s1602_s6 + $0x24] sm:$0xf] %vm954_vm4, %v1183_v7  ;;  %v551_v11 = vadd.f32 %v1591_v35, %v550_v9  ;;  %v1285_v12 = vpop.f32.mrb[21].mxu0  ;;  %990 = vst.msk [vmem:[%s1602_s6 + $0x8c] sm:$0xf] %vm954_vm4, %v1209_v8  ;;  %v655_v13 = vadd.f32 %v1591_v35, %v654_v10  ;;  %v1337_v14 = vpop.f32.mrb[21].mxu1 }
 0x117   : > { %v553_v15 = vpop.f32.mrb[22].mxu0  ;;  %v657_v16 = vpop.f32.mrb[22].mxu1 }
 0x118   : > { %v718_v17 = vmax.f32 %v551_v11, 0.0  ;;  %v554_v18 = vadd.f32 %v1591_v35, %v553_v15  ;;  %v1286_v19 = vpop.f32.mrb[23].mxu0  ;;  %v744_v20 = vmax.f32 %v655_v13, 0.0  ;;  %v658_v21 = vadd.f32 %v1591_v35, %v657_v16  ;;  %v1338_v22 = vpop.f32.mrb[23].mxu1 }
 0x11a   : > { %v1184_v23 = vpack.c.bf16 %v718_v17, %v718_v17  ;;  %v719_v24 = vmax.f32 %v554_v18, 0.0  ;;  %v1210_v25 = vpack.c.bf16 %v744_v20, %v744_v20  ;;  %v745_v26 = vmax.f32 %v658_v21, 0.0 }
 0x11c   : > { %965 = vst.msk [vmem:[%s1602_s6 + $0x28] sm:$0xf] %vm954_vm4, %v1184_v23  ;;  %v1185_v27 = vpack.c.bf16 %v719_v24, %v719_v24  ;;  %991 = vst.msk [vmem:[%s1602_s6 + $0x90] sm:$0xf] %vm954_vm4, %v1210_v25  ;;  %v1211_v28 = vpack.c.bf16 %v745_v26, %v745_v26 }
 0x11d   : > { %v558_v29 = vpop.f32.mrb[24].mxu0  ;;  %v662_v30 = vpop.f32.mrb[24].mxu1 }
 0x11e   : > { %966 = vst.msk [vmem:[%s1602_s6 + $0x2c] sm:$0xf] %vm954_vm4, %v1185_v27  ;;  %v559_v31 = vadd.f32 %v1591_v35, %v558_v29  ;;  %v1289_v32 = vpop.f32.mrb[25].mxu0  ;;  %992 = vst.msk [vmem:[%s1602_s6 + $0x94] sm:$0xf] %vm954_vm4, %v1211_v28  ;;  %v663_v33 = vadd.f32 %v1591_v35, %v662_v30  ;;  %v1341_v34 = vpop.f32.mrb[25].mxu1 }
 0x11f   : > { %v561_v36 = vpop.f32.mrb[26].mxu0  ;;  %v665_v37 = vpop.f32.mrb[26].mxu1 }
 0x120   : > { %v720_v38 = vmax.f32 %v559_v31, 0.0  ;;  %v562_v39 = vadd.f32 %v1591_v35, %v561_v36  ;;  %v1290_v40 = vpop.f32.mrb[27].mxu0  ;;  %v746_v41 = vmax.f32 %v663_v33, 0.0  ;;  %v666_v42 = vadd.f32 %v1591_v35, %v665_v37  ;;  %v1342_v43 = vpop.f32.mrb[27].mxu1 }
 0x122   : > { %v1186_v44 = vpack.c.bf16 %v720_v38, %v720_v38  ;;  %v721_v45 = vmax.f32 %v562_v39, 0.0  ;;  %v1212_v46 = vpack.c.bf16 %v746_v41, %v746_v41  ;;  %v747_v47 = vmax.f32 %v666_v42, 0.0 }
 0x124   : > { %967 = vst.msk [vmem:[%s1602_s6 + $0x30] sm:$0xf] %vm954_vm4, %v1186_v44  ;;  %v1187_v48 = vpack.c.bf16 %v721_v45, %v721_v45  ;;  %993 = vst.msk [vmem:[%s1602_s6 + $0x98] sm:$0xf] %vm954_vm4, %v1212_v46  ;;  %v1213_v49 = vpack.c.bf16 %v747_v47, %v747_v47 }
 0x125   : > { %v566_v50 = vpop.f32.mrb[28].mxu0  ;;  %v670_v51 = vpop.f32.mrb[28].mxu1 }
 0x126   : > { %968 = vst.msk [vmem:[%s1602_s6 + $0x34] sm:$0xf] %vm954_vm4, %v1187_v48  ;;  %v567_v52 = vadd.f32 %v1591_v35, %v566_v50  ;;  %v1293_v53 = vpop.f32.mrb[29].mxu0  ;;  %994 = vst.msk [vmem:[%s1602_s6 + $0x9c] sm:$0xf] %vm954_vm4, %v1213_v49  ;;  %v671_v54 = vadd.f32 %v1591_v35, %v670_v51  ;;  %v1345_v55 = vpop.f32.mrb[29].mxu1 }
 0x127   : > { %v569_v56 = vpop.f32.mrb[30].mxu0  ;;  %v673_v57 = vpop.f32.mrb[30].mxu1 }
 0x128   : > { %v722_v58 = vmax.f32 %v567_v52, 0.0  ;;  %v570_v59 = vadd.f32 %v1591_v35, %v569_v56  ;;  %v1294_v60 = vpop.f32.mrb[31].mxu0  ;;  %v748_v61 = vmax.f32 %v671_v54, 0.0  ;;  %v674_v62 = vadd.f32 %v1591_v35, %v673_v57  ;;  %v1346_v63 = vpop.f32.mrb[31].mxu1 }
 0x12a   : > { %v1188_v0 = vpack.c.bf16 %v722_v58, %v722_v58  ;;  %v723_v1 = vmax.f32 %v570_v59, 0.0  ;;  %v1214_v2 = vpack.c.bf16 %v748_v61, %v748_v61  ;;  %v749_v3 = vmax.f32 %v674_v62, 0.0 }
 0x12c   : > { %969 = vst.msk [vmem:[%s1602_s6 + $0x38] sm:$0xf] %vm954_vm4, %v1188_v0  ;;  %v1189_v4 = vpack.c.bf16 %v723_v1, %v723_v1  ;;  %995 = vst.msk [vmem:[%s1602_s6 + $0xa0] sm:$0xf] %vm954_vm4, %v1214_v2  ;;  %v1215_v5 = vpack.c.bf16 %v749_v3, %v749_v3 }
 0x12d   : > { %v574_v6 = vpop.f32.mrb[32].mxu0  ;;  %v678_v7 = vpop.f32.mrb[32].mxu1 }
 0x12e   : > { %970 = vst.msk [vmem:[%s1602_s6 + $0x3c] sm:$0xf] %vm954_vm4, %v1189_v4  ;;  %v575_v8 = vadd.f32 %v1591_v35, %v574_v6  ;;  %v1297_v9 = vpop.f32.mrb[33].mxu0  ;;  %996 = vst.msk [vmem:[%s1602_s6 + $0xa4] sm:$0xf] %vm954_vm4, %v1215_v5  ;;  %v679_v10 = vadd.f32 %v1591_v35, %v678_v7  ;;  %v1349_v11 = vpop.f32.mrb[33].mxu1 }
 0x12f   : > { %v577_v12 = vpop.f32.mrb[34].mxu0  ;;  %v681_v13 = vpop.f32.mrb[34].mxu1 }
 0x130   : > { %v724_v14 = vmax.f32 %v575_v8, 0.0  ;;  %v578_v15 = vadd.f32 %v1591_v35, %v577_v12  ;;  %v1298_v16 = vpop.f32.mrb[35].mxu0  ;;  %v750_v17 = vmax.f32 %v679_v10, 0.0  ;;  %v682_v18 = vadd.f32 %v1591_v35, %v681_v13  ;;  %v1350_v19 = vpop.f32.mrb[35].mxu1 }
 0x132   : > { %v1190_v20 = vpack.c.bf16 %v724_v14, %v724_v14  ;;  %v725_v21 = vmax.f32 %v578_v15, 0.0  ;;  %v1216_v22 = vpack.c.bf16 %v750_v17, %v750_v17  ;;  %v751_v23 = vmax.f32 %v682_v18, 0.0 }
 0x134   : > { %971 = vst.msk [vmem:[%s1602_s6 + $0x40] sm:$0xf] %vm954_vm4, %v1190_v20  ;;  %v1191_v24 = vpack.c.bf16 %v725_v21, %v725_v21  ;;  %997 = vst.msk [vmem:[%s1602_s6 + $0xa8] sm:$0xf] %vm954_vm4, %v1216_v22  ;;  %v1217_v25 = vpack.c.bf16 %v751_v23, %v751_v23 }
 0x135   : > { %v582_v26 = vpop.f32.mrb[36].mxu0  ;;  %v686_v27 = vpop.f32.mrb[36].mxu1 }
 0x136   : > { %972 = vst.msk [vmem:[%s1602_s6 + $0x44] sm:$0xf] %vm954_vm4, %v1191_v24  ;;  %v583_v28 = vadd.f32 %v1591_v35, %v582_v26  ;;  %v1301_v29 = vpop.f32.mrb[37].mxu0  ;;  %998 = vst.msk [vmem:[%s1602_s6 + $0xac] sm:$0xf] %vm954_vm4, %v1217_v25  ;;  %v687_v30 = vadd.f32 %v1591_v35, %v686_v27  ;;  %v1353_v31 = vpop.f32.mrb[37].mxu1 }
 0x137   : > { %v585_v32 = vpop.f32.mrb[38].mxu0  ;;  %v689_v33 = vpop.f32.mrb[38].mxu1 }
 0x138   : > { %v726_v34 = vmax.f32 %v583_v28, 0.0  ;;  %v586_v36 = vadd.f32 %v1591_v35, %v585_v32  ;;  %v1302_v37 = vpop.f32.mrb[39].mxu0  ;;  %v752_v38 = vmax.f32 %v687_v30, 0.0  ;;  %v690_v39 = vadd.f32 %v1591_v35, %v689_v33  ;;  %v1354_v40 = vpop.f32.mrb[39].mxu1 }
 0x13a   : > { %v1192_v41 = vpack.c.bf16 %v726_v34, %v726_v34  ;;  %v727_v42 = vmax.f32 %v586_v36, 0.0  ;;  %v1218_v43 = vpack.c.bf16 %v752_v38, %v752_v38  ;;  %v753_v44 = vmax.f32 %v690_v39, 0.0 }
 0x13c   : > { %973 = vst.msk [vmem:[%s1602_s6 + $0x48] sm:$0xf] %vm954_vm4, %v1192_v41  ;;  %v1193_v45 = vpack.c.bf16 %v727_v42, %v727_v42  ;;  %999 = vst.msk [vmem:[%s1602_s6 + $0xb0] sm:$0xf] %vm954_vm4, %v1218_v43  ;;  %v1219_v46 = vpack.c.bf16 %v753_v44, %v753_v44 }
 0x13d   : > { %v590_v47 = vpop.f32.mrb[40].mxu0  ;;  %v694_v48 = vpop.f32.mrb[40].mxu1 }
 0x13e   : > { %974 = vst.msk [vmem:[%s1602_s6 + $0x4c] sm:$0xf] %vm954_vm4, %v1193_v45  ;;  %v591_v49 = vadd.f32 %v1591_v35, %v590_v47  ;;  %v1305_v50 = vpop.f32.mrb[41].mxu0  ;;  %1000 = vst.msk [vmem:[%s1602_s6 + $0xb4] sm:$0xf] %vm954_vm4, %v1219_v46  ;;  %v695_v51 = vadd.f32 %v1591_v35, %v694_v48  ;;  %v1357_v52 = vpop.f32.mrb[41].mxu1 }
 0x13f   : > { %v593_v53 = vpop.f32.mrb[42].mxu0  ;;  %v697_v54 = vpop.f32.mrb[42].mxu1 }
 0x140   : > { %v728_v55 = vmax.f32 %v591_v49, 0.0  ;;  %v594_v56 = vadd.f32 %v1591_v35, %v593_v53  ;;  %v1306_v57 = vpop.f32.mrb[43].mxu0  ;;  %v754_v58 = vmax.f32 %v695_v51, 0.0  ;;  %v698_v59 = vadd.f32 %v1591_v35, %v697_v54  ;;  %v1358_v60 = vpop.f32.mrb[43].mxu1 }
 0x142   : > { %v1194_v61 = vpack.c.bf16 %v728_v55, %v728_v55  ;;  %v729_v62 = vmax.f32 %v594_v56, 0.0  ;;  %v1220_v63 = vpack.c.bf16 %v754_v58, %v754_v58  ;;  %v755_v0 = vmax.f32 %v698_v59, 0.0 }
 0x144   : > { %975 = vst.msk [vmem:[%s1602_s6 + $0x50] sm:$0xf] %vm954_vm4, %v1194_v61  ;;  %v1195_v1 = vpack.c.bf16 %v729_v62, %v729_v62  ;;  %1001 = vst.msk [vmem:[%s1602_s6 + $0xb8] sm:$0xf] %vm954_vm4, %v1220_v63  ;;  %v1221_v2 = vpack.c.bf16 %v755_v0, %v755_v0 }
 0x145   : > { %v598_v3 = vpop.f32.mrb[44].mxu0  ;;  %v702_v4 = vpop.f32.mrb[44].mxu1 }
 0x146   : > { %976 = vst.msk [vmem:[%s1602_s6 + $0x54] sm:$0xf] %vm954_vm4, %v1195_v1  ;;  %v599_v5 = vadd.f32 %v1591_v35, %v598_v3  ;;  %v1309_v6 = vpop.f32.mrb[45].mxu0  ;;  %1002 = vst.msk [vmem:[%s1602_s6 + $0xbc] sm:$0xf] %vm954_vm4, %v1221_v2  ;;  %v703_v7 = vadd.f32 %v1591_v35, %v702_v4  ;;  %v1361_v8 = vpop.f32.mrb[45].mxu1 }
 0x147   : > { %v601_v9 = vpop.f32.mrb[46].mxu0  ;;  %v705_v10 = vpop.f32.mrb[46].mxu1 }
 0x148   : > { %v730_v11 = vmax.f32 %v599_v5, 0.0  ;;  %v602_v12 = vadd.f32 %v1591_v35, %v601_v9  ;;  %v1310_v13 = vpop.f32.mrb[47].mxu0  ;;  %v756_v14 = vmax.f32 %v703_v7, 0.0  ;;  %v1362_v15 = vpop.f32.mrb[47].mxu1 }
 0x14a   : > { %v1196_v16 = vpack.c.bf16 %v730_v11, %v730_v11  ;;  %v731_v17 = vmax.f32 %v602_v12, 0.0  ;;  %v1222_v18 = vpack.c.bf16 %v756_v14, %v756_v14 }
 0x14c   : > { %977 = vst.msk [vmem:[%s1602_s6 + $0x58] sm:$0xf] %vm954_vm4, %v1196_v16  ;;  %v1197_v19 = vpack.c.bf16 %v731_v17, %v731_v17  ;;  %1003 = vst.msk [vmem:[%s1602_s6 + $0xc0] sm:$0xf] %vm954_vm4, %v1222_v18 }
 0x14d   : > { %v606_v20 = vpop.f32.mrb[48].mxu0 }
 0x14e   : > { %978 = vst.msk [vmem:[%s1602_s6 + $0x5c] sm:$0xf] %vm954_vm4, %v1197_v19  ;;  %v607_v21 = vadd.f32 %v1591_v35, %v606_v20  ;;  %v1313_v22 = vpop.f32.mrb[49].mxu0 }
 0x14f   : > { %v609_v23 = vpop.f32.mrb[50].mxu0 }
 0x150   : > { %v732_v24 = vmax.f32 %v607_v21, 0.0  ;;  %v610_v25 = vadd.f32 %v1591_v35, %v609_v23  ;;  %v1314_v26 = vpop.f32.mrb[51].mxu0 }
 0x152   : > { %v1198_v27 = vpack.c.bf16 %v732_v24, %v732_v24  ;;  %v733_v28 = vmax.f32 %v610_v25, 0.0 }
 0x154   : > { %979 = vst.msk [vmem:[%s1602_s6 + $0x60] sm:$0xf] %vm954_vm4, %v1198_v27  ;;  %v1199_v29 = vpack.c.bf16 %v733_v28, %v733_v28 }
 0x156   : > { %980 = vst.msk [vmem:[%s1602_s6 + $0x64] sm:$0xf] %vm954_vm4, %v1199_v29 }
 0x157 PF: > { %s13_s12 = sadd.s32 1, %s1420_s12  }
 0x158   : > { %p10_p4 = scmp.ge.s32.totalorder %s13_s12, 6  }
 0x15a   :  { %12 = sbr.rel (!%p10_p4) target bundleno = 1 (0x1), region = 62 }

// kernel: lenet5_forward.8
= control target key start
LH: loop header
LB: loop body
LE: loop exit
PB: predicated region body
PF: predicated region fallthrough
CT: control target
= control target key end

     0   :  { %s668_s0 = inlined_call_operand.vmem [shape: bf16[196,128], index: 0, kind: input, shape index: {}]   ;;  %s669_s1 = inlined_call_operand.vmem [shape: bf16[196,128], index: 1, kind: input, shape index: {}]   ;;  %s670_s2 = inlined_call_operand.vmem [shape: bf16[196,128], index: 2, kind: input, shape index: {}]   ;;  %s671_s3 = inlined_call_operand.vmem [shape: bf16[196,128], index: 3, kind: input, shape index: {}]   ;;  %s672_s4 = inlined_call_operand.vmem [shape: bf16[196,128], index: 4, kind: output, shape index: {}]  }
   0x1   :  { %v17_v0 = vld [vmem:[%s668_s0] sm:$0xf]  ;;  %v18_v1 = vld [vmem:[%s668_s0 + $0x4] sm:$0xf]  ;;  %v19_v10 = vld [vmem:[%s668_s0 + $0x8] sm:$0xf] }
   0x2   :  { %v42_v2 = vld [vmem:[%s669_s1] sm:$0xf]  ;;  %v43_v3 = vld [vmem:[%s669_s1 + $0x4] sm:$0xf]  ;;  %v20_v13 = vld [vmem:[%s668_s0 + $0xc] sm:$0xf] }
   0x3   :  { %v67_v4 = vmax.bf16 %v42_v2, %v17_v0  ;;  %v92_v5 = vld [vmem:[%s670_s2] sm:$0xf]  ;;  %v93_v6 = vld [vmem:[%s670_s2 + $0x4] sm:$0xf]  ;;  %v68_v7 = vmax.bf16 %v43_v3, %v18_v1  ;;  %v44_v14 = vld [vmem:[%s669_s1 + $0x8] sm:$0xf] }
   0x4   :  { %v117_v8 = vld [vmem:[%s671_s3] sm:$0xf]  ;;  %v118_v9 = vld [vmem:[%s671_s3 + $0x4] sm:$0xf]  ;;  %v45_v15 = vld [vmem:[%s669_s1 + $0xc] sm:$0xf]  ;;  %v69_v16 = vmax.bf16 %v44_v14, %v19_v10 }
   0x5   :  { %v142_v11 = vmax.bf16 %v117_v8, %v92_v5  ;;  %v143_v12 = vmax.bf16 %v118_v9, %v93_v6  ;;  %v70_v17 = vmax.bf16 %v45_v15, %v20_v13  ;;  %v94_v18 = vld [vmem:[%s670_s2 + $0x8] sm:$0xf]  ;;  %v95_v19 = vld [vmem:[%s670_s2 + $0xc] sm:$0xf]  ;;  %v21_v25 = vld [vmem:[%s668_s0 + $0x10] sm:$0xf] }
   0x6   :  { %v119_v20 = vld [vmem:[%s671_s3 + $0x8] sm:$0xf]  ;;  %v120_v23 = vld [vmem:[%s671_s3 + $0xc] sm:$0xf]  ;;  %v22_v26 = vld [vmem:[%s668_s0 + $0x14] sm:$0xf] }
   0x7   :  { %v167_v21 = vmax.bf16 %v142_v11, %v67_v4  ;;  %v168_v22 = vmax.bf16 %v143_v12, %v68_v7  ;;  %v144_v24 = vmax.bf16 %v119_v20, %v94_v18  ;;  %v145_v27 = vmax.bf16 %v120_v23, %v95_v19  ;;  %v46_v28 = vld [vmem:[%s669_s1 + $0x10] sm:$0xf]  ;;  %v47_v29 = vld [vmem:[%s669_s1 + $0x14] sm:$0xf]  ;;  %v23_v41 = vld [vmem:[%s668_s0 + $0x18] sm:$0xf] }
   0x8   :  { %v96_v30 = vld [vmem:[%s670_s2 + $0x10] sm:$0xf]  ;;  %v71_v33 = vmax.bf16 %v46_v28, %v21_v25  ;;  %v72_v34 = vmax.bf16 %v47_v29, %v22_v26  ;;  %v97_v35 = vld [vmem:[%s670_s2 + $0x14] sm:$0xf]  ;;  %v24_v42 = vld [vmem:[%s668_s0 + $0x1c] sm:$0xf] }
   0x9   :  { %v281_v31 = vcombine.low %v167_v21, %v168_v22  ;;  %v169_v32 = vmax.bf16 %v144_v24, %v69_v16  ;;  %v121_v36 = vld [vmem:[%s671_s3 + $0x10] sm:$0xf]  ;;  %v122_v37 = vld [vmem:[%s671_s3 + $0x14] sm:$0xf]  ;;  %v170_v38 = vmax.bf16 %v145_v27, %v70_v17  ;;  %v48_v43 = vld [vmem:[%s669_s1 + $0x18] sm:$0xf] }
   0xa   :  { %v146_v39 = vmax.bf16 %v121_v36, %v96_v30  ;;  %v147_v40 = vmax.bf16 %v122_v37, %v97_v35  ;;  %v49_v44 = vld [vmem:[%s669_s1 + $0x1c] sm:$0xf]  ;;  %v73_v45 = vmax.bf16 %v48_v43, %v23_v41  ;;  %v98_v46 = vld [vmem:[%s670_s2 + $0x18] sm:$0xf]  ;;  %v25_v54 = vld [vmem:[%s668_s0 + $0x20] sm:$0xf] }
   0xb   :  { %225 = vst [vmem:[%s672_s4] sm:$0xff] %v281_v31   ;;  %v99_v47 = vld [vmem:[%s670_s2 + $0x1c] sm:$0xf]  ;;  %v282_v48 = vcombine.low %v169_v32, %v170_v38  ;;  %v74_v51 = vmax.bf16 %v49_v44, %v24_v42  ;;  %v123_v52 = vld [vmem:[%s671_s3 + $0x18] sm:$0xf]  ;;  %v26_v57 = vld [vmem:[%s668_s0 + $0x24] sm:$0xf] }
   0xc   :  { %v171_v49 = vmax.bf16 %v146_v39, %v71_v33  ;;  %v172_v50 = vmax.bf16 %v147_v40, %v72_v34  ;;  %v124_v53 = vld [vmem:[%s671_s3 + $0x1c] sm:$0xf]  ;;  %v148_v55 = vmax.bf16 %v123_v52, %v98_v46  ;;  %v50_v58 = vld [vmem:[%s669_s1 + $0x20] sm:$0xf]  ;;  %v51_v59 = vld [vmem:[%s669_s1 + $0x24] sm:$0xf] }
   0xd   :  { %v149_v56 = vmax.bf16 %v124_v53, %v99_v47  ;;  %283 = vst [vmem:[%s672_s4 + $0x8] sm:$0xff] %v282_v48   ;;  %v75_v61 = vmax.bf16 %v50_v58, %v25_v54  ;;  %v76_v62 = vmax.bf16 %v51_v59, %v26_v57  ;;  %v100_v63 = vld [vmem:[%s670_s2 + $0x20] sm:$0xf]  ;;  %v101_v0 = vld [vmem:[%s670_s2 + $0x24] sm:$0xf] }
   0xe   :  { %v284_v60 = vcombine.low %v171_v49, %v172_v50  ;;  %v125_v1 = vld [vmem:[%s671_s3 + $0x20] sm:$0xf]  ;;  %v173_v2 = vmax.bf16 %v148_v55, %v73_v45  ;;  %v126_v4 = vld [vmem:[%s671_s3 + $0x24] sm:$0xf]  ;;  %v27_v6 = vld [vmem:[%s668_s0 + $0x28] sm:$0xf] }
   0xf   :  { %v174_v3 = vmax.bf16 %v149_v56, %v74_v51  ;;  %v150_v5 = vmax.bf16 %v125_v1, %v100_v63  ;;  %v28_v7 = vld [vmem:[%s668_s0 + $0x2c] sm:$0xf]  ;;  %v151_v8 = vmax.bf16 %v126_v4, %v101_v0  ;;  %v52_v9 = vld [vmem:[%s669_s1 + $0x28] sm:$0xf]  ;;  %v29_v22 = vld [vmem:[%s668_s0 + $0x30] sm:$0xf] }
  0x10   :  { %285 = vst [vmem:[%s672_s4 + $0x10] sm:$0xff] %v284_v60   ;;  %v53_v10 = vld [vmem:[%s669_s1 + $0x2c] sm:$0xf]  ;;  %v102_v11 = vld [vmem:[%s670_s2 + $0x28] sm:$0xf]  ;;  %v77_v14 = vmax.bf16 %v52_v9, %v27_v6 }
  0x11   :  { %v286_v12 = vcombine.low %v173_v2, %v174_v3  ;;  %v175_v13 = vmax.bf16 %v150_v5, %v75_v61  ;;  %v78_v15 = vmax.bf16 %v53_v10, %v28_v7  ;;  %v103_v16 = vld [vmem:[%s670_s2 + $0x2c] sm:$0xf]  ;;  %v127_v17 = vld [vmem:[%s671_s3 + $0x28] sm:$0xf]  ;;  %v176_v19 = vmax.bf16 %v151_v8, %v76_v62  ;;  %v30_v23 = vld [vmem:[%s668_s0 + $0x34] sm:$0xf] }
  0x12   :  { %v128_v18 = vld [vmem:[%s671_s3 + $0x2c] sm:$0xf]  ;;  %v152_v20 = vmax.bf16 %v127_v17, %v102_v11  ;;  %v54_v24 = vld [vmem:[%s669_s1 + $0x30] sm:$0xf]  ;;  %v55_v25 = vld [vmem:[%s669_s1 + $0x34] sm:$0xf] }
  0x13   :  { %v153_v21 = vmax.bf16 %v128_v18, %v103_v16  ;;  %287 = vst [vmem:[%s672_s4 + $0x18] sm:$0xff] %v286_v12   ;;  %v79_v26 = vmax.bf16 %v54_v24, %v29_v22  ;;  %v104_v27 = vld [vmem:[%s670_s2 + $0x30] sm:$0xf]  ;;  %v105_v28 = vld [vmem:[%s670_s2 + $0x34] sm:$0xf]  ;;  %v288_v29 = vcombine.low %v175_v13, %v176_v19  ;;  %v80_v32 = vmax.bf16 %v55_v25, %v30_v23 }
  0x14   :  { %v177_v30 = vmax.bf16 %v152_v20, %v77_v14  ;;  %v129_v33 = vld [vmem:[%s671_s3 + $0x30] sm:$0xf]  ;;  %v130_v34 = vld [vmem:[%s671_s3 + $0x34] sm:$0xf]  ;;  %v31_v35 = vld [vmem:[%s668_s0 + $0x38] sm:$0xf] }
  0x15   :  { %v178_v31 = vmax.bf16 %v153_v21, %v78_v15  ;;  %v154_v36 = vmax.bf16 %v129_v33, %v104_v27  ;;  %v155_v37 = vmax.bf16 %v130_v34, %v105_v28  ;;  %v32_v38 = vld [vmem:[%s668_s0 + $0x3c] sm:$0xf]  ;;  %v56_v39 = vld [vmem:[%s669_s1 + $0x38] sm:$0xf]  ;;  %289 = vst [vmem:[%s672_s4 + $0x20] sm:$0xff] %v288_v29  }
  0x16   :  { %v57_v40 = vld [vmem:[%s669_s1 + $0x3c] sm:$0xf]  ;;  %v81_v42 = vmax.bf16 %v56_v39, %v31_v35  ;;  %v106_v44 = vld [vmem:[%s670_s2 + $0x38] sm:$0xf]  ;;  %v33_v51 = vld [vmem:[%s668_s0 + $0x40] sm:$0xf] }
  0x17   :  { %v290_v41 = vcombine.low %v177_v30, %v178_v31  ;;  %v82_v43 = vmax.bf16 %v57_v40, %v32_v38  ;;  %v107_v45 = vld [vmem:[%s670_s2 + $0x3c] sm:$0xf]  ;;  %v131_v46 = vld [vmem:[%s671_s3 + $0x38] sm:$0xf]  ;;  %v179_v47 = vmax.bf16 %v154_v36, %v79_v26  ;;  %v180_v48 = vmax.bf16 %v155_v37, %v80_v32  ;;  %v34_v52 = vld [vmem:[%s668_s0 + $0x44] sm:$0xf] }
  0x18   :  { %v132_v49 = vld [vmem:[%s671_s3 + $0x3c] sm:$0xf]  ;;  %v156_v50 = vmax.bf16 %v131_v46, %v106_v44  ;;  %v58_v54 = vld [vmem:[%s669_s1 + $0x40] sm:$0xf]  ;;  %v59_v55 = vld [vmem:[%s669_s1 + $0x44] sm:$0xf] }
  0x19   :  { %291 = vst [vmem:[%s672_s4 + $0x28] sm:$0xff] %v290_v41   ;;  %v157_v53 = vmax.bf16 %v132_v49, %v107_v45  ;;  %v108_v56 = vld [vmem:[%s670_s2 + $0x40] sm:$0xf]  ;;  %v292_v57 = vcombine.low %v179_v47, %v180_v48  ;;  %v83_v59 = vmax.bf16 %v58_v54, %v33_v51  ;;  %v84_v60 = vmax.bf16 %v59_v55, %v34_v52  ;;  %v109_v61 = vld [vmem:[%s670_s2 + $0x44] sm:$0xf] }
  0x1a   :  { %v181_v58 = vmax.bf16 %v156_v50, %v81_v42  ;;  %v133_v62 = vld [vmem:[%s671_s3 + $0x40] sm:$0xf]  ;;  %v134_v63 = vld [vmem:[%s671_s3 + $0x44] sm:$0xf]  ;;  %v35_v3 = vld [vmem:[%s668_s0 + $0x48] sm:$0xf] }
  0x1b   :  { %v182_v0 = vmax.bf16 %v157_v53, %v82_v43  ;;  %v158_v1 = vmax.bf16 %v133_v62, %v108_v56  ;;  %v159_v2 = vmax.bf16 %v134_v63, %v109_v61  ;;  %v36_v4 = vld [vmem:[%s668_s0 + $0x4c] sm:$0xf]  ;;  %v60_v5 = vld [vmem:[%s669_s1 + $0x48] sm:$0xf]  ;;  %293 = vst [vmem:[%s672_s4 + $0x30] sm:$0xff] %v292_v57  }
  0x1c   :  { %v61_v6 = vld [vmem:[%s669_s1 + $0x4c] sm:$0xf]  ;;  %v85_v7 = vmax.bf16 %v60_v5, %v35_v3  ;;  %v110_v8 = vld [vmem:[%s670_s2 + $0x48] sm:$0xf]  ;;  %v37_v16 = vld [vmem:[%s668_s0 + $0x50] sm:$0xf] }
  0x1d   :  { %v111_v9 = vld [vmem:[%s670_s2 + $0x4c] sm:$0xf]  ;;  %v294_v10 = vcombine.low %v181_v58, %v182_v0  ;;  %v183_v11 = vmax.bf16 %v158_v1, %v83_v59  ;;  %v184_v12 = vmax.bf16 %v159_v2, %v84_v60  ;;  %v86_v13 = vmax.bf16 %v61_v6, %v36_v4  ;;  %v135_v14 = vld [vmem:[%s671_s3 + $0x48] sm:$0xf]  ;;  %v38_v19 = vld [vmem:[%s668_s0 + $0x54] sm:$0xf] }
  0x1e   :  { %v136_v15 = vld [vmem:[%s671_s3 + $0x4c] sm:$0xf]  ;;  %v160_v17 = vmax.bf16 %v135_v14, %v110_v8  ;;  %v62_v20 = vld [vmem:[%s669_s1 + $0x50] sm:$0xf]  ;;  %v63_v21 = vld [vmem:[%s669_s1 + $0x54] sm:$0xf] }
  0x1f   :  { %v161_v18 = vmax.bf16 %v136_v15, %v111_v9  ;;  %295 = vst [vmem:[%s672_s4 + $0x38] sm:$0xff] %v294_v10   ;;  %v296_v22 = vcombine.low %v183_v11, %v184_v12  ;;  %v87_v23 = vmax.bf16 %v62_v20, %v37_v16  ;;  %v88_v24 = vmax.bf16 %v63_v21, %v38_v19  ;;  %v112_v25 = vld [vmem:[%s670_s2 + $0x50] sm:$0xf]  ;;  %v113_v26 = vld [vmem:[%s670_s2 + $0x54] sm:$0xf] }
  0x20   :  { %v137_v27 = vld [vmem:[%s671_s3 + $0x50] sm:$0xf]  ;;  %v185_v28 = vmax.bf16 %v160_v17, %v85_v7  ;;  %v138_v30 = vld [vmem:[%s671_s3 + $0x54] sm:$0xf]  ;;  %v39_v32 = vld [vmem:[%s668_s0 + $0x58] sm:$0xf] }
  0x21   :  { %v186_v29 = vmax.bf16 %v161_v18, %v86_v13  ;;  %v162_v31 = vmax.bf16 %v137_v27, %v112_v25  ;;  %v40_v33 = vld [vmem:[%s668_s0 + $0x5c] sm:$0xf]  ;;  %297 = vst [vmem:[%s672_s4 + $0x40] sm:$0xff] %v296_v22   ;;  %v163_v34 = vmax.bf16 %v138_v30, %v113_v26  ;;  %v64_v35 = vld [vmem:[%s669_s1 + $0x58] sm:$0xf] }
  0x22   :  { %v65_v36 = vld [vmem:[%s669_s1 + $0x5c] sm:$0xf]  ;;  %v114_v37 = vld [vmem:[%s670_s2 + $0x58] sm:$0xf]  ;;  %v89_v40 = vmax.bf16 %v64_v35, %v39_v32  ;;  %v41_v48 = vld [vmem:[%s668_s0 + $0x60] sm:$0x3] }
  0x23   :  { %v298_v38 = vcombine.low %v185_v28, %v186_v29  ;;  %v187_v39 = vmax.bf16 %v162_v31, %v87_v23  ;;  %v90_v41 = vmax.bf16 %v65_v36, %v40_v33  ;;  %v115_v42 = vld [vmem:[%s670_s2 + $0x5c] sm:$0xf]  ;;  %v139_v43 = vld [vmem:[%s671_s3 + $0x58] sm:$0xf]  ;;  %v188_v45 = vmax.bf16 %v163_v34, %v88_v24  ;;  %v66_v49 = vld [vmem:[%s669_s1 + $0x60] sm:$0x3] }
  0x24   :  { %v140_v44 = vld [vmem:[%s671_s3 + $0x5c] sm:$0xf]  ;;  %v164_v46 = vmax.bf16 %v139_v43, %v114_v37  ;;  %v116_v50 = vld [vmem:[%s670_s2 + $0x60] sm:$0x3]  ;;  %v91_v51 = vmax.bf16 %v66_v49, %v41_v48 }
  0x25   :  { %v165_v47 = vmax.bf16 %v140_v44, %v115_v42  ;;  %299 = vst [vmem:[%s672_s4 + $0x48] sm:$0xff] %v298_v38   ;;  %v141_v52 = vld [vmem:[%s671_s3 + $0x60] sm:$0x3]  ;;  %v300_v53 = vcombine.low %v187_v39, %v188_v45 }
  0x26   :  { %v189_v54 = vmax.bf16 %v164_v46, %v89_v40  ;;  %v166_v56 = vmax.bf16 %v141_v52, %v116_v50 }
  0x27   :  { %v190_v55 = vmax.bf16 %v165_v47, %v90_v41  ;;  %301 = vst [vmem:[%s672_s4 + $0x50] sm:$0xff] %v300_v53  }
  0x28   :  { %v191_v58 = vmax.bf16 %v166_v56, %v91_v51 }
  0x29   :  { %v302_v57 = vcombine.low %v189_v54, %v190_v55 }
  0x2a   :  { %216 = vst [vmem:[%s672_s4 + $0x60] sm:$0x3] %v191_v58 }
  0x2b   :  { %303 = vst [vmem:[%s672_s4 + $0x58] sm:$0xff] %v302_v57  }

// kernel: lenet5_forward.9
= control target key start
LH: loop header
LB: loop body
LE: loop exit
PB: predicated region body
PF: predicated region fallthrough
CT: control target
= control target key end

     0   :  { %vm4304_vm0 = vmmov 0   ;;  %vm1822_vm1 = vcmask 523264   ;;  %vm2940_vm2 = vcmask 519168   ;;  %s5512_s1 = inlined_call_operand.vmem [shape: bf16[1600,64], index: 1, kind: input, shape index: {}]   ;;  %s5513_s0 = inlined_call_operand.vmem [shape: bf16[200,1600], index: 0, kind: input, shape index: {}]   ;;  %s5514_s2 = inlined_call_operand.vmem [shape: f32[1,64], index: 2, kind: input, shape index: {}]   ;;  %s5515_s3 = inlined_call_operand.vmem [shape: bf16[200,64], index: 3, kind: output, shape index: {}]  }
   0x1   :  { %v3962_v0 = vld [vmem:[%s5512_s1 + $0x40] sm:$0xff]   ;;  %v3964_v2 = vld [vmem:[%s5512_s1 + $0x48] sm:$0xff]   ;;  %v3966_v4 = vld [vmem:[%s5512_s1 + $0x50] sm:$0xff]  }
   0x2   :  { %v3963_v1 = vld [vmem:[%s5512_s1] sm:$0xff]   ;;  %3303 = vmatprep.subr.bf16.mxu0 %v3962_v0  ;;  %3944 = vmatprep.subr.bf16.mxu1 %v3962_v0  ;;  %v3965_v3 = vld [vmem:[%s5512_s1 + $0x8] sm:$0xff]   ;;  %v3967_v5 = vld [vmem:[%s5512_s1 + $0x10] sm:$0xff]  }
   0x3   :  { %3304 = vmatpush3.bf16.msra.mxu0 %v3963_v1  ;;  %3952 = vmatpush3.bf16.msra.mxu1 %v3963_v1  ;;  %v3968_v6 = vld [vmem:[%s5512_s1 + $0x58] sm:$0xff]   ;;  %v3970_v8 = vld [vmem:[%s5512_s1 + $0x60] sm:$0xff]   ;;  %v3972_v10 = vld [vmem:[%s5512_s1 + $0x68] sm:$0xff]  }
   0x4   :  { %3305 = vmatprep.subr.bf16.mxu0 %v3964_v2  ;;  %3945 = vmatprep.subr.bf16.mxu1 %v3964_v2  ;;  %v3969_v7 = vld [vmem:[%s5512_s1 + $0x18] sm:$0xff]   ;;  %v3971_v9 = vld [vmem:[%s5512_s1 + $0x20] sm:$0xff]   ;;  %v3973_v13 = vld [vmem:[%s5512_s1 + $0x28] sm:$0xff]  }
   0x5   :  { %v3980_v11 = vld [vmem:[%s5513_s0 + $0x4] ss:$52 sps:$4 sm:$0xff]   ;;  %v3983_v12 = vld [vmem:[%s5513_s0 + $0x2dc] ss:$52 sps:$4 sm:$0xff]   ;;  %v3978_v19 = vld [vmem:[%s5513_s0] ss:$52 sps:$4 sm:$0xff]  }
   0x6   :  { %v3974_v14 = vld [vmem:[%s5512_s1 + $0x70] sm:$0xff]   ;;  %1894 = vmatprep.mubr.bf16.mxu0 %v3980_v11  ;;  %1950 = vmatprep.mubr.bf16.mxu1 %v3983_v12  ;;  %v3976_v16 = vld [vmem:[%s5512_s1 + $0x78] sm:$0xff]   ;;  %v3984_v18 = vld [vmem:[%s5512_s1 + $0x140] sm:$0xff]  }
   0x7   :  { %3306 = vmatpush3.bf16.msra.mxu0 %v3965_v3  ;;  %3953 = vmatpush3.bf16.msra.mxu1 %v3965_v3  ;;  %v3975_v15 = vld [vmem:[%s5512_s1 + $0x30] sm:$0xff]   ;;  %v3977_v17 = vld [vmem:[%s5512_s1 + $0x38] sm:$0xff]   ;;  %v3986_v21 = vld [vmem:[%s5512_s1 + $0xc0] sm:$0xff]  }
   0x8   :  { %3307 = vmatprep.subr.bf16.mxu0 %v3966_v4  ;;  %3946 = vmatprep.subr.bf16.mxu1 %v3966_v4  ;;  %v3981_v20 = vld [vmem:[%s5513_s0 + $0x2d8] ss:$52 sps:$4 sm:$0xff]   ;;  %v3985_v22 = vld [vmem:[%s5512_s1 + $0x100] sm:$0xff]   ;;  %v3998_v30 = vld [vmem:[%s5512_s1 + $0x150] sm:$0xff]  }
   0x9   :  { %v3987_v23 = vld [vmem:[%s5512_s1 + $0x80] sm:$0xff]   ;;  %v3992_v26 = vld [vmem:[%s5512_s1 + $0x148] sm:$0xff]   ;;  %v4003_v33 = vld [vmem:[%s5512_s1 + $0xd0] sm:$0xff]  }
   0xa   :  { %v3988_v24 = vld [vmem:[%s5513_s0 + $0x6c] ss:$52 sps:$4 sm:$0xff]   ;;  %v3990_v25 = vld [vmem:[%s5513_s0 + $0x344] ss:$52 sps:$4 sm:$0xff]   ;;  %v3993_v31 = vld [vmem:[%s5513_s0 + $0x68] ss:$52 sps:$4 sm:$0xff]  }
   0xb   :  { %3308 = vmatpush3.bf16.msra.mxu0 %v3967_v5  ;;  %3954 = vmatpush3.bf16.msra.mxu1 %v3967_v5  ;;  %v3996_v27 = vld [vmem:[%s5512_s1 + $0xc8] sm:$0xff]   ;;  %v3994_v32 = vld [vmem:[%s5513_s0 + $0x340] ss:$52 sps:$4 sm:$0xff]   ;;  %v4008_v38 = vld [vmem:[%s5512_s1 + $0xd8] sm:$0xff]  }
   0xc   :  { %3309 = vmatprep.subr.bf16.mxu0 %v3968_v6  ;;  %3947 = vmatprep.subr.bf16.mxu1 %v3968_v6  ;;  %v3995_v28 = vld [vmem:[%s5512_s1 + $0x108] sm:$0xff]   ;;  %v4004_v36 = vld [vmem:[%s5512_s1 + $0x110] sm:$0xff]   ;;  %v4009_v39 = vld [vmem:[%s5512_s1 + $0x158] sm:$0xff]  }
   0xd   :  { %v3997_v29 = vld [vmem:[%s5512_s1 + $0x88] sm:$0xff]   ;;  %v4007_v37 = vld [vmem:[%s5512_s1 + $0x90] sm:$0xff]   ;;  %v4010_v40 = vld [vmem:[%s5512_s1 + $0x98] sm:$0xff]  }
   0xe   :  { %v3999_v34 = vld [vmem:[%s5513_s0 + $0xd4] ss:$52 sps:$4 sm:$0xff]   ;;  %v4001_v35 = vld [vmem:[%s5513_s0 + $0x3ac] ss:$52 sps:$4 sm:$0xff]   ;;  %v4011_v41 = vld [vmem:[%s5512_s1 + $0x118] sm:$0xff]  }
   0xf   :  { %3310 = vmatpush3.bf16.msra.mxu0 %v3969_v7  ;;  %3955 = vmatpush3.bf16.msra.mxu1 %v3969_v7  ;;  %v4005_v42 = vld [vmem:[%s5513_s0 + $0xd0] ss:$52 sps:$4 sm:$0xff]   ;;  %v4006_v43 = vld [vmem:[%s5513_s0 + $0x3a8] ss:$52 sps:$4 sm:$0xff]   ;;  %v4016_v52 = vld [vmem:[%s5513_s0 + $0x138] ss:$52 sps:$4 sm:$0xff]  }
  0x10   :  { %3311 = vmatprep.subr.bf16.mxu0 %v3970_v8  ;;  %3948 = vmatprep.subr.bf16.mxu1 %v3970_v8  ;;  %v4018_v44 = vld [vmem:[%s5512_s1 + $0xe0] sm:$0xff]   ;;  %v4012_v46 = vld [vmem:[%s5513_s0 + $0x13c] ss:$52 sps:$4 sm:$0xff]   ;;  %v4014_v47 = vld [vmem:[%s5513_s0 + $0x414] ss:$52 sps:$4 sm:$0xff]  }
  0x11   :  { %v4020_v45 = vld [vmem:[%s5512_s1 + $0x160] sm:$0xff]   ;;  %v4028_v50 = vld [vmem:[%s5512_s1 + $0xe8] sm:$0xff]   ;;  %v4024_v57 = vld [vmem:[%s5513_s0 + $0x47c] ss:$52 sps:$4 sm:$0xff]  }
  0x12   :  { %v4019_v48 = vld [vmem:[%s5512_s1 + $0xa0] sm:$0xff]   ;;  %v4029_v51 = vld [vmem:[%s5512_s1 + $0xa8] sm:$0xff]   ;;  %v4035_v58 = vld [vmem:[%s5512_s1 + $0xf0] sm:$0xff]  }
  0x13   :  { %3312 = vmatpush3.bf16.msra.mxu0 %v3971_v9  ;;  %3956 = vmatpush3.bf16.msra.mxu1 %v3971_v9  ;;  %v4021_v49 = vld [vmem:[%s5512_s1 + $0x120] sm:$0xff]   ;;  %v4030_v53 = vld [vmem:[%s5512_s1 + $0x168] sm:$0xff]   ;;  %v4038_v59 = vld [vmem:[%s5512_s1 + $0xb0] sm:$0xff]  }
  0x14   :  { %3313 = vmatprep.subr.bf16.mxu0 %v3972_v10  ;;  %3949 = vmatprep.subr.bf16.mxu1 %v3972_v10  ;;  %v4031_v54 = vld [vmem:[%s5512_s1 + $0x128] sm:$0xff]   ;;  %v4017_v55 = vld [vmem:[%s5513_s0 + $0x410] ss:$52 sps:$4 sm:$0xff]   ;;  %v4041_v63 = vld [vmem:[%s5512_s1 + $0xf8] sm:$0xff]  }
  0x15   :  { %v4022_v56 = vld [vmem:[%s5513_s0 + $0x1a4] ss:$52 sps:$4 sm:$0xff]   ;;  %v4039_v60 = vld [vmem:[%s5512_s1 + $0x170] sm:$0xff]   ;;  %v4032_v3 = vld [vmem:[%s5513_s0 + $0x20c] ss:$52 sps:$4 sm:$0xff]  }
  0x16   :  { %v183_v61 = vld [vmem:[%s5513_s0 + $0x4e0] sm:$0xff]  ;;  %v4040_v62 = vld [vmem:[%s5512_s1 + $0x130] sm:$0xff]   ;;  %v4042_v0 = vld [vmem:[%s5512_s1 + $0xb8] sm:$0xff]  }
  0x17   :  { %3314 = vmatpush3.bf16.msra.mxu0 %v3973_v13  ;;  %3957 = vmatpush3.bf16.msra.mxu1 %v3973_v13  ;;  %v4026_v1 = vld [vmem:[%s5513_s0 + $0x1a0] ss:$52 sps:$4 sm:$0xff]   ;;  %v4027_v2 = vld [vmem:[%s5513_s0 + $0x478] ss:$52 sps:$4 sm:$0xff]   ;;  %v3128_v4 = vcombine.high %v183_v61, %v183_v61  ;;  %v4036_v8 = vld [vmem:[%s5513_s0 + $0x208] ss:$52 sps:$4 sm:$0xff]   ;;  %v3127_v10 = vcombine.low %v183_v61, %v183_v61 }
  0x18   :  { %3315 = vmatprep.subr.bf16.mxu0 %v3974_v14  ;;  %3950 = vmatprep.subr.bf16.mxu1 %v3974_v14  ;;  %v4049_v5 = vld [vmem:[%s5512_s1 + $0x178] sm:$0xff]   ;;  %v4051_v7 = vld [vmem:[%s5512_s1 + $0x1c0] sm:$0xff]   ;;  %v4043_v9 = vld [vmem:[%s5513_s0 + $0x274] ss:$52 sps:$4 sm:$0xff]  }
  0x19   :  { %v4050_v6 = vld [vmem:[%s5512_s1 + $0x138] sm:$0xff]   ;;  %v4047_v11 = vld [vmem:[%s5513_s0 + $0xc] ss:$52 sps:$4 sm:$0xff]   ;;  %v4048_v14 = vld [vmem:[%s5513_s0 + $0x270] ss:$52 sps:$4 sm:$0xff]  }
  0x1a   :  { %v4059_v12 = vld [vmem:[%s5512_s1 + $0x240] sm:$0xff]   ;;  %v4045_v13 = vld [vmem:[%s5513_s0 + $0x8] ss:$52 sps:$4 sm:$0xff]   ;;  %v4137_v61 = vld [vmem:[%s5512_s1 + $0x270] sm:$0xff]  }
  0x1b   :  { %3316 = vmatpush3.bf16.msra.mxu0 %v3975_v15  ;;  %3958 = vmatpush3.bf16.msra.mxu1 %v3975_v15  ;;  %v4052_v15 = vld [vmem:[%s5512_s1 + $0x180] sm:$0xff]  }
  0x1c   :  { %3317 = vmatprep.subr.bf16.mxu0 %v3976_v16  ;;  %3951 = vmatprep.subr.bf16.mxu1 %v3976_v16  ;;  %v4053_v16 = vld [vmem:[%s5513_s0 + $0x74] ss:$52 sps:$4 sm:$0xff]  }
  0x1f   :  { %3318 = vmatpush3.bf16.msra.mxu0 %v3977_v17  ;;  %3959 = vmatpush3.bf16.msra.mxu1 %v3977_v17  ;;  %v4057_v17 = vld [vmem:[%s5513_s0 + $0x14] ss:$52 sps:$4 sm:$0xff]  }
  0x20   :  { %3491 = vmatprep.subr.bf16.mxu0 %v3984_v18  ;;  %3397 = vmatprep.subr.bf16.mxu1 %v3986_v21  ;;  %v4067_v18 = vld [vmem:[%s5512_s1 + $0x1c8] sm:$0xff]   ;;  %v4077_v21 = vld [vmem:[%s5512_s1 + $0x1d0] sm:$0xff]  }
  0x22   :  { %1895 = vmatmul.mubr.bf16.vlgmr.msra.gmra.mrb[0].mxu0 %v3978_v19  ;;  %1951 = vmatmul.mubr.bf16.vlgmr.msra.gmra.mrb[0].mxu1 %v3981_v20  ;;  %v4068_v19 = vld [vmem:[%s5512_s1 + $0x188] sm:$0xff]   ;;  %v4055_v20 = vld [vmem:[%s5513_s0 + $0x10] ss:$52 sps:$4 sm:$0xff]  }
  0x23   :  { %3492 = vmatpush3.bf16.msra.mxu0 %v3985_v22  ;;  %3398 = vmatpush3.bf16.msra.mxu1 %v3987_v23  ;;  %v4058_v22 = vld [vmem:[%s5513_s0 + $0x70] ss:$52 sps:$4 sm:$0xff]  }
  0x24   :  { %1902 = vmatprep.mubr.bf16.mxu0 %v3988_v24  ;;  %1958 = vmatprep.mubr.bf16.mxu1 %v3990_v25  ;;  %v4060_v23 = vld [vmem:[%s5512_s1 + $0x200] sm:$0xff]   ;;  %v4061_v24 = vld [vmem:[%s5513_s0 + $0xdc] ss:$52 sps:$4 sm:$0xff]  }
  0x25   :  { %3493 = vmatprep.subr.bf16.mxu0 %v3992_v26  ;;  %3399 = vmatprep.subr.bf16.mxu1 %v3996_v27  ;;  %v4063_v25 = vld [vmem:[%s5513_s0 + $0x7c] ss:$52 sps:$4 sm:$0xff]   ;;  %v4069_v26 = vld [vmem:[%s5512_s1 + $0x248] sm:$0xff]  }
  0x26   :  { %v4078_v27 = vld [vmem:[%s5512_s1 + $0x190] sm:$0xff]  }
  0x27   :  { %3494 = vmatpush3.bf16.msra.mxu0 %v3995_v28  ;;  %3400 = vmatpush3.bf16.msra.mxu1 %v3997_v29  ;;  %v4070_v28 = vld [vmem:[%s5512_s1 + $0x208] sm:$0xff]   ;;  %v4093_v29 = vld [vmem:[%s5512_s1 + $0x1d8] sm:$0xff]  }
  0x28   :  { %3495 = vmatprep.subr.bf16.mxu0 %v3998_v30  ;;  %3401 = vmatprep.subr.bf16.mxu1 %v4003_v33  ;;  %v4065_v30 = vld [vmem:[%s5513_s0 + $0xd8] ss:$52 sps:$4 sm:$0xff]  }
  0x29   :  { %v4094_v33 = vld [vmem:[%s5512_s1 + $0x198] sm:$0xff]  }
  0x2a   :  { %1903 = vmatmul.mubr.bf16.gmra.mrb[4].mxu0 %v3993_v31  ;;  %1959 = vmatmul.mubr.bf16.gmra.mrb[4].mxu1 %v3994_v32  ;;  %v4066_v31 = vld [vmem:[%s5513_s0 + $0x78] ss:$52 sps:$4 sm:$0xff]   ;;  %v4085_v32 = vld [vmem:[%s5512_s1 + $0x250] sm:$0xff]  }
  0x2b   :  { %1910 = vmatprep.mubr.bf16.mxu0 %v3999_v34  ;;  %1966 = vmatprep.mubr.bf16.mxu1 %v4001_v35  ;;  %v4071_v34 = vld [vmem:[%s5513_s0 + $0x144] ss:$52 sps:$4 sm:$0xff]  }
  0x2c   :  { %3496 = vmatpush3.bf16.msra.mxu0 %v4004_v36  ;;  %3402 = vmatpush3.bf16.msra.mxu1 %v4007_v37  ;;  %v4073_v35 = vld [vmem:[%s5513_s0 + $0xe4] ss:$52 sps:$4 sm:$0xff]   ;;  %v4086_v36 = vld [vmem:[%s5512_s1 + $0x210] sm:$0xff]  }
  0x2d   :  { %3403 = vmatprep.subr.bf16.mxu1 %v4008_v38  ;;  %3497 = vmatprep.subr.bf16.mxu0 %v4009_v39  ;;  %v4099_v37 = vld [vmem:[%s5512_s1 + $0x258] sm:$0xff]   ;;  %v4075_v38 = vld [vmem:[%s5513_s0 + $0x140] ss:$52 sps:$4 sm:$0xff]  }
  0x2e   :  { %v4076_v39 = vld [vmem:[%s5513_s0 + $0xe0] ss:$52 sps:$4 sm:$0xff]  }
  0x30   :  { %3404 = vmatpush3.bf16.msra.mxu1 %v4010_v40  ;;  %3498 = vmatpush3.bf16.msra.mxu0 %v4011_v41  ;;  %v4102_v40 = vld [vmem:[%s5512_s1 + $0x218] sm:$0xff]   ;;  %v4107_v41 = vld [vmem:[%s5512_s1 + $0x1e0] sm:$0xff]  }
  0x31   :  { %3405 = vmatprep.subr.bf16.mxu1 %v4018_v44  ;;  %3499 = vmatprep.subr.bf16.mxu0 %v4020_v45  ;;  %v4110_v44 = vld [vmem:[%s5512_s1 + $0x1a0] sm:$0xff]  }
  0x32   :  { %1911 = vmatmul.mubr.bf16.gmra.mrb[8].mxu0 %v4005_v42  ;;  %1967 = vmatmul.mubr.bf16.gmra.mrb[8].mxu1 %v4006_v43  ;;  %v4079_v42 = vld [vmem:[%s5513_s0 + $0x1ac] ss:$52 sps:$4 sm:$0xff]  }
  0x33   :  { %1918 = vmatprep.mubr.bf16.mxu0 %v4012_v46  ;;  %1974 = vmatprep.mubr.bf16.mxu1 %v4014_v47  ;;  %v4081_v43 = vld [vmem:[%s5513_s0 + $0x14c] ss:$52 sps:$4 sm:$0xff]  }
  0x34   :  { %3406 = vmatpush3.bf16.msra.mxu1 %v4019_v48  ;;  %3500 = vmatpush3.bf16.msra.mxu0 %v4021_v49  ;;  %v4111_v45 = vld [vmem:[%s5512_s1 + $0x260] sm:$0xff]   ;;  %v4119_v47 = vld [vmem:[%s5512_s1 + $0x1e8] sm:$0xff]  }
  0x35   :  { %3407 = vmatprep.subr.bf16.mxu1 %v4028_v50  ;;  %3501 = vmatprep.subr.bf16.mxu0 %v4030_v53  ;;  %v4112_v46 = vld [vmem:[%s5512_s1 + $0x220] sm:$0xff]   ;;  %v4120_v48 = vld [vmem:[%s5512_s1 + $0x1a8] sm:$0xff]  }
  0x36   :  { %v4083_v49 = vld [vmem:[%s5513_s0 + $0x1a8] ss:$52 sps:$4 sm:$0xff]  }
  0x37   :  { %v4084_v50 = vld [vmem:[%s5513_s0 + $0x148] ss:$52 sps:$4 sm:$0xff]  }
  0x38   :  { %3408 = vmatpush3.bf16.msra.mxu1 %v4029_v51  ;;  %3502 = vmatpush3.bf16.msra.mxu0 %v4031_v54  ;;  %v4087_v51 = vld [vmem:[%s5513_s0 + $0x214] ss:$52 sps:$4 sm:$0xff]  }
  0x39   :  { %3409 = vmatprep.subr.bf16.mxu1 %v4035_v58  ;;  %3503 = vmatprep.subr.bf16.mxu0 %v4039_v60  ;;  %v4127_v53 = vld [vmem:[%s5512_s1 + $0x268] sm:$0xff]   ;;  %v4097_v58 = vld [vmem:[%s5513_s0 + $0x21c] ss:$52 sps:$4 sm:$0xff]  }
  0x3a   :  { %1919 = vmatmul.mubr.bf16.gmra.mrb[12].mxu0 %v4016_v52  ;;  %1975 = vmatmul.mubr.bf16.gmra.mrb[12].mxu1 %v4017_v55  ;;  %v4089_v52 = vld [vmem:[%s5513_s0 + $0x1b4] ss:$52 sps:$4 sm:$0xff]   ;;  %v4091_v55 = vld [vmem:[%s5513_s0 + $0x210] ss:$52 sps:$4 sm:$0xff]  }
  0x3b   :  { %1926 = vmatprep.mubr.bf16.mxu0 %v4022_v56  ;;  %1982 = vmatprep.mubr.bf16.mxu1 %v4024_v57  ;;  %v4128_v54 = vld [vmem:[%s5512_s1 + $0x228] sm:$0xff]   ;;  %v4092_v56 = vld [vmem:[%s5513_s0 + $0x1b0] ss:$52 sps:$4 sm:$0xff]  }
  0x3c   :  { %3410 = vmatpush3.bf16.msra.mxu1 %v4038_v59  ;;  %3504 = vmatpush3.bf16.msra.mxu0 %v4040_v62  ;;  %v4095_v57 = vld [vmem:[%s5513_s0 + $0x27c] ss:$52 sps:$4 sm:$0xff]  }
  0x3d   :  { %3411 = vmatprep.subr.bf16.mxu1 %v4041_v63  ;;  %3505 = vmatprep.subr.bf16.mxu0 %v4049_v5  ;;  %v4135_v59 = vld [vmem:[%s5512_s1 + $0x1f0] sm:$0xff]   ;;  %v4145_v63 = vld [vmem:[%s5512_s1 + $0x1f8] sm:$0xff]  }
  0x3e   :  { %v4136_v60 = vld [vmem:[%s5512_s1 + $0x1b0] sm:$0xff]   ;;  %v4152_v5 = vld [vmem:[%s5512_s1 + $0x278] sm:$0xff]  }
  0x3f   :  { %v4142_v62 = vld [vmem:[%s5512_s1 + $0x230] sm:$0xff]  }
  0x40   :  { %3412 = vmatpush3.bf16.msra.mxu1 %v4042_v0  ;;  %3506 = vmatpush3.bf16.msra.mxu0 %v4050_v6  ;;  %v4100_v0 = vld [vmem:[%s5513_s0 + $0x278] ss:$52 sps:$4 sm:$0xff]  }
  0x41   :  { %3585 = vmatprep.subr.bf16.mxu1 %v4051_v7  ;;  %3679 = vmatprep.subr.bf16.mxu0 %v4059_v12  ;;  %v4153_v6 = vld [vmem:[%s5512_s1 + $0x238] sm:$0xff]   ;;  %v4159_v7 = vld [vmem:[%s5512_s1 + $0x2c0] sm:$0xff]  }
  0x42   :  { %1927 = vmatmul.mubr.bf16.gmra.mrb[16].mxu0 %v4026_v1  ;;  %1983 = vmatmul.mubr.bf16.gmra.mrb[16].mxu1 %v4027_v2  ;;  %v4101_v1 = vld [vmem:[%s5513_s0 + $0x218] ss:$52 sps:$4 sm:$0xff]  }
  0x43   :  { %1934 = vmatprep.mubr.bf16.mxu0 %v4032_v3  ;;  %1990 = vmatprep.mubr.bf16.mxu1 %v3128_v4  ;;  %v4103_v2 = vld [vmem:[%s5513_s0 + $0x2e4] ss:$52 sps:$4 sm:$0xff]   ;;  %v4115_v12 = vld [vmem:[%s5513_s0 + $0x2ec] ss:$52 sps:$4 sm:$0xff]  }
  0x44   :  { %v4105_v3 = vld [vmem:[%s5513_s0 + $0x284] ss:$52 sps:$4 sm:$0xff]  }
  0x45   :  { %v4149_v4 = vld [vmem:[%s5512_s1 + $0x1b8] sm:$0xff]  }
  0x4a   :  { %1935 = vmatmul.mubr.bf16.gmra.mrb[20].mxu0 %v4036_v8  ;;  %1991 = vmatmul.mubr.bf16.gmra.mrb[20].mxu1 %v3127_v10  ;;  %v4303_v8 = vmov 0.0   ;;  %v4109_v10 = vld [vmem:[%s5513_s0 + $0x280] ss:$52 sps:$4 sm:$0xff]  }
  0x4b   :  { %1942 = vmatprep.mubr.bf16.mxu0 %v4043_v9  ;;  %2030 = vmatprep.mubr.bf16.mxu1 %v4047_v11  ;;  %v4108_v9 = vld [vmem:[%s5513_s0 + $0x2e0] ss:$52 sps:$4 sm:$0xff]  }
  0x4c   :  { %v4113_v11 = vld [vmem:[%s5513_s0 + $0x34c] ss:$52 sps:$4 sm:$0xff]  }
  0x52   :  { %1943 = vmatmul.mubr.bf16.gmra.mrb[24].mxu0 %v4048_v14  ;;  %2031 = vmatmul.mubr.bf16.vlgmr.msra.gmra.mrb[24].mxu1 %v4045_v13  ;;  %v4117_v13 = vld [vmem:[%s5513_s0 + $0x348] ss:$52 sps:$4 sm:$0xff]  }
  0x53   :  { %3586 = vmatpush3.bf16.msra.mxu1 %v4052_v15  ;;  %2038 = vmatprep.mubr.bf16.mxu1 %v4053_v16  ;;  %v4118_v14 = vld [vmem:[%s5513_s0 + $0x2e8] ss:$52 sps:$4 sm:$0xff]  }
  0x54   :  { %2166 = vmatprep.mubr.bf16.mxu0 %v4057_v17  ;;  %3587 = vmatprep.subr.bf16.mxu1 %v4067_v18  ;;  %v4121_v15 = vld [vmem:[%s5513_s0 + $0x3b4] ss:$52 sps:$4 sm:$0xff]   ;;  %v4125_v17 = vld [vmem:[%s5513_s0 + $0x3b0] ss:$52 sps:$4 sm:$0xff]  }
  0x55   :  { %v4123_v16 = vld [vmem:[%s5513_s0 + $0x354] ss:$52 sps:$4 sm:$0xff]   ;;  %v4126_v18 = vld [vmem:[%s5513_s0 + $0x350] ss:$52 sps:$4 sm:$0xff]  }
  0x57   :  { %3588 = vmatpush3.bf16.msra.mxu1 %v4068_v19  ;;  %v4129_v19 = vld [vmem:[%s5513_s0 + $0x41c] ss:$52 sps:$4 sm:$0xff]  }
  0x58   :  { %3589 = vmatprep.subr.bf16.mxu1 %v4077_v21  ;;  %v4133_v21 = vld [vmem:[%s5513_s0 + $0x418] ss:$52 sps:$4 sm:$0xff]  }
  0x5a   :  { %2039 = vmatmul.mubr.bf16.gmra.mrb[28].mxu1 %v4058_v22  ;;  %2167 = vmatmul.mubr.bf16.vlgmr.msra.gmra.mrb[28].mxu0 %v4055_v20  ;;  %v4131_v20 = vld [vmem:[%s5513_s0 + $0x3bc] ss:$52 sps:$4 sm:$0xff]   ;;  %v4134_v22 = vld [vmem:[%s5513_s0 + $0x3b8] ss:$52 sps:$4 sm:$0xff]  }
  0x5b   :  { %3680 = vmatpush3.bf16.msra.mxu0 %v4060_v23  ;;  %2046 = vmatprep.mubr.bf16.mxu1 %v4061_v24  ;;  %v4138_v23 = vld [vmem:[%s5513_s0 + $0x484] ss:$52 sps:$4 sm:$0xff]  }
  0x5c   :  { %2174 = vmatprep.mubr.bf16.mxu0 %v4063_v25  ;;  %3681 = vmatprep.subr.bf16.mxu0 %v4069_v26  ;;  %v4140_v24 = vld [vmem:[%s5513_s0 + $0x424] ss:$52 sps:$4 sm:$0xff]   ;;  %v184_v25 = vld [vmem:[%s5513_s0 + $0x4e8] sm:$0xff]  ;;  %v4143_v26 = vld [vmem:[%s5513_s0 + $0x480] ss:$52 sps:$4 sm:$0xff]  }
  0x5d   :  { %3590 = vmatpush3.bf16.msra.mxu1 %v4078_v27  ;;  %v4144_v27 = vld [vmem:[%s5513_s0 + $0x420] ss:$52 sps:$4 sm:$0xff]  }
  0x5e   :  { %3591 = vmatprep.subr.bf16.mxu1 %v4093_v29  ;;  %v4147_v29 = vld [vmem:[%s5513_s0 + $0x48c] ss:$52 sps:$4 sm:$0xff]  }
  0x5f   :  { %3682 = vmatpush3.bf16.msra.mxu0 %v4070_v28  ;;  %v3130_v28 = vcombine.high %v184_v25, %v184_v25 }
  0x60   :  { %3683 = vmatprep.subr.bf16.mxu0 %v4085_v32  ;;  %v4151_v32 = vld [vmem:[%s5513_s0 + $0x488] ss:$52 sps:$4 sm:$0xff]  }
  0x61   :  { %3592 = vmatpush3.bf16.msra.mxu1 %v4094_v33 }
  0x62   :  { %2047 = vmatmul.mubr.bf16.gmra.mrb[32].mxu1 %v4065_v30  ;;  %2175 = vmatmul.mubr.bf16.gmra.mrb[32].mxu0 %v4066_v31  ;;  %v185_v30 = vld [vmem:[%s5513_s0 + $0x4f0] sm:$0xff]  ;;  %v3129_v31 = vcombine.low %v184_v25, %v184_v25 }
  0x63   :  { %2054 = vmatprep.mubr.bf16.mxu1 %v4071_v34  ;;  %2182 = vmatprep.mubr.bf16.mxu0 %v4073_v35  ;;  %v3132_v33 = vcombine.high %v185_v30, %v185_v30  ;;  %v4157_v34 = vld [vmem:[%s5513_s0 + $0x1c] ss:$52 sps:$4 sm:$0xff]   ;;  %v4155_v35 = vld [vmem:[%s5513_s0 + $0x18] ss:$52 sps:$4 sm:$0xff]  }
  0x64   :  { %3684 = vmatpush3.bf16.msra.mxu0 %v4086_v36  ;;  %3593 = vmatprep.subr.bf16.mxu1 %v4107_v41  ;;  %v3131_v36 = vcombine.low %v185_v30, %v185_v30  ;;  %v4175_v41 = vld [vmem:[%s5512_s1 + $0x288] sm:$0xff]  }
  0x65   :  { %3685 = vmatprep.subr.bf16.mxu0 %v4099_v37  ;;  %3594 = vmatpush3.bf16.msra.mxu1 %v4110_v44  ;;  %v4160_v37 = vld [vmem:[%s5512_s1 + $0x280] sm:$0xff]   ;;  %v4182_v44 = vld [vmem:[%s5512_s1 + $0x2d0] sm:$0xff]  }
  0x66   :  { %3595 = vmatprep.subr.bf16.mxu1 %v4119_v47  ;;  %v4170_v47 = vld [vmem:[%s5513_s0 + $0x8c] ss:$52 sps:$4 sm:$0xff]  }
  0x68   :  { %3686 = vmatpush3.bf16.msra.mxu0 %v4102_v40  ;;  %v4174_v40 = vld [vmem:[%s5512_s1 + $0x2c8] sm:$0xff]  }
  0x69   :  { %3687 = vmatprep.subr.bf16.mxu0 %v4111_v45  ;;  %3596 = vmatpush3.bf16.msra.mxu1 %v4120_v48  ;;  %v4167_v45 = vld [vmem:[%s5512_s1 + $0x300] sm:$0xff]   ;;  %v4183_v48 = vld [vmem:[%s5512_s1 + $0x290] sm:$0xff]  }
  0x6a   :  { %2055 = vmatmul.mubr.bf16.gmra.mrb[36].mxu1 %v4075_v38  ;;  %2183 = vmatmul.mubr.bf16.gmra.mrb[36].mxu0 %v4076_v39  ;;  %v4161_v38 = vld [vmem:[%s5513_s0 + $0x84] ss:$52 sps:$4 sm:$0xff]  }
  0x6b   :  { %2062 = vmatprep.mubr.bf16.mxu1 %v4079_v42  ;;  %2190 = vmatprep.mubr.bf16.mxu0 %v4081_v43  ;;  %v4165_v39 = vld [vmem:[%s5513_s0 + $0x24] ss:$52 sps:$4 sm:$0xff]   ;;  %v4163_v42 = vld [vmem:[%s5513_s0 + $0x20] ss:$52 sps:$4 sm:$0xff]  }
  0x6c   :  { %3688 = vmatpush3.bf16.msra.mxu0 %v4112_v46  ;;  %3597 = vmatprep.subr.bf16.mxu1 %v4135_v59  ;;  %v4166_v43 = vld [vmem:[%s5513_s0 + $0x80] ss:$52 sps:$4 sm:$0xff]   ;;  %v4220_v59 = vld [vmem:[%s5512_s1 + $0x2e8] sm:$0xff]  }
  0x6d   :  { %3689 = vmatprep.subr.bf16.mxu0 %v4127_v53  ;;  %3598 = vmatpush3.bf16.msra.mxu1 %v4136_v60  ;;  %v4168_v46 = vld [vmem:[%s5513_s0 + $0xec] ss:$52 sps:$4 sm:$0xff]   ;;  %v4172_v53 = vld [vmem:[%s5513_s0 + $0xe8] ss:$52 sps:$4 sm:$0xff]  }
  0x6e   :  { %3599 = vmatprep.subr.bf16.mxu1 %v4145_v63  ;;  %v4221_v60 = vld [vmem:[%s5512_s1 + $0x2a8] sm:$0xff]   ;;  %v4180_v63 = vld [vmem:[%s5513_s0 + $0x150] ss:$52 sps:$4 sm:$0xff]  }
  0x70   :  { %3690 = vmatpush3.bf16.msra.mxu0 %v4128_v54  ;;  %v4173_v54 = vld [vmem:[%s5513_s0 + $0x88] ss:$52 sps:$4 sm:$0xff]  }
  0x71   :  { %3691 = vmatprep.subr.bf16.mxu0 %v4137_v61  ;;  %3600 = vmatpush3.bf16.msra.mxu1 %v4149_v4  ;;  %v4240_v61 = vld [vmem:[%s5512_s1 + $0x318] sm:$0xff]  }
  0x72   :  { %2063 = vmatmul.mubr.bf16.gmra.mrb[40].mxu1 %v4083_v49  ;;  %2191 = vmatmul.mubr.bf16.gmra.mrb[40].mxu0 %v4084_v50  ;;  %v4197_v49 = vld [vmem:[%s5512_s1 + $0x2d8] sm:$0xff]   ;;  %v4190_v50 = vld [vmem:[%s5512_s1 + $0x308] sm:$0xff]  }
  0x73   :  { %2070 = vmatprep.mubr.bf16.mxu1 %v4087_v51  ;;  %2198 = vmatprep.mubr.bf16.mxu0 %v4089_v52  ;;  %v4198_v51 = vld [vmem:[%s5512_s1 + $0x298] sm:$0xff]   ;;  %v4209_v52 = vld [vmem:[%s5512_s1 + $0x2e0] sm:$0xff]  }
  0x74   :  { %3692 = vmatpush3.bf16.msra.mxu0 %v4142_v62  ;;  %3773 = vmatprep.subr.bf16.mxu1 %v4159_v7  ;;  %v4234_v62 = vld [vmem:[%s5512_s1 + $0x2f0] sm:$0xff]   ;;  %v4243_v4 = vld [vmem:[%s5512_s1 + $0x2f8] sm:$0xff]  }
  0x75   :  { %3693 = vmatprep.subr.bf16.mxu0 %v4152_v5  ;;  %v4247_v5 = vld [vmem:[%s5512_s1 + $0x2b8] sm:$0xff]  }
  0x76   :  { %v4189_v7 = vld [vmem:[%s5513_s0 + $0x158] ss:$52 sps:$4 sm:$0xff]  }
  0x78   :  { %3694 = vmatpush3.bf16.msra.mxu0 %v4153_v6  ;;  %v4188_v6 = vld [vmem:[%s5513_s0 + $0x1b8] ss:$52 sps:$4 sm:$0xff]  }
  0x79   :  { %3884 = vmatprep.subr.bf16.mxu0 %v4303_v8 }
  0x7a   :  { %2071 = vmatmul.mubr.bf16.gmra.mrb[44].mxu1 %v4091_v55  ;;  %2199 = vmatmul.mubr.bf16.gmra.mrb[44].mxu0 %v4092_v56  ;;  %v4176_v55 = vld [vmem:[%s5513_s0 + $0x154] ss:$52 sps:$4 sm:$0xff]  }
  0x7b   :  { %2078 = vmatprep.mubr.bf16.mxu1 %v4095_v57  ;;  %2206 = vmatprep.mubr.bf16.mxu0 %v4097_v58  ;;  %v4178_v56 = vld [vmem:[%s5513_s0 + $0xf4] ss:$52 sps:$4 sm:$0xff]   ;;  %v4212_v57 = vld [vmem:[%s5512_s1 + $0x2a0] sm:$0xff]  }
  0x7c   :  { %v4213_v58 = vld [vmem:[%s5512_s1 + $0x310] sm:$0xff]  }
  0x82   :  { %2079 = vmatmul.mubr.bf16.gmra.mrb[48].mxu1 %v4100_v0  ;;  %2207 = vmatmul.mubr.bf16.gmra.mrb[48].mxu0 %v4101_v1  ;;  %v4181_v0 = vld [vmem:[%s5513_s0 + $0xf0] ss:$52 sps:$4 sm:$0xff]  }
  0x83   :  { %2086 = vmatprep.mubr.bf16.mxu1 %v4103_v2  ;;  %2214 = vmatprep.mubr.bf16.mxu0 %v4105_v3  ;;  %v4184_v1 = vld [vmem:[%s5513_s0 + $0x1bc] ss:$52 sps:$4 sm:$0xff]  }
  0x84   :  { %v4186_v2 = vld [vmem:[%s5513_s0 + $0x15c] ss:$52 sps:$4 sm:$0xff]  }
  0x85   :  { %v4235_v3 = vld [vmem:[%s5512_s1 + $0x2b0] sm:$0xff]  }
  0x8a   :  { %2087 = vmatmul.mubr.bf16.gmra.mrb[52].mxu1 %v4108_v9  ;;  %2215 = vmatmul.mubr.bf16.gmra.mrb[52].mxu0 %v4109_v10  ;;  %v4191_v9 = vld [vmem:[%s5513_s0 + $0x224] ss:$52 sps:$4 sm:$0xff]  }
  0x8b   :  { %2094 = vmatprep.mubr.bf16.mxu1 %v4113_v11  ;;  %2222 = vmatprep.mubr.bf16.mxu0 %v4115_v12  ;;  %v4193_v10 = vld [vmem:[%s5513_s0 + $0x1c4] ss:$52 sps:$4 sm:$0xff]   ;;  %v4195_v11 = vld [vmem:[%s5513_s0 + $0x220] ss:$52 sps:$4 sm:$0xff]  }
  0x8c   :  { %v4196_v12 = vld [vmem:[%s5513_s0 + $0x1c0] ss:$52 sps:$4 sm:$0xff]  }
  0x92   :  { %2095 = vmatmul.mubr.bf16.gmra.mrb[56].mxu1 %v4117_v13  ;;  %2223 = vmatmul.mubr.bf16.gmra.mrb[56].mxu0 %v4118_v14  ;;  %v4199_v13 = vld [vmem:[%s5513_s0 + $0x28c] ss:$52 sps:$4 sm:$0xff]  }
  0x93   :  { %2102 = vmatprep.mubr.bf16.mxu1 %v4121_v15  ;;  %2230 = vmatprep.mubr.bf16.mxu0 %v4123_v16  ;;  %v4201_v14 = vld [vmem:[%s5513_s0 + $0x22c] ss:$52 sps:$4 sm:$0xff]   ;;  %v4203_v15 = vld [vmem:[%s5513_s0 + $0x288] ss:$52 sps:$4 sm:$0xff]  }
  0x94   :  { %v4204_v16 = vld [vmem:[%s5513_s0 + $0x228] ss:$52 sps:$4 sm:$0xff]  }
  0x9a   :  { %2103 = vmatmul.mubr.bf16.gmra.mrb[60].mxu1 %v4125_v17  ;;  %2231 = vmatmul.mubr.bf16.gmra.mrb[60].mxu0 %v4126_v18  ;;  %v4205_v17 = vld [vmem:[%s5513_s0 + $0x2f4] ss:$52 sps:$4 sm:$0xff]  }
  0x9b   :  { %2110 = vmatprep.mubr.bf16.mxu1 %v4129_v19  ;;  %2238 = vmatprep.mubr.bf16.mxu0 %v4131_v20  ;;  %v4207_v18 = vld [vmem:[%s5513_s0 + $0x294] ss:$52 sps:$4 sm:$0xff]   ;;  %v4210_v19 = vld [vmem:[%s5513_s0 + $0x2f0] ss:$52 sps:$4 sm:$0xff]  }
  0x9c   :  { %v4211_v20 = vld [vmem:[%s5513_s0 + $0x290] ss:$52 sps:$4 sm:$0xff]  }
  0xa2   :  { %2111 = vmatmul.mubr.bf16.gmra.mrb[64].mxu1 %v4133_v21  ;;  %2239 = vmatmul.mubr.bf16.gmra.mrb[64].mxu0 %v4134_v22  ;;  %v4214_v21 = vld [vmem:[%s5513_s0 + $0x35c] ss:$52 sps:$4 sm:$0xff]  }
  0xa3   :  { %2118 = vmatprep.mubr.bf16.mxu1 %v4138_v23  ;;  %2246 = vmatprep.mubr.bf16.mxu0 %v4140_v24  ;;  %v4216_v22 = vld [vmem:[%s5513_s0 + $0x2fc] ss:$52 sps:$4 sm:$0xff]  }
  0xaa   :  { %2119 = vmatmul.mubr.bf16.gmra.mrb[68].mxu1 %v4143_v26  ;;  %2247 = vmatmul.mubr.bf16.gmra.mrb[68].mxu0 %v4144_v27  ;;  %v4218_v27 = vld [vmem:[%s5513_s0 + $0x358] ss:$52 sps:$4 sm:$0xff]  }
  0xab   :  { %2126 = vmatprep.mubr.bf16.mxu1 %v3130_v28  ;;  %2254 = vmatprep.mubr.bf16.mxu0 %v4147_v29  ;;  %v4219_v28 = vld [vmem:[%s5513_s0 + $0x2f8] ss:$52 sps:$4 sm:$0xff]  }
  0xb2   :  { %2127 = vmatmul.mubr.bf16.gmra.mrb[72].mxu1 %v3129_v31  ;;  %2255 = vmatmul.mubr.bf16.gmra.mrb[72].mxu0 %v4151_v32 }
  0xb3   :  { %2262 = vmatprep.mubr.bf16.mxu0 %v3132_v33  ;;  %2302 = vmatprep.mubr.bf16.mxu1 %v4157_v34  ;;  %v4222_v33 = vld [vmem:[%s5513_s0 + $0x3c4] ss:$52 sps:$4 sm:$0xff]  }
  0xb4   :  { %v4224_v34 = vld [vmem:[%s5513_s0 + $0x364] ss:$52 sps:$4 sm:$0xff]  }
  0xba   :  { %2263 = vmatmul.mubr.bf16.gmra.mrb[76].mxu0 %v3131_v36  ;;  %2303 = vmatmul.mubr.bf16.vlgmr.msra.gmra.mrb[76].mxu1 %v4155_v35 }
  0xbb   :  { %3774 = vmatpush3.bf16.msra.mxu1 %v4160_v37  ;;  %2310 = vmatprep.mubr.bf16.mxu1 %v4161_v38 }
  0xbc   :  { %2438 = vmatprep.mubr.bf16.mxu0 %v4165_v39  ;;  %3775 = vmatprep.subr.bf16.mxu1 %v4174_v40 }
  0xbf   :  { %3776 = vmatpush3.bf16.msra.mxu1 %v4175_v41 }
  0xc0   :  { %3777 = vmatprep.subr.bf16.mxu1 %v4182_v44  ;;  %v4227_v44 = vld [vmem:[%s5513_s0 + $0x360] ss:$52 sps:$4 sm:$0xff]  }
  0xc2   :  { %2311 = vmatmul.mubr.bf16.gmra.mrb[80].mxu1 %v4166_v43  ;;  %2439 = vmatmul.mubr.bf16.vlgmr.msra.gmra.mrb[80].mxu0 %v4163_v42  ;;  %v4226_v43 = vld [vmem:[%s5513_s0 + $0x3c0] ss:$52 sps:$4 sm:$0xff]  }
  0xc3   :  { %3885 = vmatpush3.bf16.msra.mxu0 %v4167_v45  ;;  %2318 = vmatprep.mubr.bf16.mxu1 %v4168_v46 }
  0xc4   :  { %2446 = vmatprep.mubr.bf16.mxu0 %v4170_v47  ;;  %3778 = vmatpush3.bf16.msra.mxu1 %v4183_v48 }
  0xc5   :  { %3886 = vmatprep.subr.bf16.mxu0 %v4303_v8  ;;  %3779 = vmatprep.subr.bf16.mxu1 %v4197_v49  ;;  %v4228_v49 = vld [vmem:[%s5513_s0 + $0x42c] ss:$52 sps:$4 sm:$0xff]  }
  0xc7   :  { %3887 = vmatpush3.bf16.msra.mxu0 %v4190_v50  ;;  %v4230_v50 = vld [vmem:[%s5513_s0 + $0x3cc] ss:$52 sps:$4 sm:$0xff]  }
  0xc8   :  { %3780 = vmatpush3.bf16.msra.mxu1 %v4198_v51  ;;  %3888 = vmatprep.subr.bf16.mxu0 %v4303_v8  ;;  %v4987_v51 = vld [vmem:[%s5514_s2] ss:$0 sm:$0xff] }
  0xc9   :  { %3781 = vmatprep.subr.bf16.mxu1 %v4209_v52 }
  0xca   :  { %2319 = vmatmul.mubr.bf16.gmra.mrb[84].mxu1 %v4172_v53  ;;  %2447 = vmatmul.mubr.bf16.gmra.mrb[84].mxu0 %v4173_v54 }
  0xcb   :  { %2326 = vmatprep.mubr.bf16.mxu1 %v4176_v55  ;;  %2454 = vmatprep.mubr.bf16.mxu0 %v4178_v56 }
  0xcc   :  { %3782 = vmatpush3.bf16.msra.mxu1 %v4212_v57  ;;  %3889 = vmatpush3.bf16.msra.mxu0 %v4213_v58 }
  0xcd   :  { %3783 = vmatprep.subr.bf16.mxu1 %v4220_v59  ;;  %3890 = vmatprep.subr.bf16.mxu0 %v4303_v8 }
  0xd0   :  { %3784 = vmatpush3.bf16.msra.mxu1 %v4221_v60  ;;  %3891 = vmatpush3.bf16.msra.mxu0 %v4240_v61 }
  0xd1   :  { %3785 = vmatprep.subr.bf16.mxu1 %v4234_v62  ;;  %v4232_v62 = vld [vmem:[%s5513_s0 + $0x428] ss:$52 sps:$4 sm:$0xff]  }
  0xd2   :  { %2327 = vmatmul.mubr.bf16.gmra.mrb[88].mxu1 %v4180_v63  ;;  %2455 = vmatmul.mubr.bf16.gmra.mrb[88].mxu0 %v4181_v0  ;;  %v4233_v63 = vld [vmem:[%s5513_s0 + $0x3c8] ss:$52 sps:$4 sm:$0xff]  }
  0xd3   :  { %2334 = vmatprep.mubr.bf16.mxu1 %v4184_v1  ;;  %2462 = vmatprep.mubr.bf16.mxu0 %v4186_v2 }
  0xd4   :  { %3786 = vmatpush3.bf16.msra.mxu1 %v4235_v3 }
  0xd5   :  { %3787 = vmatprep.subr.bf16.mxu1 %v4243_v4  ;;  %v4236_v4 = vld [vmem:[%s5513_s0 + $0x494] ss:$52 sps:$4 sm:$0xff]  }
  0xd8   :  { %3788 = vmatpush3.bf16.msra.mxu1 %v4247_v5  ;;  %v4238_v5 = vld [vmem:[%s5513_s0 + $0x434] ss:$52 sps:$4 sm:$0xff]  }
  0xda   :  { %2335 = vmatmul.mubr.bf16.gmra.mrb[92].mxu1 %v4188_v6  ;;  %2463 = vmatmul.mubr.bf16.gmra.mrb[92].mxu0 %v4189_v7 }
  0xdb   :  { %2342 = vmatprep.mubr.bf16.mxu1 %v4191_v9  ;;  %2470 = vmatprep.mubr.bf16.mxu0 %v4193_v10 }
  0xe2   :  { %2343 = vmatmul.mubr.bf16.gmra.mrb[96].mxu1 %v4195_v11  ;;  %2471 = vmatmul.mubr.bf16.gmra.mrb[96].mxu0 %v4196_v12 }
  0xe3   :  { %2350 = vmatprep.mubr.bf16.mxu1 %v4199_v13  ;;  %2478 = vmatprep.mubr.bf16.mxu0 %v4201_v14  ;;  %v186_v13 = vld [vmem:[%s5513_s0 + $0x4f8] sm:$0xff] }
  0xea   :  { %2351 = vmatmul.mubr.bf16.gmra.mrb[100].mxu1 %v4203_v15  ;;  %2479 = vmatmul.mubr.bf16.gmra.mrb[100].mxu0 %v4204_v16 }
  0xeb   :  { %2358 = vmatprep.mubr.bf16.mxu1 %v4205_v17  ;;  %2486 = vmatprep.mubr.bf16.mxu0 %v4207_v18  ;;  %v4241_v18 = vld [vmem:[%s5513_s0 + $0x490] ss:$52 sps:$4 sm:$0xff]  }
  0xf2   :  { %2359 = vmatmul.mubr.bf16.gmra.mrb[104].mxu1 %v4210_v19  ;;  %2487 = vmatmul.mubr.bf16.gmra.mrb[104].mxu0 %v4211_v20  ;;  %v4242_v19 = vld [vmem:[%s5513_s0 + $0x430] ss:$52 sps:$4 sm:$0xff]  }
  0xf3   :  { %2366 = vmatprep.mubr.bf16.mxu1 %v4214_v21  ;;  %2494 = vmatprep.mubr.bf16.mxu0 %v4216_v22 }
  0xf5   :  { %v3319_v23 = vpop.f32.mrb[0].mxu0  ;;  %v3361_v24 = vpop.f32.mrb[0].mxu1 }
  0xf6   :  { %v3320_v25 = vpop.f32.mrb[1].mxu0  ;;  %v3362_v26 = vpop.f32.mrb[1].mxu1 }
  0xf7   :  { %v4956_v29 = vadd.f32 %v3320_v25, %v3319_v23  ;;  %v3322_v30 = vpop.f32.mrb[2].mxu0  ;;  %v4958_v31 = vadd.f32 %v3362_v26, %v3361_v24  ;;  %v3364_v32 = vpop.f32.mrb[2].mxu1  ;;  %v3134_v24 = vcombine.high %v186_v13, %v186_v13  ;;  %v4245_v25 = vld [vmem:[%s5513_s0 + $0x49c] ss:$52 sps:$4 sm:$0xff]  }
  0xf8   :  { %v3323_v35 = vpop.f32.mrb[3].mxu0  ;;  %v3365_v36 = vpop.f32.mrb[3].mxu1 }
  0xf9   :  { %v4966_v37 = vadd.f32 %v3323_v35, %v3322_v30  ;;  %v4968_v38 = vadd.f32 %v3365_v36, %v3364_v32 }
  0xfa   :  { %2367 = vmatmul.mubr.bf16.gmra.mrb[108].mxu1 %v4218_v27  ;;  %2495 = vmatmul.mubr.bf16.gmra.mrb[108].mxu0 %v4219_v28 }
  0xfb   :  { %2374 = vmatprep.mubr.bf16.mxu1 %v4222_v33  ;;  %2502 = vmatprep.mubr.bf16.mxu0 %v4224_v34  ;;  %v187_v34 = vld [vmem:[%s5513_s0 + $0x500] sm:$0xff] }
  0xfd   :  { %v3325_v39 = vpop.f32.mrb[4].mxu0  ;;  %v3367_v40 = vpop.f32.mrb[4].mxu1 }
  0xfe   :  { %v3326_v41 = vpop.f32.mrb[5].mxu0  ;;  %v3368_v42 = vpop.f32.mrb[5].mxu1 }
  0xff   :  { %v4976_v45 = vadd.f32 %v3326_v41, %v3325_v39  ;;  %v3328_v46 = vpop.f32.mrb[6].mxu0  ;;  %v3369_v47 = vadd.f32 %v3368_v42, %v3367_v40  ;;  %v3370_v48 = vpop.f32.mrb[6].mxu1  ;;  %v3133_v41 = vcombine.low %v186_v13, %v186_v13  ;;  %v4249_v42 = vld [vmem:[%s5513_s0 + $0x498] ss:$52 sps:$4 sm:$0xff]  }
 0x100   :  { %v3329_v52 = vpop.f32.mrb[7].mxu0  ;;  %v3371_v53 = vpop.f32.mrb[7].mxu1 }
 0x101   :  { %v4990_v54 = vadd.f32 %v3369_v47, %v4987_v51  ;;  %v4992_v55 = vadd.f32 %v3329_v52, %v3328_v46  ;;  %v3372_v56 = vadd.f32 %v3371_v53, %v3370_v48  ;;  %v3136_v48 = vcombine.high %v187_v34, %v187_v34 }
 0x102   :  { %2375 = vmatmul.mubr.bf16.gmra.mrb[112].mxu1 %v4226_v43  ;;  %2503 = vmatmul.mubr.bf16.gmra.mrb[112].mxu0 %v4227_v44 }
 0x103   :  { %v4995_v57 = vadd.f32 %v3372_v56, %v4987_v51  ;;  %2382 = vmatprep.mubr.bf16.mxu1 %v4228_v49  ;;  %2510 = vmatprep.mubr.bf16.mxu0 %v4230_v50  ;;  %v4253_v49 = vld [vmem:[%s5513_s0 + $0x2c] ss:$52 sps:$4 sm:$0xff]  }
 0x105   :  { %v3331_v58 = vpop.f32.mrb[8].mxu0  ;;  %v3373_v59 = vpop.f32.mrb[8].mxu1 }
 0x106   :  { %v3332_v60 = vpop.f32.mrb[9].mxu0  ;;  %v3374_v61 = vpop.f32.mrb[9].mxu1 }
 0x107   :  { %v5003_v0 = vadd.f32 %v3332_v60, %v3331_v58  ;;  %v3334_v1 = vpop.f32.mrb[10].mxu0  ;;  %v3375_v2 = vadd.f32 %v3374_v61, %v3373_v59  ;;  %v3376_v3 = vpop.f32.mrb[10].mxu1 }
 0x108   :  { %v3335_v6 = vpop.f32.mrb[11].mxu0  ;;  %v3377_v7 = vpop.f32.mrb[11].mxu1 }
 0x109   :  { %v5012_v9 = vadd.f32 %v3375_v2, %v4987_v51  ;;  %v5014_v10 = vadd.f32 %v3335_v6, %v3334_v1  ;;  %v3378_v11 = vadd.f32 %v3377_v7, %v3376_v3  ;;  %v4251_v1 = vld [vmem:[%s5513_s0 + $0x28] ss:$52 sps:$4 sm:$0xff]   ;;  %v3135_v2 = vcombine.low %v187_v34, %v187_v34 }
 0x10a   :  { %2383 = vmatmul.mubr.bf16.gmra.mrb[116].mxu1 %v4232_v62  ;;  %2511 = vmatmul.mubr.bf16.gmra.mrb[116].mxu0 %v4233_v63  ;;  %v4255_v7 = vld [vmem:[%s5513_s0 + $0x94] ss:$52 sps:$4 sm:$0xff]  }
 0x10b   :  { %v5017_v12 = vadd.f32 %v3378_v11, %v4987_v51  ;;  %2390 = vmatprep.mubr.bf16.mxu1 %v4236_v4  ;;  %2518 = vmatprep.mubr.bf16.mxu0 %v4238_v5 }
 0x10d   :  { %v3337_v14 = vpop.f32.mrb[12].mxu0  ;;  %v3379_v15 = vpop.f32.mrb[12].mxu1 }
 0x10e   :  { %v3338_v16 = vpop.f32.mrb[13].mxu0  ;;  %v3380_v17 = vpop.f32.mrb[13].mxu1 }
 0x10f   :  { %v5028_v20 = vadd.f32 %v3338_v16, %v3337_v14  ;;  %v3340_v21 = vpop.f32.mrb[14].mxu0  ;;  %v3381_v22 = vadd.f32 %v3380_v17, %v3379_v15  ;;  %v3382_v23 = vpop.f32.mrb[14].mxu1 }
 0x110   :  { %v3341_v26 = vpop.f32.mrb[15].mxu0  ;;  %v3383_v27 = vpop.f32.mrb[15].mxu1 }
 0x111   :  { %v5034_v28 = vadd.f32 %v3381_v22, %v4987_v51  ;;  %v5036_v30 = vadd.f32 %v3341_v26, %v3340_v21  ;;  %v3384_v32 = vadd.f32 %v3383_v27, %v3382_v23  ;;  %v4257_v21 = vld [vmem:[%s5513_s0 + $0x90] ss:$52 sps:$4 sm:$0xff]   ;;  %v1897_v23 = vadd.f32 %v4956_v29, %v4987_v51 }
 0x112   :  { %2391 = vmatmul.mubr.bf16.gmra.mrb[120].mxu1 %v4241_v18  ;;  %2519 = vmatmul.mubr.bf16.gmra.mrb[120].mxu0 %v4242_v19  ;;  %v4258_v22 = vld [vmem:[%s5513_s0 + $0x30] ss:$52 sps:$4 sm:$0xff]  }
 0x113   :  { %v5039_v33 = vadd.f32 %v3384_v32, %v4987_v51  ;;  %2398 = vmatprep.mubr.bf16.mxu1 %v3134_v24  ;;  %2526 = vmatprep.mubr.bf16.mxu0 %v4245_v25  ;;  %v4259_v32 = vld [vmem:[%s5513_s0 + $0xfc] ss:$52 sps:$4 sm:$0xff]  }
 0x115   :  { %v3343_v35 = vpop.f32.mrb[16].mxu0  ;;  %v3385_v36 = vpop.f32.mrb[16].mxu1 }
 0x116   :  { %v3344_v39 = vpop.f32.mrb[17].mxu0  ;;  %v3386_v40 = vpop.f32.mrb[17].mxu1 }
 0x117   :  { %v5047_v43 = vadd.f32 %v3344_v39, %v3343_v35  ;;  %v3346_v44 = vpop.f32.mrb[18].mxu0  ;;  %v3387_v46 = vadd.f32 %v3386_v40, %v3385_v36  ;;  %v3388_v47 = vpop.f32.mrb[18].mxu1  ;;  %v1900_v36 = vadd.f32 %v4966_v37, %v4987_v51  ;;  %v4261_v37 = vld [vmem:[%s5513_s0 + $0xf8] ss:$52 sps:$4 sm:$0xff]  }
 0x118   :  { %v3347_v50 = vpop.f32.mrb[19].mxu0  ;;  %v3389_v52 = vpop.f32.mrb[19].mxu1 }
 0x119   :  { %v5053_v53 = vadd.f32 %v3387_v46, %v4987_v51  ;;  %v5055_v56 = vadd.f32 %v3347_v50, %v3346_v44  ;;  %v3390_v58 = vadd.f32 %v3389_v52, %v3388_v47 }
 0x11a   :  { %2399 = vmatmul.mubr.bf16.gmra.mrb[124].mxu1 %v3133_v41  ;;  %2527 = vmatmul.mubr.bf16.gmra.mrb[124].mxu0 %v4249_v42 }
 0x11b   :  { %v5058_v59 = vadd.f32 %v3390_v58, %v4987_v51  ;;  %2534 = vmatprep.mubr.bf16.mxu0 %v3136_v48  ;;  %2574 = vmatprep.mubr.bf16.mxu1 %v4253_v49  ;;  %v4262_v48 = vld [vmem:[%s5513_s0 + $0x98] ss:$52 sps:$4 sm:$0xff]   ;;  %v1905_v49 = vadd.f32 %v4976_v45, %v4987_v51 }
 0x11d   :  { %v3349_v60 = vpop.f32.mrb[20].mxu0  ;;  %v3391_v61 = vpop.f32.mrb[20].mxu1 }
 0x11e   :  { %v3350_v62 = vpop.f32.mrb[21].mxu0  ;;  %v3392_v63 = vpop.f32.mrb[21].mxu1 }
 0x11f   :  { %v5063_v3 = vadd.f32 %v3350_v62, %v3349_v60  ;;  %v3352_v4 = vpop.f32.mrb[22].mxu0  ;;  %v3393_v5 = vadd.f32 %v3392_v63, %v3391_v61  ;;  %v3394_v6 = vpop.f32.mrb[22].mxu1  ;;  %v4263_v61 = vld [vmem:[%s5513_s0 + $0x164] ss:$52 sps:$4 sm:$0xff]   ;;  %v1908_v62 = vadd.f32 %v4992_v55, %v4987_v51 }
 0x120   :  { %v3353_v11 = vpop.f32.mrb[23].mxu0  ;;  %v3395_v13 = vpop.f32.mrb[23].mxu1 }
 0x121   :  { %v5069_v14 = vadd.f32 %v3393_v5, %v4987_v51  ;;  %v5071_v15 = vadd.f32 %v3353_v11, %v3352_v4 }
 0x122   :  { %2535 = vmatmul.mubr.bf16.gmra.mrb[128].mxu0 %v3135_v2  ;;  %2575 = vmatmul.mubr.bf16.vlgmr.msra.gmra.mrb[128].mxu1 %v4251_v1 }
 0x123   :  { %2582 = vmatprep.mubr.bf16.mxu1 %v4255_v7  ;;  %3892 = vmatprep.mubr.msk.bf16.mxu0 %vm4304_vm0, %v4303_v8 }
 0x125   :  { %v3355_v16 = vpop.f32.mrb[24].mxu0  ;;  %v3413_v17 = vpop.f32.mrb[24].mxu1 }
 0x126   :  { %v3356_v18 = vpop.f32.mrb[25].mxu0  ;;  %v3414_v19 = vpop.f32.mrb[25].mxu1 }
 0x127   :  { %v5083_v24 = vadd.f32 %v3356_v18, %v3355_v16  ;;  %v3415_v25 = vadd.f32 %v3414_v19, %v3413_v17  ;;  %v3358_v26 = vpop.f32.mrb[26].mxu0  ;;  %v3416_v27 = vpop.f32.mrb[26].mxu1  ;;  %v4265_v17 = vld [vmem:[%s5513_s0 + $0x160] ss:$52 sps:$4 sm:$0xff]   ;;  %v1913_v19 = vadd.f32 %v5003_v0, %v4987_v51 }
 0x128   :  { %v3359_v34 = vpop.f32.mrb[27].mxu0  ;;  %v3417_v35 = vpop.f32.mrb[27].mxu1  ;;  %v4266_v18 = vld [vmem:[%s5513_s0 + $0x100] ss:$52 sps:$4 sm:$0xff]  }
 0x129   :  { %v2033_v39 = vadd.f32 %v3415_v25, %v1897_v23  ;;  %v5090_v40 = vadd.f32 %v3359_v34, %v3358_v26  ;;  %v3418_v41 = vadd.f32 %v3417_v35, %v3416_v27  ;;  %v4267_v26 = vld [vmem:[%s5513_s0 + $0x1cc] ss:$52 sps:$4 sm:$0xff]   ;;  %v1916_v27 = vadd.f32 %v5014_v10, %v4987_v51 }
 0x12a   :  { %2583 = vmatmul.mubr.bf16.gmra.mrb[132].mxu1 %v4257_v21  ;;  %3893 = vmatmul.mubr.msk.bf16.vlgmr.msra.gmra.mrb[132].mxu0 %vm1822_vm1, %v4258_v22 }
 0x12b   :  { %v2036_v29 = vadd.f32 %v3418_v41, %v1900_v36  ;;  %2590 = vmatprep.mubr.bf16.mxu1 %v4259_v32  ;;  %3896 = vmatprep.mubr.msk.bf16.mxu0 %vm4304_vm0, %v4303_v8 }
 0x12d   :  { %v3419_v42 = vpop.f32.mrb[28].mxu1  ;;  %v3507_v44 = vpop.f32.mrb[28].mxu0 }
 0x12e   :  { %v3420_v46 = vpop.f32.mrb[29].mxu1  ;;  %v3508_v47 = vpop.f32.mrb[29].mxu0 }
 0x12f   :  { %v3421_v50 = vadd.f32 %v3420_v46, %v3419_v42  ;;  %v3509_v52 = vadd.f32 %v3508_v47, %v3507_v44  ;;  %v3422_v58 = vpop.f32.mrb[30].mxu1  ;;  %v3510_v60 = vpop.f32.mrb[30].mxu0  ;;  %v4269_v47 = vld [vmem:[%s5513_s0 + $0x1c8] ss:$52 sps:$4 sm:$0xff]  }
 0x130   :  { %v3423_v63 = vpop.f32.mrb[31].mxu1  ;;  %v3511_v1 = vpop.f32.mrb[31].mxu0 }
 0x131   :  { %v2041_v2 = vadd.f32 %v3421_v50, %v1905_v49  ;;  %v5108_v4 = vadd.f32 %v3509_v52, %v2033_v39  ;;  %v3424_v5 = vadd.f32 %v3423_v63, %v3422_v58  ;;  %v3512_v6 = vadd.f32 %v3511_v1, %v3510_v60  ;;  %v4271_v60 = vld [vmem:[%s5513_s0 + $0x234] ss:$52 sps:$4 sm:$0xff]  }
 0x132   :  { %2591 = vmatmul.mubr.bf16.gmra.mrb[136].mxu1 %v4261_v37  ;;  %3897 = vmatmul.mubr.msk.bf16.gmra.mrb[136].mxu0 %vm1822_vm1, %v4262_v48  ;;  %v4270_v37 = vld [vmem:[%s5513_s0 + $0x168] ss:$52 sps:$4 sm:$0xff]   ;;  %v1921_v48 = vadd.f32 %v5028_v20, %v4987_v51 }
 0x133   :  { %v2044_v45 = vadd.f32 %v3424_v5, %v1908_v62  ;;  %v5111_v7 = vadd.f32 %v3512_v6, %v2036_v29  ;;  %2598 = vmatprep.mubr.bf16.mxu1 %v4263_v61  ;;  %3900 = vmatprep.mubr.msk.bf16.mxu0 %vm4304_vm0, %v4303_v8  ;;  %v1924_v61 = vadd.f32 %v5036_v30, %v4987_v51 }
 0x135   :  { %v3425_v11 = vpop.f32.mrb[32].mxu1  ;;  %v3513_v13 = vpop.f32.mrb[32].mxu0 }
 0x136   :  { %v3426_v55 = vpop.f32.mrb[33].mxu1  ;;  %v3514_v16 = vpop.f32.mrb[33].mxu0 }
 0x137   :  { %v3427_v21 = vadd.f32 %v3426_v55, %v3425_v11  ;;  %v3515_v22 = vadd.f32 %v3514_v16, %v3513_v13  ;;  %v3428_v23 = vpop.f32.mrb[34].mxu1  ;;  %v3516_v25 = vpop.f32.mrb[34].mxu0  ;;  %v4273_v16 = vld [vmem:[%s5513_s0 + $0x230] ss:$52 sps:$4 sm:$0xff]  }
 0x138   :  { %v3429_v32 = vpop.f32.mrb[35].mxu1  ;;  %v3517_v34 = vpop.f32.mrb[35].mxu0 }
 0x139   :  { %v2049_v35 = vadd.f32 %v3427_v21, %v1913_v19  ;;  %v5128_v36 = vadd.f32 %v3515_v22, %v2041_v2  ;;  %v3430_v39 = vadd.f32 %v3429_v32, %v3428_v23  ;;  %v3518_v41 = vadd.f32 %v3517_v34, %v3516_v25  ;;  %v4275_v25 = vld [vmem:[%s5513_s0 + $0x29c] ss:$52 sps:$4 sm:$0xff]  }
 0x13a   :  { %2599 = vmatmul.mubr.bf16.gmra.mrb[140].mxu1 %v4265_v17  ;;  %3901 = vmatmul.mubr.msk.bf16.gmra.mrb[140].mxu0 %vm1822_vm1, %v4266_v18  ;;  %v4274_v17 = vld [vmem:[%s5513_s0 + $0x1d0] ss:$52 sps:$4 sm:$0xff]   ;;  %v1929_v18 = vadd.f32 %v5047_v43, %v4987_v51 }
 0x13b   :  { %v2052_v0 = vadd.f32 %v3430_v39, %v1916_v27  ;;  %v5131_v29 = vadd.f32 %v3518_v41, %v2044_v45  ;;  %2606 = vmatprep.mubr.bf16.mxu1 %v4267_v26  ;;  %3904 = vmatprep.mubr.msk.bf16.mxu0 %vm4304_vm0, %v4303_v8  ;;  %v1932_v26 = vadd.f32 %v5055_v56, %v4987_v51 }
 0x13d   :  { %v3431_v42 = vpop.f32.mrb[36].mxu1  ;;  %v3519_v44 = vpop.f32.mrb[36].mxu0 }
 0x13e   :  { %v3432_v10 = vpop.f32.mrb[37].mxu1  ;;  %v3520_v46 = vpop.f32.mrb[37].mxu0 }
 0x13f   :  { %v3433_v49 = vadd.f32 %v3432_v10, %v3431_v42  ;;  %v3521_v50 = vadd.f32 %v3520_v46, %v3519_v44  ;;  %v3434_v52 = vpop.f32.mrb[38].mxu1  ;;  %v3522_v58 = vpop.f32.mrb[38].mxu0  ;;  %v4277_v46 = vld [vmem:[%s5513_s0 + $0x298] ss:$52 sps:$4 sm:$0xff]  }
 0x140   :  { %v3435_v62 = vpop.f32.mrb[39].mxu1  ;;  %v3523_v63 = vpop.f32.mrb[39].mxu0 }
 0x141   :  { %v2057_v1 = vadd.f32 %v3433_v49, %v1921_v48  ;;  %v5148_v2 = vadd.f32 %v3521_v50, %v2049_v35  ;;  %v3436_v5 = vadd.f32 %v3435_v62, %v3434_v52  ;;  %v3524_v6 = vadd.f32 %v3523_v63, %v3522_v58  ;;  %v4279_v58 = vld [vmem:[%s5513_s0 + $0x304] ss:$52 sps:$4 sm:$0xff]  }
 0x142   :  { %2607 = vmatmul.mubr.bf16.gmra.mrb[144].mxu1 %v4269_v47  ;;  %3905 = vmatmul.mubr.msk.bf16.gmra.mrb[144].mxu0 %vm1822_vm1, %v4270_v37  ;;  %v4278_v47 = vld [vmem:[%s5513_s0 + $0x238] ss:$52 sps:$4 sm:$0xff]   ;;  %v1937_v37 = vadd.f32 %v5063_v3, %v4987_v51 }
 0x143   :  { %v2060_v20 = vadd.f32 %v3436_v5, %v1924_v61  ;;  %v5151_v45 = vadd.f32 %v3524_v6, %v2052_v0  ;;  %2614 = vmatprep.mubr.bf16.mxu1 %v4271_v60  ;;  %3908 = vmatprep.mubr.msk.bf16.mxu0 %vm4304_vm0, %v4303_v8  ;;  %v1940_v60 = vadd.f32 %v5071_v15, %v4987_v51 }
 0x145   :  { %v3437_v11 = vpop.f32.mrb[40].mxu1  ;;  %v3525_v13 = vpop.f32.mrb[40].mxu0 }
 0x146   :  { %v3438_v30 = vpop.f32.mrb[41].mxu1  ;;  %v3526_v55 = vpop.f32.mrb[41].mxu0 }
 0x147   :  { %v3439_v19 = vadd.f32 %v3438_v30, %v3437_v11  ;;  %v3527_v21 = vadd.f32 %v3526_v55, %v3525_v13  ;;  %v3440_v22 = vpop.f32.mrb[42].mxu1  ;;  %v3528_v23 = vpop.f32.mrb[42].mxu0  ;;  %v4281_v55 = vld [vmem:[%s5513_s0 + $0x300] ss:$52 sps:$4 sm:$0xff]  }
 0x148   :  { %v3441_v27 = vpop.f32.mrb[43].mxu1  ;;  %v3529_v32 = vpop.f32.mrb[43].mxu0 }
 0x149   :  { %v2065_v34 = vadd.f32 %v3439_v19, %v1929_v18  ;;  %v5168_v35 = vadd.f32 %v3527_v21, %v2057_v1  ;;  %v3442_v39 = vadd.f32 %v3441_v27, %v3440_v22  ;;  %v3530_v41 = vadd.f32 %v3529_v32, %v3528_v23  ;;  %v4283_v23 = vld [vmem:[%s5513_s0 + $0x36c] ss:$52 sps:$4 sm:$0xff]  }
 0x14a   :  { %2615 = vmatmul.mubr.bf16.gmra.mrb[148].mxu1 %v4273_v16  ;;  %3909 = vmatmul.mubr.msk.bf16.gmra.mrb[148].mxu0 %vm1822_vm1, %v4274_v17  ;;  %v4282_v16 = vld [vmem:[%s5513_s0 + $0x2a0] ss:$52 sps:$4 sm:$0xff]   ;;  %v1945_v17 = vadd.f32 %v5083_v24, %v4987_v51 }
 0x14b   :  { %v2068_v43 = vadd.f32 %v3442_v39, %v1932_v26  ;;  %v5171_v0 = vadd.f32 %v3530_v41, %v2060_v20  ;;  %2622 = vmatprep.mubr.bf16.mxu1 %v4275_v25  ;;  %3912 = vmatprep.mubr.msk.bf16.mxu0 %vm4304_vm0, %v4303_v8  ;;  %v1948_v25 = vadd.f32 %v5090_v40, %v4987_v51 }
 0x14d   :  { %v3443_v42 = vpop.f32.mrb[44].mxu1  ;;  %v3531_v44 = vpop.f32.mrb[44].mxu0 }
 0x14e   :  { %v3444_v56 = vpop.f32.mrb[45].mxu1  ;;  %v3532_v10 = vpop.f32.mrb[45].mxu0 }
 0x14f   :  { %v3445_v48 = vadd.f32 %v3444_v56, %v3443_v42  ;;  %v3533_v49 = vadd.f32 %v3532_v10, %v3531_v44  ;;  %v3446_v50 = vpop.f32.mrb[46].mxu1  ;;  %v3534_v52 = vpop.f32.mrb[46].mxu0  ;;  %v4285_v10 = vld [vmem:[%s5513_s0 + $0x368] ss:$52 sps:$4 sm:$0xff]  }
 0x150   :  { %v3447_v61 = vpop.f32.mrb[47].mxu1  ;;  %v3535_v62 = vpop.f32.mrb[47].mxu0 }
 0x151   :  { %v2073_v63 = vadd.f32 %v3445_v48, %v1937_v37  ;;  %v5188_v1 = vadd.f32 %v3533_v49, %v2065_v34  ;;  %v3448_v5 = vadd.f32 %v3447_v61, %v3446_v50  ;;  %v3536_v6 = vadd.f32 %v3535_v62, %v3534_v52  ;;  %v4287_v52 = vld [vmem:[%s5513_s0 + $0x3d4] ss:$52 sps:$4 sm:$0xff]  }
 0x152   :  { %2623 = vmatmul.mubr.bf16.gmra.mrb[152].mxu1 %v4277_v46  ;;  %3913 = vmatmul.mubr.msk.bf16.gmra.mrb[152].mxu0 %vm1822_vm1, %v4278_v47  ;;  %v4286_v46 = vld [vmem:[%s5513_s0 + $0x308] ss:$52 sps:$4 sm:$0xff]   ;;  %v1953_v47 = vadd.f32 %v4958_v31, %v4987_v51 }
 0x153   :  { %v2076_v3 = vadd.f32 %v3448_v5, %v1940_v60  ;;  %v5191_v20 = vadd.f32 %v3536_v6, %v2068_v43  ;;  %2630 = vmatprep.mubr.bf16.mxu1 %v4279_v58  ;;  %3916 = vmatprep.mubr.msk.bf16.mxu0 %vm4304_vm0, %v4303_v8  ;;  %v1956_v58 = vadd.f32 %v4968_v38, %v4987_v51 }
 0x155   :  { %v3449_v11 = vpop.f32.mrb[48].mxu1  ;;  %v3537_v13 = vpop.f32.mrb[48].mxu0 }
 0x156   :  { %v3450_v15 = vpop.f32.mrb[49].mxu1  ;;  %v3538_v30 = vpop.f32.mrb[49].mxu0 }
 0x157   :  { %v3451_v18 = vadd.f32 %v3450_v15, %v3449_v11  ;;  %v3539_v19 = vadd.f32 %v3538_v30, %v3537_v13  ;;  %v3452_v21 = vpop.f32.mrb[50].mxu1  ;;  %v3540_v22 = vpop.f32.mrb[50].mxu0  ;;  %v4289_v15 = vld [vmem:[%s5513_s0 + $0x3d0] ss:$52 sps:$4 sm:$0xff]  }
 0x158   :  { %v3453_v26 = vpop.f32.mrb[51].mxu1  ;;  %v3541_v27 = vpop.f32.mrb[51].mxu0  ;;  %v4290_v30 = vld [vmem:[%s5513_s0 + $0x370] ss:$52 sps:$4 sm:$0xff]  }
 0x159   :  { %v2081_v32 = vadd.f32 %v3451_v18, %v1945_v17  ;;  %v5208_v34 = vadd.f32 %v3539_v19, %v2073_v63  ;;  %v3454_v39 = vadd.f32 %v3453_v26, %v3452_v21  ;;  %v3542_v41 = vadd.f32 %v3541_v27, %v3540_v22  ;;  %v4291_v19 = vld [vmem:[%s5513_s0 + $0x43c] ss:$52 sps:$4 sm:$0xff]  }
 0x15a   :  { %2631 = vmatmul.mubr.bf16.gmra.mrb[156].mxu1 %v4281_v55  ;;  %3917 = vmatmul.mubr.msk.bf16.gmra.mrb[156].mxu0 %vm1822_vm1, %v4282_v16 }
 0x15b   :  { %v2084_v24 = vadd.f32 %v3454_v39, %v1948_v25  ;;  %v5211_v43 = vadd.f32 %v3542_v41, %v2076_v3  ;;  %2638 = vmatprep.mubr.bf16.mxu1 %v4283_v23  ;;  %3920 = vmatprep.mubr.msk.bf16.mxu0 %vm4304_vm0, %v4303_v8 }
 0x15d   :  { %v3455_v42 = vpop.f32.mrb[52].mxu1  ;;  %v3543_v44 = vpop.f32.mrb[52].mxu0 }
 0x15e   :  { %v3456_v40 = vpop.f32.mrb[53].mxu1  ;;  %v3544_v56 = vpop.f32.mrb[53].mxu0 }
 0x15f   :  { %v3457_v37 = vadd.f32 %v3456_v40, %v3455_v42  ;;  %v3545_v48 = vadd.f32 %v3544_v56, %v3543_v44  ;;  %v3458_v49 = vpop.f32.mrb[54].mxu1  ;;  %v3546_v50 = vpop.f32.mrb[54].mxu0  ;;  %v4294_v40 = vld [vmem:[%s5513_s0 + $0x3d8] ss:$52 sps:$4 sm:$0xff]  }
 0x160   :  { %v3459_v60 = vpop.f32.mrb[55].mxu1  ;;  %v3547_v61 = vpop.f32.mrb[55].mxu0 }
 0x161   :  { %v2089_v62 = vadd.f32 %v3457_v37, %v1953_v47  ;;  %v5228_v63 = vadd.f32 %v3545_v48, %v2081_v32  ;;  %v3460_v5 = vadd.f32 %v3459_v60, %v3458_v49  ;;  %v3548_v6 = vadd.f32 %v3547_v61, %v3546_v50  ;;  %v4295_v47 = vld [vmem:[%s5513_s0 + $0x4a4] ss:$52 sps:$4 sm:$0xff]  }
 0x162   :  { %2639 = vmatmul.mubr.bf16.gmra.mrb[160].mxu1 %v4285_v10  ;;  %3921 = vmatmul.mubr.msk.bf16.gmra.mrb[160].mxu0 %vm1822_vm1, %v4286_v46 }
 0x163   :  { %v2092_v31 = vadd.f32 %v3460_v5, %v1956_v58  ;;  %v5231_v3 = vadd.f32 %v3548_v6, %v2084_v24  ;;  %2646 = vmatprep.mubr.bf16.mxu1 %v4287_v52  ;;  %3924 = vmatprep.mubr.msk.bf16.mxu0 %vm4304_vm0, %v4303_v8 }
 0x165   :  { %v3461_v11 = vpop.f32.mrb[56].mxu1  ;;  %v3549_v13 = vpop.f32.mrb[56].mxu0 }
 0x166   :  { %v3462_v38 = vpop.f32.mrb[57].mxu1  ;;  %v3550_v51 = vpop.f32.mrb[57].mxu0 }
 0x167   :  { %v3463_v55 = vadd.f32 %v3462_v38, %v3461_v11  ;;  %v3551_v16 = vadd.f32 %v3550_v51, %v3549_v13  ;;  %v3464_v17 = vpop.f32.mrb[58].mxu1  ;;  %v3552_v18 = vpop.f32.mrb[58].mxu0  ;;  %v4297_v11 = vld [vmem:[%s5513_s0 + $0x4a0] ss:$52 sps:$4 sm:$0xff]  }
 0x168   :  { %v3465_v21 = vpop.f32.mrb[59].mxu1  ;;  %v3553_v22 = vpop.f32.mrb[59].mxu0 }
 0x169   :  { %v2097_v23 = vadd.f32 %v3463_v55, %v4990_v54  ;;  %v5245_v25 = vadd.f32 %v3551_v16, %v2089_v62  ;;  %v3466_v26 = vadd.f32 %v3465_v21, %v3464_v17  ;;  %v3554_v27 = vadd.f32 %v3553_v22, %v3552_v18  ;;  %v4293_v54 = vld [vmem:[%s5513_s0 + $0x438] ss:$52 sps:$4 sm:$0xff]  }
 0x16a   :  { %2647 = vmatmul.mubr.bf16.gmra.mrb[164].mxu1 %v4289_v15  ;;  %3925 = vmatmul.mubr.msk.bf16.gmra.mrb[164].mxu0 %vm1822_vm1, %v4290_v30  ;;  %v188_v62 = vld [vmem:[%s5513_s0 + $0x508] sm:$0xff] }
 0x16b   :  { %v2100_v32 = vadd.f32 %v3466_v26, %v4995_v57  ;;  %v5249_v39 = vadd.f32 %v3554_v27, %v2092_v31  ;;  %2654 = vmatprep.mubr.bf16.mxu1 %v4291_v19  ;;  %3928 = vmatprep.mubr.msk.bf16.mxu0 %vm4304_vm0, %v4303_v8  ;;  %v3138_v30 = vcombine.high %v188_v62, %v188_v62 }
 0x16d   :  { %v3467_v41 = vpop.f32.mrb[60].mxu1  ;;  %v3555_v24 = vpop.f32.mrb[60].mxu0 }
 0x16e   :  { %v3468_v42 = vpop.f32.mrb[61].mxu1  ;;  %v3556_v44 = vpop.f32.mrb[61].mxu0 }
 0x16f   :  { %v3469_v56 = vadd.f32 %v3468_v42, %v3467_v41  ;;  %v3557_v57 = vadd.f32 %v3556_v44, %v3555_v24  ;;  %v3470_v10 = vpop.f32.mrb[62].mxu1  ;;  %v3558_v46 = vpop.f32.mrb[62].mxu0  ;;  %v4301_v24 = vld [vmem:[%s5513_s0 + $0x4a8] ss:$52 sps:$4 sm:$0xff]  }
 0x170   :  { %v3471_v37 = vpop.f32.mrb[63].mxu1  ;;  %v3559_v48 = vpop.f32.mrb[63].mxu0 }
 0x171   :  { %v2105_v49 = vadd.f32 %v3469_v56, %v5012_v9  ;;  %v5263_v50 = vadd.f32 %v3557_v57, %v2097_v23  ;;  %v3472_v52 = vadd.f32 %v3471_v37, %v3470_v10  ;;  %v3560_v58 = vadd.f32 %v3559_v48, %v3558_v46 }
 0x172   :  { %2655 = vmatmul.mubr.bf16.gmra.mrb[168].mxu1 %v4293_v54  ;;  %3929 = vmatmul.mubr.msk.bf16.gmra.mrb[168].mxu0 %vm1822_vm1, %v4294_v40 }
 0x173   :  { %v2108_v60 = vadd.f32 %v3472_v52, %v5017_v12  ;;  %v5267_v61 = vadd.f32 %v3560_v58, %v2100_v32  ;;  %2662 = vmatprep.mubr.bf16.mxu1 %v4295_v47  ;;  %3932 = vmatprep.mubr.msk.bf16.mxu0 %vm4304_vm0, %v4303_v8  ;;  %v4298_v12 = vld [vmem:[%s5513_s0 + $0x440] ss:$52 sps:$4 sm:$0xff]  }
 0x175   :  { %v3473_v9 = vpop.f32.mrb[64].mxu1  ;;  %v3561_v5 = vpop.f32.mrb[64].mxu0 }
 0x176   :  { %v3474_v6 = vpop.f32.mrb[65].mxu1  ;;  %v3562_v31 = vpop.f32.mrb[65].mxu0 }
 0x177   :  { %v3475_v13 = vadd.f32 %v3474_v6, %v3473_v9  ;;  %v3563_v38 = vadd.f32 %v3562_v31, %v3561_v5  ;;  %v3476_v51 = vpop.f32.mrb[66].mxu1  ;;  %v3564_v15 = vpop.f32.mrb[66].mxu0 }
 0x178   :  { %v3477_v55 = vpop.f32.mrb[67].mxu1  ;;  %v3565_v16 = vpop.f32.mrb[67].mxu0 }
 0x179   :  { %v2113_v17 = vadd.f32 %v3475_v13, %v5034_v28  ;;  %v5281_v18 = vadd.f32 %v3563_v38, %v2105_v49  ;;  %v3478_v19 = vadd.f32 %v3477_v55, %v3476_v51  ;;  %v3566_v21 = vadd.f32 %v3565_v16, %v3564_v15 }
 0x17a   :  { %2663 = vmatmul.mubr.bf16.gmra.mrb[172].mxu1 %v4297_v11  ;;  %3933 = vmatmul.mubr.msk.bf16.gmra.mrb[172].mxu0 %vm1822_vm1, %v4298_v12  ;;  %v3137_v28 = vcombine.low %v188_v62, %v188_v62 }
 0x17b   :  { %v2116_v22 = vadd.f32 %v3478_v19, %v5039_v33  ;;  %v5285_v23 = vadd.f32 %v3566_v21, %v2108_v60  ;;  %2670 = vmatprep.mubr.bf16.mxu1 %v3138_v30  ;;  %3936 = vmatprep.mubr.msk.bf16.mxu0 %vm4304_vm0, %v4303_v8 }
 0x17d   :  { %v3479_v26 = vpop.f32.mrb[68].mxu1  ;;  %v3567_v27 = vpop.f32.mrb[68].mxu0 }
 0x17e   :  { %v3480_v32 = vpop.f32.mrb[69].mxu1  ;;  %v3568_v41 = vpop.f32.mrb[69].mxu0 }
 0x17f   :  { %v3481_v42 = vadd.f32 %v3480_v32, %v3479_v26  ;;  %v3569_v44 = vadd.f32 %v3568_v41, %v3567_v27  ;;  %v3482_v54 = vpop.f32.mrb[70].mxu1  ;;  %v3570_v40 = vpop.f32.mrb[70].mxu0 }
 0x180   :  { %v3483_v33 = vpop.f32.mrb[71].mxu1  ;;  %v3571_v56 = vpop.f32.mrb[71].mxu0 }
 0x181   :  { %v2121_v57 = vadd.f32 %v3481_v42, %v5053_v53  ;;  %v5293_v10 = vadd.f32 %v3569_v44, %v2113_v17  ;;  %v3484_v46 = vadd.f32 %v3483_v33, %v3482_v54  ;;  %v3572_v47 = vadd.f32 %v3571_v56, %v3570_v40  ;;  %v4302_v53 = vld [vmem:[%s5513_s0 + $0x510] ss:$0 sps:$4 sm:$0xff]  }
 0x182   :  { %2671 = vmatmul.mubr.bf16.gmra.mrb[176].mxu1 %v3137_v28  ;;  %3937 = vmatmul.mubr.msk.bf16.gmra.mrb[176].mxu0 %vm1822_vm1, %v4301_v24 }
 0x183   :  { %v2124_v37 = vadd.f32 %v3484_v46, %v5058_v59  ;;  %v5297_v48 = vadd.f32 %v3572_v47, %v2116_v22  ;;  %3940 = vmatprep.mubr.msk.bf16.mxu0 %vm4304_vm0, %v4303_v8 }
 0x185   :  { %v3485_v49 = vpop.f32.mrb[72].mxu1  ;;  %v3573_v52 = vpop.f32.mrb[72].mxu0 }
 0x186   :  { %v3486_v58 = vpop.f32.mrb[73].mxu1  ;;  %v3574_v60 = vpop.f32.mrb[73].mxu0 }
 0x187   :  { %v3487_v62 = vadd.f32 %v3486_v58, %v3485_v49  ;;  %v3575_v9 = vadd.f32 %v3574_v60, %v3573_v52  ;;  %v3576_v5 = vpop.f32.mrb[74].mxu0  ;;  %v3488_v6 = vpop.f32.mrb[74].mxu1 }
 0x188   :  { %v3577_v31 = vpop.f32.mrb[75].mxu0  ;;  %v3489_v11 = vpop.f32.mrb[75].mxu1 }
 0x189   :  { %v2129_v59 = vadd.f32 %v3487_v62, %v5069_v14  ;;  %v5305_v12 = vadd.f32 %v3575_v9, %v2121_v57  ;;  %v3578_v13 = vadd.f32 %v3577_v31, %v3576_v5 }
 0x18a   :  { %3941 = vmatmul.mubr.msk.bf16.gmra.mrb[180].mxu0 %vm1822_vm1, %v4302_v53 }
 0x18b   :  { %v5308_v8 = vadd.f32 %v3578_v13, %v2124_v37 }
 0x18d   :  { %v3579_v38 = vpop.f32.mrb[76].mxu0  ;;  %v3601_v51 = vpop.f32.mrb[76].mxu1 }
 0x18e   :  { %v3580_v15 = vpop.f32.mrb[77].mxu0  ;;  %v3602_v30 = vpop.f32.mrb[77].mxu1 }
 0x18f   :  { %v3581_v55 = vadd.f32 %v3580_v15, %v3579_v38  ;;  %v3603_v16 = vadd.f32 %v3602_v30, %v3601_v51  ;;  %v3582_v17 = vpop.f32.mrb[78].mxu0  ;;  %v3604_v19 = vpop.f32.mrb[78].mxu1 }
 0x190   :  { %v3583_v21 = vpop.f32.mrb[79].mxu0  ;;  %v3605_v22 = vpop.f32.mrb[79].mxu1 }
 0x191   :  { %v5310_v26 = vadd.f32 %v3581_v55, %v2129_v59  ;;  %v2305_v14 = vadd.f32 %v3603_v16, %v5108_v4  ;;  %v3606_v27 = vadd.f32 %v3605_v22, %v3604_v19 }
 0x193   :  { %v2308_v32 = vadd.f32 %v3606_v27, %v5111_v7 }
 0x195   :  { %v3607_v41 = vpop.f32.mrb[80].mxu1  ;;  %v3695_v28 = vpop.f32.mrb[80].mxu0 }
 0x196   :  { %v3608_v24 = vpop.f32.mrb[81].mxu1  ;;  %v3696_v42 = vpop.f32.mrb[81].mxu0 }
 0x197   :  { %v3609_v44 = vadd.f32 %v3608_v24, %v3607_v41  ;;  %v3697_v54 = vadd.f32 %v3696_v42, %v3695_v28  ;;  %v3610_v40 = vpop.f32.mrb[82].mxu1  ;;  %v3698_v33 = vpop.f32.mrb[82].mxu0 }
 0x198   :  { %v3611_v56 = vpop.f32.mrb[83].mxu1  ;;  %v3699_v57 = vpop.f32.mrb[83].mxu0 }
 0x199   :  { %v2313_v46 = vadd.f32 %v3609_v44, %v5128_v36  ;;  %v5315_v47 = vadd.f32 %v3697_v54, %v2305_v14  ;;  %v3612_v37 = vadd.f32 %v3611_v56, %v3610_v40  ;;  %v3700_v49 = vadd.f32 %v3699_v57, %v3698_v33 }
 0x19b   :  { %v2316_v4 = vadd.f32 %v3612_v37, %v5131_v29  ;;  %v5318_v52 = vadd.f32 %v3700_v49, %v2308_v32 }
 0x19d   :  { %v3613_v7 = vpop.f32.mrb[84].mxu1  ;;  %v3701_v58 = vpop.f32.mrb[84].mxu0 }
 0x19e   :  { %v3614_v60 = vpop.f32.mrb[85].mxu1  ;;  %v3702_v53 = vpop.f32.mrb[85].mxu0 }
 0x19f   :  { %v3615_v62 = vadd.f32 %v3614_v60, %v3613_v7  ;;  %v3703_v9 = vadd.f32 %v3702_v53, %v3701_v58  ;;  %v3616_v5 = vpop.f32.mrb[86].mxu1  ;;  %v3704_v6 = vpop.f32.mrb[86].mxu0 }
 0x1a0   :  { %v3617_v31 = vpop.f32.mrb[87].mxu1  ;;  %v3705_v11 = vpop.f32.mrb[87].mxu0 }
 0x1a1   :  { %v2321_v36 = vadd.f32 %v3615_v62, %v5148_v2  ;;  %v5321_v59 = vadd.f32 %v3703_v9, %v2313_v46  ;;  %v3618_v13 = vadd.f32 %v3617_v31, %v3616_v5  ;;  %v3706_v38 = vadd.f32 %v3705_v11, %v3704_v6 }
 0x1a3   :  { %v2324_v29 = vadd.f32 %v3618_v13, %v5151_v45  ;;  %v5324_v51 = vadd.f32 %v3706_v38, %v2316_v4 }
 0x1a5   :  { %v3619_v15 = vpop.f32.mrb[88].mxu1  ;;  %v3707_v30 = vpop.f32.mrb[88].mxu0 }
 0x1a6   :  { %v3620_v55 = vpop.f32.mrb[89].mxu1  ;;  %v3708_v16 = vpop.f32.mrb[89].mxu0 }
 0x1a7   :  { %v3621_v17 = vadd.f32 %v3620_v55, %v3619_v15  ;;  %v3709_v19 = vadd.f32 %v3708_v16, %v3707_v30  ;;  %v3622_v21 = vpop.f32.mrb[90].mxu1  ;;  %v3710_v22 = vpop.f32.mrb[90].mxu0 }
 0x1a8   :  { %v3623_v14 = vpop.f32.mrb[91].mxu1  ;;  %v3711_v27 = vpop.f32.mrb[91].mxu0 }
 0x1a9   :  { %v2329_v2 = vadd.f32 %v3621_v17, %v5168_v35  ;;  %v5327_v32 = vadd.f32 %v3709_v19, %v2321_v36  ;;  %v3624_v41 = vadd.f32 %v3623_v14, %v3622_v21  ;;  %v3712_v28 = vadd.f32 %v3711_v27, %v3710_v22 }
 0x1ab   :  { %v2332_v45 = vadd.f32 %v3624_v41, %v5171_v0  ;;  %v5330_v24 = vadd.f32 %v3712_v28, %v2324_v29 }
 0x1ad   :  { %v3625_v42 = vpop.f32.mrb[92].mxu1  ;;  %v3713_v44 = vpop.f32.mrb[92].mxu0 }
 0x1ae   :  { %v3626_v54 = vpop.f32.mrb[93].mxu1  ;;  %v3714_v40 = vpop.f32.mrb[93].mxu0 }
 0x1af   :  { %v3627_v33 = vadd.f32 %v3626_v54, %v3625_v42  ;;  %v3715_v56 = vadd.f32 %v3714_v40, %v3713_v44  ;;  %v3628_v57 = vpop.f32.mrb[94].mxu1  ;;  %v3716_v46 = vpop.f32.mrb[94].mxu0 }
 0x1b0   :  { %v3629_v37 = vpop.f32.mrb[95].mxu1  ;;  %v3717_v49 = vpop.f32.mrb[95].mxu0 }
 0x1b1   :  { %v2337_v35 = vadd.f32 %v3627_v33, %v5188_v1  ;;  %v5333_v4 = vadd.f32 %v3715_v56, %v2329_v2  ;;  %v3630_v7 = vadd.f32 %v3629_v37, %v3628_v57  ;;  %v3718_v58 = vadd.f32 %v3717_v49, %v3716_v46 }
 0x1b3   :  { %v2340_v0 = vadd.f32 %v3630_v7, %v5191_v20  ;;  %v5336_v60 = vadd.f32 %v3718_v58, %v2332_v45 }
 0x1b5   :  { %v3631_v53 = vpop.f32.mrb[96].mxu1  ;;  %v3719_v62 = vpop.f32.mrb[96].mxu0 }
 0x1b6   :  { %v3632_v9 = vpop.f32.mrb[97].mxu1  ;;  %v3720_v5 = vpop.f32.mrb[97].mxu0 }
 0x1b7   :  { %v3633_v6 = vadd.f32 %v3632_v9, %v3631_v53  ;;  %v3721_v31 = vadd.f32 %v3720_v5, %v3719_v62  ;;  %v3634_v11 = vpop.f32.mrb[98].mxu1  ;;  %v3722_v36 = vpop.f32.mrb[98].mxu0 }
 0x1b8   :  { %v3635_v13 = vpop.f32.mrb[99].mxu1  ;;  %v3723_v38 = vpop.f32.mrb[99].mxu0 }
 0x1b9   :  { %v2345_v1 = vadd.f32 %v3633_v6, %v5208_v34  ;;  %v5339_v29 = vadd.f32 %v3721_v31, %v2337_v35  ;;  %v3636_v15 = vadd.f32 %v3635_v13, %v3634_v11  ;;  %v3724_v30 = vadd.f32 %v3723_v38, %v3722_v36 }
 0x1bb   :  { %v2348_v20 = vadd.f32 %v3636_v15, %v5211_v43  ;;  %v5342_v55 = vadd.f32 %v3724_v30, %v2340_v0 }
 0x1bd   :  { %v3637_v16 = vpop.f32.mrb[100].mxu1  ;;  %v3725_v17 = vpop.f32.mrb[100].mxu0 }
 0x1be   :  { %v3638_v19 = vpop.f32.mrb[101].mxu1  ;;  %v3726_v21 = vpop.f32.mrb[101].mxu0 }
 0x1bf   :  { %v3639_v22 = vadd.f32 %v3638_v19, %v3637_v16  ;;  %v3727_v14 = vadd.f32 %v3726_v21, %v3725_v17  ;;  %v3640_v27 = vpop.f32.mrb[102].mxu1  ;;  %v3728_v2 = vpop.f32.mrb[102].mxu0 }
 0x1c0   :  { %v3641_v41 = vpop.f32.mrb[103].mxu1  ;;  %v3729_v28 = vpop.f32.mrb[103].mxu0 }
 0x1c1   :  { %v2353_v34 = vadd.f32 %v3639_v22, %v5228_v63  ;;  %v5345_v45 = vadd.f32 %v3727_v14, %v2345_v1  ;;  %v3642_v42 = vadd.f32 %v3641_v41, %v3640_v27  ;;  %v3730_v44 = vadd.f32 %v3729_v28, %v3728_v2 }
 0x1c3   :  { %v2356_v43 = vadd.f32 %v3642_v42, %v5231_v3  ;;  %v5348_v54 = vadd.f32 %v3730_v44, %v2348_v20 }
 0x1c5   :  { %v3643_v40 = vpop.f32.mrb[104].mxu1  ;;  %v3731_v33 = vpop.f32.mrb[104].mxu0 }
 0x1c6   :  { %v3644_v56 = vpop.f32.mrb[105].mxu1  ;;  %v3732_v57 = vpop.f32.mrb[105].mxu0 }
 0x1c7   :  { %v3645_v46 = vadd.f32 %v3644_v56, %v3643_v40  ;;  %v3733_v37 = vadd.f32 %v3732_v57, %v3731_v33  ;;  %v3646_v49 = vpop.f32.mrb[106].mxu1  ;;  %v3734_v35 = vpop.f32.mrb[106].mxu0 }
 0x1c8   :  { %v3647_v7 = vpop.f32.mrb[107].mxu1  ;;  %v3735_v58 = vpop.f32.mrb[107].mxu0 }
 0x1c9   :  { %v2361_v63 = vadd.f32 %v3645_v46, %v5245_v25  ;;  %v5351_v0 = vadd.f32 %v3733_v37, %v2353_v34  ;;  %v3648_v53 = vadd.f32 %v3647_v7, %v3646_v49  ;;  %v3736_v62 = vadd.f32 %v3735_v58, %v3734_v35 }
 0x1cb   :  { %v2364_v3 = vadd.f32 %v3648_v53, %v5249_v39  ;;  %v5354_v9 = vadd.f32 %v3736_v62, %v2356_v43 }
 0x1cd   :  { %v3649_v5 = vpop.f32.mrb[108].mxu1  ;;  %v3737_v6 = vpop.f32.mrb[108].mxu0 }
 0x1ce   :  { %v3650_v31 = vpop.f32.mrb[109].mxu1  ;;  %v3738_v11 = vpop.f32.mrb[109].mxu0 }
 0x1cf   :  { %v3651_v36 = vadd.f32 %v3650_v31, %v3649_v5  ;;  %v3739_v13 = vadd.f32 %v3738_v11, %v3737_v6  ;;  %v3652_v38 = vpop.f32.mrb[110].mxu1  ;;  %v3740_v1 = vpop.f32.mrb[110].mxu0 }
 0x1d0   :  { %v3653_v15 = vpop.f32.mrb[111].mxu1  ;;  %v3741_v30 = vpop.f32.mrb[111].mxu0 }
 0x1d1   :  { %v2369_v25 = vadd.f32 %v3651_v36, %v5263_v50  ;;  %v5357_v20 = vadd.f32 %v3739_v13, %v2361_v63  ;;  %v3654_v16 = vadd.f32 %v3653_v15, %v3652_v38  ;;  %v3742_v17 = vadd.f32 %v3741_v30, %v3740_v1 }
 0x1d3   :  { %v2372_v39 = vadd.f32 %v3654_v16, %v5267_v61  ;;  %v5360_v19 = vadd.f32 %v3742_v17, %v2364_v3 }
 0x1d5   :  { %v3655_v21 = vpop.f32.mrb[112].mxu1  ;;  %v3743_v22 = vpop.f32.mrb[112].mxu0 }
 0x1d6   :  { %v3656_v14 = vpop.f32.mrb[113].mxu1  ;;  %v3744_v27 = vpop.f32.mrb[113].mxu0 }
 0x1d7   :  { %v3657_v2 = vadd.f32 %v3656_v14, %v3655_v21  ;;  %v3745_v41 = vadd.f32 %v3744_v27, %v3743_v22  ;;  %v3658_v28 = vpop.f32.mrb[114].mxu1  ;;  %v3746_v34 = vpop.f32.mrb[114].mxu0 }
 0x1d8   :  { %v3659_v42 = vpop.f32.mrb[115].mxu1  ;;  %v3747_v44 = vpop.f32.mrb[115].mxu0 }
 0x1d9   :  { %v2377_v50 = vadd.f32 %v3657_v2, %v5281_v18  ;;  %v5363_v43 = vadd.f32 %v3745_v41, %v2369_v25  ;;  %v3660_v40 = vadd.f32 %v3659_v42, %v3658_v28  ;;  %v3748_v33 = vadd.f32 %v3747_v44, %v3746_v34 }
 0x1db   :  { %v2380_v61 = vadd.f32 %v3660_v40, %v5285_v23  ;;  %v5366_v56 = vadd.f32 %v3748_v33, %v2372_v39 }
 0x1dd   :  { %v3661_v57 = vpop.f32.mrb[116].mxu1  ;;  %v3749_v46 = vpop.f32.mrb[116].mxu0 }
 0x1de   :  { %v3662_v37 = vpop.f32.mrb[117].mxu1  ;;  %v3750_v49 = vpop.f32.mrb[117].mxu0 }
 0x1df   :  { %v3663_v35 = vadd.f32 %v3662_v37, %v3661_v57  ;;  %v3751_v7 = vadd.f32 %v3750_v49, %v3749_v46  ;;  %v3664_v58 = vpop.f32.mrb[118].mxu1  ;;  %v3752_v63 = vpop.f32.mrb[118].mxu0 }
 0x1e0   :  { %v3665_v53 = vpop.f32.mrb[119].mxu1  ;;  %v3753_v62 = vpop.f32.mrb[119].mxu0 }
 0x1e1   :  { %v2385_v18 = vadd.f32 %v3663_v35, %v5293_v10  ;;  %v5369_v3 = vadd.f32 %v3751_v7, %v2377_v50  ;;  %v3666_v5 = vadd.f32 %v3665_v53, %v3664_v58  ;;  %v3754_v6 = vadd.f32 %v3753_v62, %v3752_v63 }
 0x1e3   :  { %v2388_v23 = vadd.f32 %v3666_v5, %v5297_v48  ;;  %v5372_v31 = vadd.f32 %v3754_v6, %v2380_v61 }
 0x1e5   :  { %v3667_v11 = vpop.f32.mrb[120].mxu1  ;;  %v3755_v36 = vpop.f32.mrb[120].mxu0 }
 0x1e6   :  { %v3668_v13 = vpop.f32.mrb[121].mxu1  ;;  %v3756_v38 = vpop.f32.mrb[121].mxu0 }
 0x1e7   :  { %v3669_v1 = vadd.f32 %v3668_v13, %v3667_v11  ;;  %v3757_v15 = vadd.f32 %v3756_v38, %v3755_v36  ;;  %v3670_v30 = vpop.f32.mrb[122].mxu1  ;;  %v3758_v25 = vpop.f32.mrb[122].mxu0 }
 0x1e8   :  { %v3671_v16 = vpop.f32.mrb[123].mxu1  ;;  %v3759_v17 = vpop.f32.mrb[123].mxu0 }
 0x1e9   :  { %v2393_v10 = vadd.f32 %v3669_v1, %v5305_v12  ;;  %v5375_v39 = vadd.f32 %v3757_v15, %v2385_v18  ;;  %v3672_v21 = vadd.f32 %v3671_v16, %v3670_v30  ;;  %v3760_v22 = vadd.f32 %v3759_v17, %v3758_v25 }
 0x1eb   :  { %v2396_v48 = vadd.f32 %v3672_v21, %v5308_v8  ;;  %v5378_v14 = vadd.f32 %v3760_v22, %v2388_v23 }
 0x1ed   :  { %v3673_v27 = vpop.f32.mrb[124].mxu1  ;;  %v3761_v2 = vpop.f32.mrb[124].mxu0 }
 0x1ee   :  { %v3674_v41 = vpop.f32.mrb[125].mxu1  ;;  %v3762_v28 = vpop.f32.mrb[125].mxu0 }
 0x1ef   :  { %v3675_v34 = vadd.f32 %v3674_v41, %v3673_v27  ;;  %v3763_v42 = vadd.f32 %v3762_v28, %v3761_v2  ;;  %v3764_v44 = vpop.f32.mrb[126].mxu0  ;;  %v3676_v50 = vpop.f32.mrb[126].mxu1 }
 0x1f0   :  { %v3765_v40 = vpop.f32.mrb[127].mxu0  ;;  %v3677_v33 = vpop.f32.mrb[127].mxu1 }
 0x1f1   :  { %v2401_v12 = vadd.f32 %v3675_v34, %v5310_v26  ;;  %v5381_v61 = vadd.f32 %v3763_v42, %v2393_v10  ;;  %v3766_v57 = vadd.f32 %v3765_v40, %v3764_v44 }
 0x1f3   :  { %v5383_v46 = vadd.f32 %v3766_v57, %v2396_v48 }
 0x1f5   :  { %v3767_v8 = vpop.f32.mrb[128].mxu0  ;;  %v3789_v37 = vpop.f32.mrb[128].mxu1 }
 0x1f6   :  { %v3768_v49 = vpop.f32.mrb[129].mxu0  ;;  %v3790_v35 = vpop.f32.mrb[129].mxu1 }
 0x1f7   :  { %v3769_v7 = vadd.f32 %v3768_v49, %v3767_v8  ;;  %v3791_v58 = vadd.f32 %v3790_v35, %v3789_v37  ;;  %v3770_v63 = vpop.f32.mrb[130].mxu0  ;;  %v3792_v53 = vpop.f32.mrb[130].mxu1 }
 0x1f8   :  { %v3771_v62 = vpop.f32.mrb[131].mxu0  ;;  %v3793_v18 = vpop.f32.mrb[131].mxu1 }
 0x1f9   :  { %v5385_v5 = vadd.f32 %v3769_v7, %v2401_v12  ;;  %v3794_v6 = vadd.f32 %v3793_v18, %v3792_v53  ;;  %v2577_v26 = vadd.f32 %v3791_v58, %v5315_v47 }
 0x1fb   :  { %v2580_v23 = vadd.f32 %v3794_v6, %v5318_v52 }
 0x1fd   :  { %v3795_v11 = vpop.f32.mrb[132].mxu1  ;;  %v2712_v36 = vpop.f32.mrb[132].mxu0 }
 0x1fe   :  { %v2713_v13 = vadd.f32 %v2712_v36, %v2577_v26  ;;  %v3796_v38 = vpop.f32.mrb[133].mxu1  ;;  %v3894_v1 = vpop.f32.mrb[133].mxu0 }
 0x1ff   :  { %v3797_v15 = vadd.f32 %v3796_v38, %v3795_v11  ;;  %v3798_v30 = vpop.f32.mrb[134].mxu1  ;;  %v2715_v25 = vpop.f32.mrb[134].mxu0 }
 0x200   :  { %v2814_v16 = vmax.f32 %v2713_v13, 0.0  ;;  %v2716_v17 = vadd.f32 %v2715_v25, %v2580_v23  ;;  %v3799_v10 = vpop.f32.mrb[135].mxu1  ;;  %v3895_v21 = vpop.f32.mrb[135].mxu0 }
 0x201   :  { %v3800_v22 = vadd.f32 %v3799_v10, %v3798_v30  ;;  %v2585_v48 = vadd.f32 %v3797_v15, %v5321_v59 }
 0x202   :  { %v3278_v27 = vpack.c.bf16 %v2814_v16, %v2814_v16  ;;  %v2815_v47 = vmax.f32 %v2716_v17, 0.0 }
 0x203   :  { %v2588_v52 = vadd.f32 %v3800_v22, %v5324_v51 }
 0x204   :  { %2941 = vst.msk [vmem:[%s5515_s3] sm:$0xf] %vm2940_vm2, %v3278_v27  ;;  %v3279_v2 = vpack.c.bf16 %v2815_v47, %v2815_v47 }
 0x205   :  { %v3801_v41 = vpop.f32.mrb[136].mxu1  ;;  %v2720_v28 = vpop.f32.mrb[136].mxu0 }
 0x206   :  { %2942 = vst.msk [vmem:[%s5515_s3 + $0x4] sm:$0xf] %vm2940_vm2, %v3279_v2  ;;  %v2721_v34 = vadd.f32 %v2720_v28, %v2585_v48  ;;  %v3802_v42 = vpop.f32.mrb[137].mxu1  ;;  %v3898_v59 = vpop.f32.mrb[137].mxu0 }
 0x207   :  { %v3803_v44 = vadd.f32 %v3802_v42, %v3801_v41  ;;  %v3804_v50 = vpop.f32.mrb[138].mxu1  ;;  %v2723_v40 = vpop.f32.mrb[138].mxu0 }
 0x208   :  { %v2816_v51 = vmax.f32 %v2721_v34, 0.0  ;;  %v2724_v33 = vadd.f32 %v2723_v40, %v2588_v52  ;;  %v3805_v12 = vpop.f32.mrb[139].mxu1  ;;  %v3899_v57 = vpop.f32.mrb[139].mxu0 }
 0x209   :  { %v3806_v8 = vadd.f32 %v3805_v12, %v3804_v50  ;;  %v2593_v37 = vadd.f32 %v3803_v44, %v5327_v32 }
 0x20a   :  { %v3280_v49 = vpack.c.bf16 %v2816_v51, %v2816_v51  ;;  %v2817_v35 = vmax.f32 %v2724_v33, 0.0 }
 0x20b   :  { %v2596_v7 = vadd.f32 %v3806_v8, %v5330_v24 }
 0x20c   :  { %2943 = vst.msk [vmem:[%s5515_s3 + $0x8] sm:$0xf] %vm2940_vm2, %v3280_v49  ;;  %v3281_v58 = vpack.c.bf16 %v2817_v35, %v2817_v35 }
 0x20d   :  { %v3807_v63 = vpop.f32.mrb[140].mxu1  ;;  %v2728_v53 = vpop.f32.mrb[140].mxu0 }
 0x20e   :  { %2944 = vst.msk [vmem:[%s5515_s3 + $0xc] sm:$0xf] %vm2940_vm2, %v3281_v58  ;;  %v2729_v62 = vadd.f32 %v2728_v53, %v2593_v37  ;;  %v3808_v18 = vpop.f32.mrb[141].mxu1  ;;  %v3902_v32 = vpop.f32.mrb[141].mxu0 }
 0x20f   :  { %v3809_v6 = vadd.f32 %v3808_v18, %v3807_v63  ;;  %v3810_v26 = vpop.f32.mrb[142].mxu1  ;;  %v2731_v23 = vpop.f32.mrb[142].mxu0 }
 0x210   :  { %v2818_v24 = vmax.f32 %v2729_v62, 0.0  ;;  %v2732_v11 = vadd.f32 %v2731_v23, %v2596_v7  ;;  %v3811_v36 = vpop.f32.mrb[143].mxu1  ;;  %v3903_v13 = vpop.f32.mrb[143].mxu0 }
 0x211   :  { %v3812_v38 = vadd.f32 %v3811_v36, %v3810_v26  ;;  %v2601_v1 = vadd.f32 %v3809_v6, %v5333_v4 }
 0x212   :  { %v3282_v15 = vpack.c.bf16 %v2818_v24, %v2818_v24  ;;  %v2819_v30 = vmax.f32 %v2732_v11, 0.0 }
 0x213   :  { %v2604_v25 = vadd.f32 %v3812_v38, %v5336_v60 }
 0x214   :  { %2945 = vst.msk [vmem:[%s5515_s3 + $0x10] sm:$0xf] %vm2940_vm2, %v3282_v15  ;;  %v3283_v16 = vpack.c.bf16 %v2819_v30, %v2819_v30 }
 0x215   :  { %v3813_v17 = vpop.f32.mrb[144].mxu1  ;;  %v2736_v10 = vpop.f32.mrb[144].mxu0 }
 0x216   :  { %2946 = vst.msk [vmem:[%s5515_s3 + $0x14] sm:$0xf] %vm2940_vm2, %v3283_v16  ;;  %v2737_v21 = vadd.f32 %v2736_v10, %v2601_v1  ;;  %v3814_v22 = vpop.f32.mrb[145].mxu1  ;;  %v3906_v4 = vpop.f32.mrb[145].mxu0 }
 0x217   :  { %v3815_v48 = vadd.f32 %v3814_v22, %v3813_v17  ;;  %v3816_v27 = vpop.f32.mrb[146].mxu1  ;;  %v2739_v47 = vpop.f32.mrb[146].mxu0 }
 0x218   :  { %v2820_v60 = vmax.f32 %v2737_v21, 0.0  ;;  %v2740_v52 = vadd.f32 %v2739_v47, %v2604_v25  ;;  %v3817_v2 = vpop.f32.mrb[147].mxu1  ;;  %v3907_v41 = vpop.f32.mrb[147].mxu0 }
 0x219   :  { %v3818_v28 = vadd.f32 %v3817_v2, %v3816_v27  ;;  %v2609_v34 = vadd.f32 %v3815_v48, %v5339_v29 }
 0x21a   :  { %v3284_v42 = vpack.c.bf16 %v2820_v60, %v2820_v60  ;;  %v2821_v59 = vmax.f32 %v2740_v52, 0.0 }
 0x21b   :  { %v2612_v44 = vadd.f32 %v3818_v28, %v5342_v55 }
 0x21c   :  { %2947 = vst.msk [vmem:[%s5515_s3 + $0x18] sm:$0xf] %vm2940_vm2, %v3284_v42  ;;  %v3285_v50 = vpack.c.bf16 %v2821_v59, %v2821_v59 }
 0x21d   :  { %v3819_v40 = vpop.f32.mrb[148].mxu1  ;;  %v2744_v51 = vpop.f32.mrb[148].mxu0 }
 0x21e   :  { %2948 = vst.msk [vmem:[%s5515_s3 + $0x1c] sm:$0xf] %vm2940_vm2, %v3285_v50  ;;  %v2745_v33 = vadd.f32 %v2744_v51, %v2609_v34  ;;  %v3820_v12 = vpop.f32.mrb[149].mxu1  ;;  %v3910_v29 = vpop.f32.mrb[149].mxu0 }
 0x21f   :  { %v3821_v57 = vadd.f32 %v3820_v12, %v3819_v40  ;;  %v3822_v8 = vpop.f32.mrb[150].mxu1  ;;  %v2747_v37 = vpop.f32.mrb[150].mxu0 }
 0x220   :  { %v2822_v55 = vmax.f32 %v2745_v33, 0.0  ;;  %v2748_v49 = vadd.f32 %v2747_v37, %v2612_v44  ;;  %v3823_v35 = vpop.f32.mrb[151].mxu1  ;;  %v3911_v7 = vpop.f32.mrb[151].mxu0 }
 0x221   :  { %v3824_v58 = vadd.f32 %v3823_v35, %v3822_v8  ;;  %v2617_v63 = vadd.f32 %v3821_v57, %v5345_v45 }
 0x222   :  { %v3286_v53 = vpack.c.bf16 %v2822_v55, %v2822_v55  ;;  %v2823_v62 = vmax.f32 %v2748_v49, 0.0 }
 0x223   :  { %v2620_v18 = vadd.f32 %v3824_v58, %v5348_v54 }
 0x224   :  { %2949 = vst.msk [vmem:[%s5515_s3 + $0x20] sm:$0xf] %vm2940_vm2, %v3286_v53  ;;  %v3287_v32 = vpack.c.bf16 %v2823_v62, %v2823_v62 }
 0x225   :  { %v3825_v6 = vpop.f32.mrb[152].mxu1  ;;  %v2752_v26 = vpop.f32.mrb[152].mxu0 }
 0x226   :  { %2950 = vst.msk [vmem:[%s5515_s3 + $0x24] sm:$0xf] %vm2940_vm2, %v3287_v32  ;;  %v2753_v23 = vadd.f32 %v2752_v26, %v2617_v63  ;;  %v3826_v24 = vpop.f32.mrb[153].mxu1  ;;  %v3914_v45 = vpop.f32.mrb[153].mxu0 }
 0x227   :  { %v3827_v11 = vadd.f32 %v3826_v24, %v3825_v6  ;;  %v3828_v36 = vpop.f32.mrb[154].mxu1  ;;  %v2755_v13 = vpop.f32.mrb[154].mxu0 }
 0x228   :  { %v2824_v54 = vmax.f32 %v2753_v23, 0.0  ;;  %v2756_v38 = vadd.f32 %v2755_v13, %v2620_v18  ;;  %v3829_v1 = vpop.f32.mrb[155].mxu1  ;;  %v3915_v15 = vpop.f32.mrb[155].mxu0 }
 0x229   :  { %v3830_v30 = vadd.f32 %v3829_v1, %v3828_v36  ;;  %v2625_v25 = vadd.f32 %v3827_v11, %v5351_v0 }
 0x22a   :  { %v3288_v16 = vpack.c.bf16 %v2824_v54, %v2824_v54  ;;  %v2825_v17 = vmax.f32 %v2756_v38, 0.0 }
 0x22b   :  { %v2628_v10 = vadd.f32 %v3830_v30, %v5354_v9 }
 0x22c   :  { %2951 = vst.msk [vmem:[%s5515_s3 + $0x28] sm:$0xf] %vm2940_vm2, %v3288_v16  ;;  %v3289_v21 = vpack.c.bf16 %v2825_v17, %v2825_v17 }
 0x22d   :  { %v3831_v22 = vpop.f32.mrb[156].mxu1  ;;  %v2760_v4 = vpop.f32.mrb[156].mxu0 }
 0x22e   :  { %2952 = vst.msk [vmem:[%s5515_s3 + $0x2c] sm:$0xf] %vm2940_vm2, %v3289_v21  ;;  %v2761_v48 = vadd.f32 %v2760_v4, %v2625_v25  ;;  %v3832_v27 = vpop.f32.mrb[157].mxu1  ;;  %v3918_v0 = vpop.f32.mrb[157].mxu0 }
 0x22f   :  { %v3833_v47 = vadd.f32 %v3832_v27, %v3831_v22  ;;  %v3834_v60 = vpop.f32.mrb[158].mxu1  ;;  %v2763_v52 = vpop.f32.mrb[158].mxu0 }
 0x230   :  { %v2826_v9 = vmax.f32 %v2761_v48, 0.0  ;;  %v2764_v2 = vadd.f32 %v2763_v52, %v2628_v10  ;;  %v3835_v41 = vpop.f32.mrb[159].mxu1  ;;  %v3919_v28 = vpop.f32.mrb[159].mxu0 }
 0x231   :  { %v3836_v34 = vadd.f32 %v3835_v41, %v3834_v60  ;;  %v2633_v42 = vadd.f32 %v3833_v47, %v5357_v20 }
 0x232   :  { %v3290_v59 = vpack.c.bf16 %v2826_v9, %v2826_v9  ;;  %v2827_v44 = vmax.f32 %v2764_v2, 0.0 }
 0x233   :  { %v2636_v50 = vadd.f32 %v3836_v34, %v5360_v19 }
 0x234   :  { %2953 = vst.msk [vmem:[%s5515_s3 + $0x30] sm:$0xf] %vm2940_vm2, %v3290_v59  ;;  %v3291_v40 = vpack.c.bf16 %v2827_v44, %v2827_v44 }
 0x235   :  { %v3837_v51 = vpop.f32.mrb[160].mxu1  ;;  %v2768_v33 = vpop.f32.mrb[160].mxu0 }
 0x236   :  { %2954 = vst.msk [vmem:[%s5515_s3 + $0x34] sm:$0xf] %vm2940_vm2, %v3291_v40  ;;  %v2769_v12 = vadd.f32 %v2768_v33, %v2633_v42  ;;  %v3838_v29 = vpop.f32.mrb[161].mxu1  ;;  %v3922_v20 = vpop.f32.mrb[161].mxu0 }
 0x237   :  { %v3839_v57 = vadd.f32 %v3838_v29, %v3837_v51  ;;  %v3840_v8 = vpop.f32.mrb[162].mxu1  ;;  %v2771_v37 = vpop.f32.mrb[162].mxu0 }
 0x238   :  { %v2828_v19 = vmax.f32 %v2769_v12, 0.0  ;;  %v2772_v55 = vadd.f32 %v2771_v37, %v2636_v50  ;;  %v3841_v49 = vpop.f32.mrb[163].mxu1  ;;  %v3923_v35 = vpop.f32.mrb[163].mxu0 }
 0x239   :  { %v3842_v7 = vadd.f32 %v3841_v49, %v3840_v8  ;;  %v2641_v58 = vadd.f32 %v3839_v57, %v5363_v43 }
 0x23a   :  { %v3292_v63 = vpack.c.bf16 %v2828_v19, %v2828_v19  ;;  %v2829_v53 = vmax.f32 %v2772_v55, 0.0 }
 0x23b   :  { %v2644_v62 = vadd.f32 %v3842_v7, %v5366_v56 }
 0x23c   :  { %2955 = vst.msk [vmem:[%s5515_s3 + $0x38] sm:$0xf] %vm2940_vm2, %v3292_v63  ;;  %v3293_v18 = vpack.c.bf16 %v2829_v53, %v2829_v53 }
 0x23d   :  { %v3843_v32 = vpop.f32.mrb[164].mxu1  ;;  %v2776_v6 = vpop.f32.mrb[164].mxu0 }
 0x23e   :  { %2956 = vst.msk [vmem:[%s5515_s3 + $0x3c] sm:$0xf] %vm2940_vm2, %v3293_v18  ;;  %v2777_v26 = vadd.f32 %v2776_v6, %v2641_v58  ;;  %v3844_v23 = vpop.f32.mrb[165].mxu1  ;;  %v3926_v43 = vpop.f32.mrb[165].mxu0 }
 0x23f   :  { %v3845_v24 = vadd.f32 %v3844_v23, %v3843_v32  ;;  %v3846_v45 = vpop.f32.mrb[166].mxu1  ;;  %v2779_v11 = vpop.f32.mrb[166].mxu0 }
 0x240   :  { %v2830_v56 = vmax.f32 %v2777_v26, 0.0  ;;  %v2780_v36 = vadd.f32 %v2779_v11, %v2644_v62  ;;  %v3847_v13 = vpop.f32.mrb[167].mxu1  ;;  %v3927_v54 = vpop.f32.mrb[167].mxu0 }
 0x241   :  { %v3848_v38 = vadd.f32 %v3847_v13, %v3846_v45  ;;  %v2649_v1 = vadd.f32 %v3845_v24, %v5369_v3 }
 0x242   :  { %v3294_v15 = vpack.c.bf16 %v2830_v56, %v2830_v56  ;;  %v2831_v30 = vmax.f32 %v2780_v36, 0.0 }
 0x243   :  { %v2652_v25 = vadd.f32 %v3848_v38, %v5372_v31 }
 0x244   :  { %2957 = vst.msk [vmem:[%s5515_s3 + $0x40] sm:$0xf] %vm2940_vm2, %v3294_v15  ;;  %v3295_v16 = vpack.c.bf16 %v2831_v30, %v2831_v30 }
 0x245   :  { %v3849_v17 = vpop.f32.mrb[168].mxu1  ;;  %v2784_v10 = vpop.f32.mrb[168].mxu0 }
 0x246   :  { %2958 = vst.msk [vmem:[%s5515_s3 + $0x44] sm:$0xf] %vm2940_vm2, %v3295_v16  ;;  %v2785_v21 = vadd.f32 %v2784_v10, %v2649_v1  ;;  %v3850_v22 = vpop.f32.mrb[169].mxu1  ;;  %v3930_v3 = vpop.f32.mrb[169].mxu0 }
 0x247   :  { %v3851_v4 = vadd.f32 %v3850_v22, %v3849_v17  ;;  %v3852_v48 = vpop.f32.mrb[170].mxu1  ;;  %v2787_v27 = vpop.f32.mrb[170].mxu0 }
 0x248   :  { %v2832_v31 = vmax.f32 %v2785_v21, 0.0  ;;  %v2788_v0 = vadd.f32 %v2787_v27, %v2652_v25  ;;  %v3853_v47 = vpop.f32.mrb[171].mxu1  ;;  %v3931_v60 = vpop.f32.mrb[171].mxu0 }
 0x249   :  { %v3854_v52 = vadd.f32 %v3853_v47, %v3852_v48  ;;  %v2657_v9 = vadd.f32 %v3851_v4, %v5375_v39 }
 0x24a   :  { %v3296_v2 = vpack.c.bf16 %v2832_v31, %v2832_v31  ;;  %v2833_v41 = vmax.f32 %v2788_v0, 0.0 }
 0x24b   :  { %v2660_v28 = vadd.f32 %v3854_v52, %v5378_v14 }
 0x24c   :  { %2959 = vst.msk [vmem:[%s5515_s3 + $0x48] sm:$0xf] %vm2940_vm2, %v3296_v2  ;;  %v3297_v34 = vpack.c.bf16 %v2833_v41, %v2833_v41 }
 0x24d   :  { %v3855_v42 = vpop.f32.mrb[172].mxu1  ;;  %v2792_v59 = vpop.f32.mrb[172].mxu0 }
 0x24e   :  { %2960 = vst.msk [vmem:[%s5515_s3 + $0x4c] sm:$0xf] %vm2940_vm2, %v3297_v34  ;;  %v2793_v44 = vadd.f32 %v2792_v59, %v2657_v9  ;;  %v3856_v50 = vpop.f32.mrb[173].mxu1  ;;  %v3934_v39 = vpop.f32.mrb[173].mxu0 }
 0x24f   :  { %v3857_v40 = vadd.f32 %v3856_v50, %v3855_v42  ;;  %v3858_v51 = vpop.f32.mrb[174].mxu1  ;;  %v2795_v33 = vpop.f32.mrb[174].mxu0 }
 0x250   :  { %v2834_v14 = vmax.f32 %v2793_v44, 0.0  ;;  %v2796_v12 = vadd.f32 %v2795_v33, %v2660_v28  ;;  %v3859_v29 = vpop.f32.mrb[175].mxu1  ;;  %v3935_v20 = vpop.f32.mrb[175].mxu0 }
 0x251   :  { %v3860_v57 = vadd.f32 %v3859_v29, %v3858_v51  ;;  %v2665_v8 = vadd.f32 %v3857_v40, %v5381_v61 }
 0x252   :  { %v3298_v37 = vpack.c.bf16 %v2834_v14, %v2834_v14  ;;  %v2835_v19 = vmax.f32 %v2796_v12, 0.0 }
 0x253   :  { %v2668_v55 = vadd.f32 %v3860_v57, %v5383_v46 }
 0x254   :  { %2961 = vst.msk [vmem:[%s5515_s3 + $0x50] sm:$0xf] %vm2940_vm2, %v3298_v37  ;;  %v3299_v49 = vpack.c.bf16 %v2835_v19, %v2835_v19 }
 0x255   :  { %v3861_v35 = vpop.f32.mrb[176].mxu1  ;;  %v2800_v7 = vpop.f32.mrb[176].mxu0 }
 0x256   :  { %2962 = vst.msk [vmem:[%s5515_s3 + $0x54] sm:$0xf] %vm2940_vm2, %v3299_v49  ;;  %v2801_v58 = vadd.f32 %v2800_v7, %v2665_v8  ;;  %v3862_v63 = vpop.f32.mrb[177].mxu1  ;;  %v3938_v61 = vpop.f32.mrb[177].mxu0 }
 0x257   :  { %v3863_v53 = vadd.f32 %v3862_v63, %v3861_v35  ;;  %v2803_v62 = vpop.f32.mrb[178].mxu0  ;;  %v3864_v18 = vpop.f32.mrb[178].mxu1 }
 0x258   :  { %v2836_v46 = vmax.f32 %v2801_v58, 0.0  ;;  %v2804_v32 = vadd.f32 %v2803_v62, %v2668_v55  ;;  %v3939_v6 = vpop.f32.mrb[179].mxu0  ;;  %v3865_v26 = vpop.f32.mrb[179].mxu1 }
 0x259   :  { %v2673_v23 = vadd.f32 %v3863_v53, %v5385_v5 }
 0x25a   :  { %v3300_v43 = vpack.c.bf16 %v2836_v46, %v2836_v46  ;;  %v2837_v24 = vmax.f32 %v2804_v32, 0.0 }
 0x25c   :  { %2963 = vst.msk [vmem:[%s5515_s3 + $0x58] sm:$0xf] %vm2940_vm2, %v3300_v43  ;;  %v3301_v45 = vpack.c.bf16 %v2837_v24, %v2837_v24 }
 0x25d   :  { %v2808_v11 = vpop.f32.mrb[180].mxu0 }
 0x25e   :  { %2964 = vst.msk [vmem:[%s5515_s3 + $0x5c] sm:$0xf] %vm2940_vm2, %v3301_v45  ;;  %v2809_v56 = vadd.f32 %v2808_v11, %v2673_v23  ;;  %v3942_v36 = vpop.f32.mrb[181].mxu0 }
 0x25f   :  { %v2811_v13 = vpop.f32.mrb[182].mxu0 }
 0x260   :  { %v2838_v54 = vmax.f32 %v2809_v56, 0.0  ;;  %v3943_v38 = vpop.f32.mrb[183].mxu0 }
 0x262   :  { %v3302_v5 = vpack.c.bf16 %v2838_v54, %v2838_v54 }
 0x264   :  { %2965 = vst.msk [vmem:[%s5515_s3 + $0x60] sm:$0xf] %vm2940_vm2, %v3302_v5 }

// kernel: lenet5_forward.10
= control target key start
LH: loop header
LB: loop body
LE: loop exit
PB: predicated region body
PF: predicated region fallthrough
CT: control target
= control target key end

     0   :  { %vm48_vm0 = vcmask 1040384   ;;  %vm49_vm1 = vsmask.f32 256  ;;  %s151_s0 = inlined_call_operand.vmem [shape: bf16[25,128], index: 0, kind: input, shape index: {}]   ;;  %s152_s1 = inlined_call_operand.vmem [shape: bf16[25,128], index: 1, kind: input, shape index: {}]   ;;  %s153_s2 = inlined_call_operand.vmem [shape: bf16[25,128], index: 2, kind: input, shape index: {}]   ;;  %s154_s3 = inlined_call_operand.vmem [shape: bf16[25,128], index: 3, kind: input, shape index: {}]   ;;  %s155_s4 = inlined_call_operand.vmem [shape: bf16[25,128], index: 4, kind: output, shape index: {}]  }
   0x1   :  { %v17_v0 = vld [vmem:[%s151_s0] sm:$0xf]  ;;  %v18_v1 = vld [vmem:[%s151_s0 + $0x4] sm:$0xf]  ;;  %v19_v10 = vld [vmem:[%s151_s0 + $0x8] sm:$0xf] }
   0x2   :  { %v21_v2 = vld [vmem:[%s152_s1] sm:$0xf]  ;;  %v22_v3 = vld [vmem:[%s152_s1 + $0x4] sm:$0xf]  ;;  %v23_v13 = vld [vmem:[%s152_s1 + $0x8] sm:$0xf] }
   0x3   :  { %v25_v4 = vmax.bf16 %v21_v2, %v17_v0  ;;  %v29_v5 = vld [vmem:[%s153_s2] sm:$0xf]  ;;  %v30_v6 = vld [vmem:[%s153_s2 + $0x4] sm:$0xf]  ;;  %v26_v7 = vmax.bf16 %v22_v3, %v18_v1  ;;  %v31_v14 = vld [vmem:[%s153_s2 + $0x8] sm:$0xf]  ;;  %v27_v16 = vmax.bf16 %v23_v13, %v19_v10 }
   0x4   :  { %v33_v8 = vld [vmem:[%s154_s3] sm:$0xf]  ;;  %v34_v9 = vld [vmem:[%s154_s3 + $0x4] sm:$0xf]  ;;  %v35_v15 = vld [vmem:[%s154_s3 + $0x8] sm:$0xf] }
   0x5   :  { %v37_v11 = vmax.bf16 %v33_v8, %v29_v5  ;;  %v38_v12 = vmax.bf16 %v34_v9, %v30_v6  ;;  %v39_v17 = vmax.bf16 %v35_v15, %v31_v14  ;;  %v20_v18 = vld [vmem:[%s151_s0 + $0xc] sm:$0x1]  ;;  %vm50_vm2 = vmand %vm48_vm0, %vm49_vm1 }
   0x6   :  { %v24_v19 = vld [vmem:[%s152_s1 + $0xc] sm:$0x1] }
   0x7   :  { %v32_v20 = vld [vmem:[%s153_s2 + $0xc] sm:$0x1]  ;;  %v41_v21 = vmax.bf16 %v37_v11, %v25_v4  ;;  %v42_v22 = vmax.bf16 %v38_v12, %v26_v7  ;;  %v28_v23 = vmax.bf16 %v24_v19, %v20_v18  ;;  %v43_v25 = vmax.bf16 %v39_v17, %v27_v16 }
   0x8   :  { %v36_v24 = vld [vmem:[%s154_s3 + $0xc] sm:$0x1] }
   0x9   :  { %v40_v26 = vmax.bf16 %v36_v24, %v32_v20  ;;  %v63_v27 = vcombine.low %v41_v21, %v42_v22  ;;  %v51_v28 = vld [vmem:[%s155_s4 + $0xc] sm:$0x1]  ;;  %47 = vst [vmem:[%s155_s4 + $0x8] sm:$0xf] %v43_v25 }
   0xb   :  { %v44_v29 = vmax.bf16 %v40_v26, %v28_v23  ;;  %62 = vst [vmem:[%s155_s4] sm:$0xff] %v63_v27  }
   0xd   :  { %v52_v30 = vsel %vm50_vm2, %v44_v29, %v51_v28 }
   0xe   :  { %53 = vst [vmem:[%s155_s4 + $0xc] sm:$0x1] %v52_v30 }

// kernel: lenet5_forward.11
= control target key start
LH: loop header
LB: loop body
LE: loop exit
PB: predicated region body
PF: predicated region fallthrough
CT: control target
= control target key end

     0   :  { %vm2084_vm0 = vcmask 523264   ;;  %vm3586_vm1 = vmmov 0   ;;  %s4610_s1 = inlined_call_operand.vmem [shape: bf16[1600,384], index: 1, kind: input, shape index: {}]   ;;  %s4611_s0 = inlined_call_operand.vmem [shape: bf16[8,1600], index: 0, kind: input, shape index: {}]   ;;  %s4612_s2 = inlined_call_operand.vmem [shape: f32[1,384], index: 2, kind: input, shape index: {}]   ;;  %s4613_s3 = inlined_call_operand.vmem [shape: bf16[8,384], index: 3, kind: output, shape index: {}]  }
   0x1   :  { %v3170_v0 = vld [vmem:[%s4610_s1 + $0x4] ss:$12 sps:$4 sm:$0xff]   ;;  %v3174_v2 = vld [vmem:[%s4610_s1] ss:$12 sps:$4 sm:$0xff]   ;;  %v3176_v4 = vld [vmem:[%s4610_s1 + $0x1c] ss:$12 sps:$4 sm:$0xff]  }
   0x2   :  { %v3172_v1 = vld [vmem:[%s4610_s1 + $0x184] ss:$12 sps:$4 sm:$0xff]   ;;  %2088 = vmatprep.subr.bf16.mxu1 %v3170_v0  ;;  %v3175_v3 = vld [vmem:[%s4610_s1 + $0x180] ss:$12 sps:$4 sm:$0xff]   ;;  %v3178_v5 = vld [vmem:[%s4610_s1 + $0x19c] ss:$12 sps:$4 sm:$0xff]  }
   0x3   :  { %2129 = vmatprep.subr.bf16.mxu0 %v3172_v1  ;;  %2089 = vmatpush1.bf16.msra.mxu1 %v3174_v2  ;;  %v3180_v6 = vld [vmem:[%s4610_s1 + $0x18] ss:$12 sps:$4 sm:$0xff]   ;;  %v3182_v8 = vld [vmem:[%s4610_s1 + $0x34] ss:$12 sps:$4 sm:$0xff]   ;;  %v3186_v10 = vld [vmem:[%s4610_s1 + $0x30] ss:$12 sps:$4 sm:$0xff]  }
   0x4   :  { %2130 = vmatpush1.bf16.msra.mxu0 %v3175_v3  ;;  %2090 = vmatprep.subr.bf16.mxu1 %v3176_v4  ;;  %v3181_v7 = vld [vmem:[%s4610_s1 + $0x198] ss:$12 sps:$4 sm:$0xff]   ;;  %v3184_v9 = vld [vmem:[%s4610_s1 + $0x1b4] ss:$12 sps:$4 sm:$0xff]   ;;  %v3187_v11 = vld [vmem:[%s4610_s1 + $0x1b0] ss:$12 sps:$4 sm:$0xff]  }
   0x5   :  { %2131 = vmatprep.subr.bf16.mxu0 %v3178_v5  ;;  %v3188_v12 = vld [vmem:[%s4610_s1 + $0x4c] ss:$12 sps:$4 sm:$0xff]   ;;  %v3192_v14 = vld [vmem:[%s4610_s1 + $0x48] ss:$12 sps:$4 sm:$0xff]   ;;  %v3194_v16 = vld [vmem:[%s4610_s1 + $0x64] ss:$12 sps:$4 sm:$0xff]  }
   0x6   :  { %v3190_v13 = vld [vmem:[%s4610_s1 + $0x1cc] ss:$12 sps:$4 sm:$0xff]   ;;  %v3193_v15 = vld [vmem:[%s4610_s1 + $0x1c8] ss:$12 sps:$4 sm:$0xff]   ;;  %v3196_v17 = vld [vmem:[%s4610_s1 + $0x1e4] ss:$12 sps:$4 sm:$0xff]  }
   0x7   :  { %2091 = vmatpush1.bf16.msra.mxu1 %v3180_v6  ;;  %v3198_v18 = vld [vmem:[%s4610_s1 + $0x60] ss:$12 sps:$4 sm:$0xff]   ;;  %v3200_v20 = vld [vmem:[%s4610_s1 + $0x7c] ss:$12 sps:$4 sm:$0xff]   ;;  %v3204_v22 = vld [vmem:[%s4610_s1 + $0x78] ss:$12 sps:$4 sm:$0xff]  }
   0x8   :  { %2132 = vmatpush1.bf16.msra.mxu0 %v3181_v7  ;;  %2092 = vmatprep.subr.bf16.mxu1 %v3182_v8  ;;  %v3199_v19 = vld [vmem:[%s4610_s1 + $0x1e0] ss:$12 sps:$4 sm:$0xff]   ;;  %v3202_v21 = vld [vmem:[%s4610_s1 + $0x1fc] ss:$12 sps:$4 sm:$0xff]   ;;  %v3205_v23 = vld [vmem:[%s4610_s1 + $0x1f8] ss:$12 sps:$4 sm:$0xff]  }
   0x9   :  { %2133 = vmatprep.subr.bf16.mxu0 %v3184_v9  ;;  %v3206_v24 = vld [vmem:[%s4610_s1 + $0x94] ss:$12 sps:$4 sm:$0xff]   ;;  %v3210_v26 = vld [vmem:[%s4610_s1 + $0x90] ss:$12 sps:$4 sm:$0xff]   ;;  %v3212_v28 = vld [vmem:[%s4610_s1 + $0xac] ss:$12 sps:$4 sm:$0xff]  }
   0xa   :  { %v3208_v25 = vld [vmem:[%s4610_s1 + $0x214] ss:$12 sps:$4 sm:$0xff]   ;;  %v3211_v27 = vld [vmem:[%s4610_s1 + $0x210] ss:$12 sps:$4 sm:$0xff]   ;;  %v3214_v29 = vld [vmem:[%s4610_s1 + $0x22c] ss:$12 sps:$4 sm:$0xff]  }
   0xb   :  { %2093 = vmatpush1.bf16.msra.mxu1 %v3186_v10  ;;  %v3216_v30 = vld [vmem:[%s4610_s1 + $0xa8] ss:$12 sps:$4 sm:$0xff]   ;;  %v3218_v32 = vld [vmem:[%s4610_s1 + $0xc4] ss:$12 sps:$4 sm:$0xff]   ;;  %v3222_v34 = vld [vmem:[%s4610_s1 + $0xc0] ss:$12 sps:$4 sm:$0xff]  }
   0xc   :  { %2134 = vmatpush1.bf16.msra.mxu0 %v3187_v11  ;;  %2094 = vmatprep.subr.bf16.mxu1 %v3188_v12  ;;  %v3217_v31 = vld [vmem:[%s4610_s1 + $0x228] ss:$12 sps:$4 sm:$0xff]   ;;  %v3220_v33 = vld [vmem:[%s4610_s1 + $0x244] ss:$12 sps:$4 sm:$0xff]   ;;  %v3223_v35 = vld [vmem:[%s4610_s1 + $0x240] ss:$12 sps:$4 sm:$0xff]  }
   0xd   :  { %2135 = vmatprep.subr.bf16.mxu0 %v3190_v13  ;;  %v3224_v36 = vld [vmem:[%s4610_s1 + $0xdc] ss:$12 sps:$4 sm:$0xff]   ;;  %v3228_v38 = vld [vmem:[%s4610_s1 + $0xd8] ss:$12 sps:$4 sm:$0xff]   ;;  %v3230_v40 = vld [vmem:[%s4610_s1 + $0xf4] ss:$12 sps:$4 sm:$0xff]  }
   0xe   :  { %v3226_v37 = vld [vmem:[%s4610_s1 + $0x25c] ss:$12 sps:$4 sm:$0xff]   ;;  %v3229_v39 = vld [vmem:[%s4610_s1 + $0x258] ss:$12 sps:$4 sm:$0xff]   ;;  %v3232_v41 = vld [vmem:[%s4610_s1 + $0x274] ss:$12 sps:$4 sm:$0xff]  }
   0xf   :  { %2095 = vmatpush1.bf16.msra.mxu1 %v3192_v14  ;;  %v3234_v42 = vld [vmem:[%s4610_s1 + $0xf0] ss:$12 sps:$4 sm:$0xff]   ;;  %v3236_v44 = vld [vmem:[%s4610_s1 + $0x10c] ss:$12 sps:$4 sm:$0xff]   ;;  %v15_v46 = vld [vmem:[%s4611_s0] sm:$0xff] }
  0x10   :  { %2136 = vmatpush1.bf16.msra.mxu0 %v3193_v15  ;;  %2096 = vmatprep.subr.bf16.mxu1 %v3194_v16  ;;  %v3235_v43 = vld [vmem:[%s4610_s1 + $0x270] ss:$12 sps:$4 sm:$0xff]   ;;  %v3238_v45 = vld [vmem:[%s4610_s1 + $0x28c] ss:$12 sps:$4 sm:$0xff]   ;;  %v3748_v47 = vcombine.high %v15_v46, %v15_v46  ;;  %v3240_v49 = vld [vmem:[%s4610_s1 + $0x108] ss:$12 sps:$4 sm:$0xff]   ;;  %v3817_v6 = vcombine.low %v15_v46, %v15_v46 }
  0x11   :  { %2137 = vmatprep.subr.bf16.mxu0 %v3196_v17  ;;  %v16_v48 = vld [vmem:[%s4611_s0 + $0x8] sm:$0xff]  ;;  %v3242_v52 = vld [vmem:[%s4610_s1 + $0x124] ss:$12 sps:$4 sm:$0xff]   ;;  %v3254_v60 = vld [vmem:[%s4610_s1 + $0x154] ss:$12 sps:$4 sm:$0xff]   ;;  %v3584_v16 = vmov 0  }
  0x12   :  { %v3241_v50 = vld [vmem:[%s4610_s1 + $0x288] ss:$12 sps:$4 sm:$0xff]   ;;  %v3759_v51 = vcombine.high %v16_v48, %v16_v48  ;;  %v3244_v53 = vld [vmem:[%s4610_s1 + $0x2a4] ss:$12 sps:$4 sm:$0xff]   ;;  %2120 = vmatprep.mubr.bf16.mxu1 %v3748_v47  ;;  %v3246_v54 = vld [vmem:[%s4610_s1 + $0x120] ss:$12 sps:$4 sm:$0xff]   ;;  %v3819_v7 = vcombine.low %v16_v48, %v16_v48 }
  0x13   :  { %2097 = vmatpush1.bf16.msra.mxu1 %v3198_v18  ;;  %v3247_v55 = vld [vmem:[%s4610_s1 + $0x2a0] ss:$12 sps:$4 sm:$0xff]   ;;  %v3248_v56 = vld [vmem:[%s4610_s1 + $0x13c] ss:$12 sps:$4 sm:$0xff]   ;;  %v3252_v58 = vld [vmem:[%s4610_s1 + $0x138] ss:$12 sps:$4 sm:$0xff]  }
  0x14   :  { %2138 = vmatpush1.bf16.msra.mxu0 %v3199_v19  ;;  %2098 = vmatprep.subr.bf16.mxu1 %v3200_v20  ;;  %v3250_v57 = vld [vmem:[%s4610_s1 + $0x2bc] ss:$12 sps:$4 sm:$0xff]   ;;  %v3253_v59 = vld [vmem:[%s4610_s1 + $0x2b8] ss:$12 sps:$4 sm:$0xff]   ;;  %v3256_v61 = vld [vmem:[%s4610_s1 + $0x2d4] ss:$12 sps:$4 sm:$0xff]  }
  0x15   :  { %2139 = vmatprep.subr.bf16.mxu0 %v3202_v21  ;;  %2161 = vmatprep.mubr.bf16.mxu0 %v3759_v51  ;;  %v3258_v62 = vld [vmem:[%s4610_s1 + $0x150] ss:$12 sps:$4 sm:$0xff]   ;;  %v3260_v0 = vld [vmem:[%s4610_s1 + $0x16c] ss:$12 sps:$4 sm:$0xff]   ;;  %v3264_v2 = vld [vmem:[%s4610_s1 + $0x168] ss:$12 sps:$4 sm:$0xff]  }
  0x16   :  { %v3259_v63 = vld [vmem:[%s4610_s1 + $0x2d0] ss:$12 sps:$4 sm:$0xff]   ;;  %v3262_v1 = vld [vmem:[%s4610_s1 + $0x2ec] ss:$12 sps:$4 sm:$0xff]   ;;  %v3265_v3 = vld [vmem:[%s4610_s1 + $0x2e8] ss:$12 sps:$4 sm:$0xff]  }
  0x17   :  { %2099 = vmatpush1.bf16.msra.mxu1 %v3204_v22  ;;  %v3272_v4 = vld [vmem:[%s4610_s1 + $0x304] ss:$12 sps:$4 sm:$0xff]   ;;  %v3270_v8 = vld [vmem:[%s4610_s1 + $0x300] ss:$12 sps:$4 sm:$0xff]   ;;  %v3278_v10 = vld [vmem:[%s4610_s1 + $0x31c] ss:$12 sps:$4 sm:$0xff]  }
  0x18   :  { %2140 = vmatpush1.bf16.msra.mxu0 %v3205_v23  ;;  %2100 = vmatprep.subr.bf16.mxu1 %v3206_v24  ;;  %v3275_v5 = vld [vmem:[%s4610_s1 + $0x904] ss:$12 sps:$4 sm:$0xff]   ;;  %v3273_v9 = vld [vmem:[%s4610_s1 + $0x900] ss:$12 sps:$4 sm:$0xff]   ;;  %v3281_v11 = vld [vmem:[%s4610_s1 + $0x91c] ss:$12 sps:$4 sm:$0xff]  }
  0x19   :  { %2141 = vmatprep.subr.bf16.mxu0 %v3208_v25  ;;  %v3276_v12 = vld [vmem:[%s4610_s1 + $0x318] ss:$12 sps:$4 sm:$0xff]   ;;  %v3284_v14 = vld [vmem:[%s4610_s1 + $0x334] ss:$12 sps:$4 sm:$0xff]   ;;  %v3282_v17 = vld [vmem:[%s4610_s1 + $0x330] ss:$12 sps:$4 sm:$0xff]  }
  0x1a   :  { %v3279_v13 = vld [vmem:[%s4610_s1 + $0x918] ss:$12 sps:$4 sm:$0xff]   ;;  %v3287_v15 = vld [vmem:[%s4610_s1 + $0x934] ss:$12 sps:$4 sm:$0xff]   ;;  %v3285_v18 = vld [vmem:[%s4610_s1 + $0x930] ss:$12 sps:$4 sm:$0xff]  }
  0x1b   :  { %2101 = vmatpush1.bf16.msra.mxu1 %v3210_v26  ;;  %v3290_v19 = vld [vmem:[%s4610_s1 + $0x34c] ss:$12 sps:$4 sm:$0xff]   ;;  %v3288_v21 = vld [vmem:[%s4610_s1 + $0x348] ss:$12 sps:$4 sm:$0xff]   ;;  %v3296_v23 = vld [vmem:[%s4610_s1 + $0x364] ss:$12 sps:$4 sm:$0xff]  }
  0x1c   :  { %2142 = vmatpush1.bf16.msra.mxu0 %v3211_v27  ;;  %2102 = vmatprep.subr.bf16.mxu1 %v3212_v28  ;;  %v3293_v20 = vld [vmem:[%s4610_s1 + $0x94c] ss:$12 sps:$4 sm:$0xff]   ;;  %v3291_v22 = vld [vmem:[%s4610_s1 + $0x948] ss:$12 sps:$4 sm:$0xff]   ;;  %v3298_v26 = vld [vmem:[%s4611_s0 + $0x30] ss:$0 sps:$4 sm:$0xff]  }
  0x1d   :  { %2143 = vmatprep.subr.bf16.mxu0 %v3214_v29  ;;  %v3297_v24 = vld [vmem:[%s4610_s1 + $0xc8] ss:$12 sps:$4 sm:$0xff]   ;;  %v3294_v25 = vld [vmem:[%s4610_s1 + $0x360] ss:$12 sps:$4 sm:$0xff]   ;;  %v3320_v48 = vld [vmem:[%s4610_s1 + $0x3d8] ss:$12 sps:$4 sm:$0xff]  }
  0x1e   :  { %v3299_v27 = vld [vmem:[%s4610_s1 + $0x8] ss:$12 sps:$4 sm:$0xff]   ;;  %v3303_v29 = vld [vmem:[%s4610_s1 + $0xe0] ss:$12 sps:$4 sm:$0xff]  }
  0x1f   :  { %2103 = vmatpush1.bf16.msra.mxu1 %v3216_v30  ;;  %v3302_v28 = vld [vmem:[%s4610_s1 + $0x37c] ss:$12 sps:$4 sm:$0xff]   ;;  %v3300_v30 = vld [vmem:[%s4610_s1 + $0x378] ss:$12 sps:$4 sm:$0xff]  }
  0x20   :  { %2144 = vmatpush1.bf16.msra.mxu0 %v3217_v31  ;;  %2104 = vmatprep.subr.bf16.mxu1 %v3218_v32  ;;  %v3304_v31 = vld [vmem:[%s4610_s1 + $0x20] ss:$12 sps:$4 sm:$0xff]   ;;  %v3322_v46 = vld [vmem:[%s4610_s1 + $0x3dc] ss:$12 sps:$4 sm:$0xff]  }
  0x21   :  { %2145 = vmatprep.subr.bf16.mxu0 %v3220_v33  ;;  %v3307_v32 = vld [vmem:[%s4610_s1 + $0x394] ss:$12 sps:$4 sm:$0xff]   ;;  %v3308_v33 = vld [vmem:[%s4610_s1 + $0xf8] ss:$12 sps:$4 sm:$0xff]  }
  0x23   :  { %2105 = vmatpush1.bf16.msra.mxu1 %v3222_v34  ;;  %v3305_v34 = vld [vmem:[%s4610_s1 + $0x390] ss:$12 sps:$4 sm:$0xff]  }
  0x24   :  { %2146 = vmatpush1.bf16.msra.mxu0 %v3223_v35  ;;  %2106 = vmatprep.subr.bf16.mxu1 %v3224_v36  ;;  %v3309_v35 = vld [vmem:[%s4610_s1 + $0x38] ss:$12 sps:$4 sm:$0xff]  }
  0x25   :  { %2147 = vmatprep.subr.bf16.mxu0 %v3226_v37  ;;  %v3312_v36 = vld [vmem:[%s4610_s1 + $0x3ac] ss:$12 sps:$4 sm:$0xff]   ;;  %v3313_v37 = vld [vmem:[%s4610_s1 + $0x110] ss:$12 sps:$4 sm:$0xff]  }
  0x27   :  { %2107 = vmatpush1.bf16.msra.mxu1 %v3228_v38  ;;  %v3310_v38 = vld [vmem:[%s4610_s1 + $0x3a8] ss:$12 sps:$4 sm:$0xff]  }
  0x28   :  { %2148 = vmatpush1.bf16.msra.mxu0 %v3229_v39  ;;  %2108 = vmatprep.subr.bf16.mxu1 %v3230_v40  ;;  %v3314_v39 = vld [vmem:[%s4610_s1 + $0x50] ss:$12 sps:$4 sm:$0xff]  }
  0x29   :  { %2149 = vmatprep.subr.bf16.mxu0 %v3232_v41  ;;  %v3317_v40 = vld [vmem:[%s4610_s1 + $0x3c4] ss:$12 sps:$4 sm:$0xff]   ;;  %v3318_v41 = vld [vmem:[%s4610_s1 + $0x128] ss:$12 sps:$4 sm:$0xff]  }
  0x2b   :  { %2109 = vmatpush1.bf16.msra.mxu1 %v3234_v42  ;;  %v3315_v42 = vld [vmem:[%s4610_s1 + $0x3c0] ss:$12 sps:$4 sm:$0xff]  }
  0x2c   :  { %2150 = vmatpush1.bf16.msra.mxu0 %v3235_v43  ;;  %2110 = vmatprep.subr.bf16.mxu1 %v3236_v44  ;;  %v3930_v43 = vld [vmem:[%s4611_s0 + $0x10] sm:$0xff] }
  0x2d   :  { %2151 = vmatprep.subr.bf16.mxu0 %v3238_v45  ;;  %v3319_v44 = vld [vmem:[%s4610_s1 + $0x68] ss:$12 sps:$4 sm:$0xff]   ;;  %v3937_v45 = vcombine.high %v3930_v43, %v3930_v43 }
  0x2f   :  { %2111 = vmatpush1.bf16.msra.mxu1 %v3240_v49  ;;  %v3324_v49 = vld [vmem:[%s4610_s1 + $0x80] ss:$12 sps:$4 sm:$0xff]  }
  0x30   :  { %2152 = vmatpush1.bf16.msra.mxu0 %v3241_v50  ;;  %2112 = vmatprep.subr.bf16.mxu1 %v3242_v52  ;;  %v3327_v50 = vld [vmem:[%s4610_s1 + $0x3f4] ss:$12 sps:$4 sm:$0xff]   ;;  %v3328_v52 = vld [vmem:[%s4610_s1 + $0x158] ss:$12 sps:$4 sm:$0xff]  }
  0x31   :  { %2153 = vmatprep.subr.bf16.mxu0 %v3244_v53  ;;  %v3325_v53 = vld [vmem:[%s4610_s1 + $0x3f0] ss:$12 sps:$4 sm:$0xff]  }
  0x33   :  { %2113 = vmatpush1.bf16.msra.mxu1 %v3246_v54  ;;  %v3329_v54 = vld [vmem:[%s4610_s1 + $0x98] ss:$12 sps:$4 sm:$0xff]  }
  0x34   :  { %2154 = vmatpush1.bf16.msra.mxu0 %v3247_v55  ;;  %2114 = vmatprep.subr.bf16.mxu1 %v3248_v56  ;;  %v3332_v55 = vld [vmem:[%s4610_s1 + $0x40c] ss:$12 sps:$4 sm:$0xff]   ;;  %v3333_v56 = vld [vmem:[%s4610_s1 + $0x170] ss:$12 sps:$4 sm:$0xff]  }
  0x35   :  { %2155 = vmatprep.subr.bf16.mxu0 %v3250_v57  ;;  %v3330_v57 = vld [vmem:[%s4610_s1 + $0x408] ss:$12 sps:$4 sm:$0xff]  }
  0x37   :  { %2115 = vmatpush1.bf16.msra.mxu1 %v3252_v58  ;;  %v3334_v58 = vld [vmem:[%s4610_s1 + $0xb0] ss:$12 sps:$4 sm:$0xff]  }
  0x38   :  { %2156 = vmatpush1.bf16.msra.mxu0 %v3253_v59  ;;  %2116 = vmatprep.subr.bf16.mxu1 %v3254_v60  ;;  %v3337_v59 = vld [vmem:[%s4610_s1 + $0x424] ss:$12 sps:$4 sm:$0xff]   ;;  %v3338_v60 = vld [vmem:[%s4610_s1 + $0x248] ss:$12 sps:$4 sm:$0xff]  }
  0x39   :  { %2157 = vmatprep.subr.bf16.mxu0 %v3256_v61  ;;  %v3335_v61 = vld [vmem:[%s4610_s1 + $0x420] ss:$12 sps:$4 sm:$0xff]  }
  0x3b   :  { %2117 = vmatpush1.bf16.msra.mxu1 %v3258_v62  ;;  %v3339_v62 = vld [vmem:[%s4610_s1 + $0x188] ss:$12 sps:$4 sm:$0xff]  }
  0x3c   :  { %2158 = vmatpush1.bf16.msra.mxu0 %v3259_v63  ;;  %2118 = vmatprep.subr.bf16.mxu1 %v3260_v0  ;;  %v3342_v63 = vld [vmem:[%s4610_s1 + $0x43c] ss:$12 sps:$4 sm:$0xff]   ;;  %v3343_v0 = vld [vmem:[%s4610_s1 + $0x260] ss:$12 sps:$4 sm:$0xff]  }
  0x3d   :  { %2159 = vmatprep.subr.bf16.mxu0 %v3262_v1  ;;  %v3340_v1 = vld [vmem:[%s4610_s1 + $0x438] ss:$12 sps:$4 sm:$0xff]  }
  0x3f   :  { %2119 = vmatpush1.bf16.msra.mxu1 %v3264_v2  ;;  %v3344_v2 = vld [vmem:[%s4610_s1 + $0x1a0] ss:$12 sps:$4 sm:$0xff]  }
  0x40   :  { %2160 = vmatpush1.bf16.msra.mxu0 %v3265_v3  ;;  %2334 = vmatprep.subr.bf16.mxu1 %v3275_v5  ;;  %v3347_v3 = vld [vmem:[%s4610_s1 + $0x454] ss:$12 sps:$4 sm:$0xff]   ;;  %v3345_v5 = vld [vmem:[%s4610_s1 + $0x450] ss:$12 sps:$4 sm:$0xff]  }
  0x41   :  { %2170 = vmatprep.subr.bf16.mxu0 %v3272_v4  ;;  %v3348_v4 = vld [vmem:[%s4610_s1 + $0x278] ss:$12 sps:$4 sm:$0xff]  }
  0x42   :  { %2121 = vmatmul.mubr.bf16.vlgmr.msra.gmra.mrb[0].mxu1 %v3817_v6 }
  0x43   :  { %2162 = vmatmul.mubr.bf16.vlgmr.msra.gmra.mrb[0].mxu0 %v3819_v7  ;;  %2335 = vmatpush1.bf16.msra.mxu1 %v3273_v9  ;;  %v3350_v9 = vld [vmem:[%s4610_s1 + $0x468] ss:$12 sps:$4 sm:$0xff]  }
  0x44   :  { %2171 = vmatpush1.bf16.msra.mxu0 %v3270_v8  ;;  %2336 = vmatprep.subr.bf16.mxu1 %v3281_v11  ;;  %v3352_v8 = vld [vmem:[%s4610_s1 + $0x46c] ss:$12 sps:$4 sm:$0xff]   ;;  %v3359_v11 = vld [vmem:[%s4610_s1 + $0x484] ss:$12 sps:$4 sm:$0xff]  }
  0x45   :  { %2172 = vmatprep.subr.bf16.mxu0 %v3278_v10  ;;  %2366 = vmatprep.mubr.bf16.mxu1 %v3584_v16  ;;  %v3354_v10 = vld [vmem:[%s4610_s1 + $0x1d0] ss:$12 sps:$4 sm:$0xff]  }
  0x46   :  { %2202 = vmatprep.mubr.bf16.mxu0 %v3937_v45  ;;  %v3364_v16 = vld [vmem:[%s4610_s1 + $0x49c] ss:$12 sps:$4 sm:$0xff]  }
  0x47   :  { %2337 = vmatpush1.bf16.msra.mxu1 %v3279_v13  ;;  %v4034_v13 = vcombine.low %v3930_v43, %v3930_v43  ;;  %v3392_v43 = vld [vmem:[%s4610_s1 + $0x528] ss:$12 sps:$4 sm:$0xff]  }
  0x48   :  { %2173 = vmatpush1.bf16.msra.mxu0 %v3276_v12  ;;  %2338 = vmatprep.subr.bf16.mxu1 %v3287_v15  ;;  %v3360_v12 = vld [vmem:[%s4610_s1 + $0x2a8] ss:$12 sps:$4 sm:$0xff]  }
  0x49   :  { %2174 = vmatprep.subr.bf16.mxu0 %v3284_v14  ;;  %v3357_v14 = vld [vmem:[%s4610_s1 + $0x480] ss:$12 sps:$4 sm:$0xff]   ;;  %v3361_v15 = vld [vmem:[%s4610_s1 + $0x1e8] ss:$12 sps:$4 sm:$0xff]  }
  0x4b   :  { %2339 = vmatpush1.bf16.msra.mxu1 %v3285_v18  ;;  %v3362_v18 = vld [vmem:[%s4610_s1 + $0x498] ss:$12 sps:$4 sm:$0xff]  }
  0x4c   :  { %2175 = vmatpush1.bf16.msra.mxu0 %v3282_v17  ;;  %2340 = vmatprep.subr.bf16.mxu1 %v3293_v20  ;;  %v3365_v17 = vld [vmem:[%s4610_s1 + $0x2c0] ss:$12 sps:$4 sm:$0xff]  }
  0x4d   :  { %2176 = vmatprep.subr.bf16.mxu0 %v3290_v19  ;;  %v3366_v19 = vld [vmem:[%s4610_s1 + $0x200] ss:$12 sps:$4 sm:$0xff]  }
  0x4e   :  { %v3369_v20 = vld [vmem:[%s4610_s1 + $0x4b4] ss:$12 sps:$4 sm:$0xff]  }
  0x4f   :  { %2341 = vmatpush1.bf16.msra.mxu1 %v3291_v22  ;;  %v3367_v22 = vld [vmem:[%s4610_s1 + $0x4b0] ss:$12 sps:$4 sm:$0xff]  }
  0x50   :  { %2177 = vmatpush1.bf16.msra.mxu0 %v3288_v21  ;;  %2996 = vmatprep.subr.bf16.mxu1 %v3297_v24  ;;  %v3370_v21 = vld [vmem:[%s4610_s1 + $0x2d8] ss:$12 sps:$4 sm:$0xff]  }
  0x51   :  { %2178 = vmatprep.subr.bf16.mxu0 %v3296_v23  ;;  %v3371_v23 = vld [vmem:[%s4610_s1 + $0x218] ss:$12 sps:$4 sm:$0xff]  }
  0x52   :  { %2990 = vmatmul.mubr.msk.bf16.vlgmr.msra.gmra.mrb[4].mxu1 %vm2084_vm0, %v3298_v26  ;;  %v3374_v24 = vld [vmem:[%s4610_s1 + $0x4cc] ss:$12 sps:$4 sm:$0xff]   ;;  %v3372_v26 = vld [vmem:[%s4610_s1 + $0x4c8] ss:$12 sps:$4 sm:$0xff]  }
  0x53   :  { %2997 = vmatpush3.bf16.msra.mxu1 %v3299_v27  ;;  %2407 = vmatprep.mubr.bf16.mxu1 %v3748_v47  ;;  %v3323_v47 = vld [vmem:[%s4610_s1 + $0x140] ss:$12 sps:$4 sm:$0xff]   ;;  %v3376_v27 = vld [vmem:[%s4610_s1 + $0x230] ss:$12 sps:$4 sm:$0xff]  }
  0x54   :  { %2179 = vmatpush1.bf16.msra.mxu0 %v3294_v25  ;;  %2998 = vmatprep.subr.bf16.mxu1 %v3303_v29  ;;  %v3375_v25 = vld [vmem:[%s4610_s1 + $0x2f0] ss:$12 sps:$4 sm:$0xff]   ;;  %v3380_v29 = vld [vmem:[%s4610_s1 + $0x3c8] ss:$12 sps:$4 sm:$0xff]  }
  0x55   :  { %2180 = vmatprep.subr.bf16.mxu0 %v3302_v28  ;;  %v3379_v28 = vld [vmem:[%s4610_s1 + $0x4e4] ss:$12 sps:$4 sm:$0xff]  }
  0x57   :  { %2999 = vmatpush3.bf16.msra.mxu1 %v3304_v31  ;;  %v3381_v31 = vld [vmem:[%s4610_s1 + $0x308] ss:$12 sps:$4 sm:$0xff]  }
  0x58   :  { %2181 = vmatpush1.bf16.msra.mxu0 %v3300_v30  ;;  %3000 = vmatprep.subr.bf16.mxu1 %v3308_v33  ;;  %v3377_v30 = vld [vmem:[%s4610_s1 + $0x4e0] ss:$12 sps:$4 sm:$0xff]  }
  0x59   :  { %2182 = vmatprep.subr.bf16.mxu0 %v3307_v32  ;;  %v3384_v32 = vld [vmem:[%s4610_s1 + $0x4fc] ss:$12 sps:$4 sm:$0xff]   ;;  %v3385_v33 = vld [vmem:[%s4610_s1 + $0x3e0] ss:$12 sps:$4 sm:$0xff]  }
  0x5b   :  { %3001 = vmatpush3.bf16.msra.mxu1 %v3309_v35  ;;  %v3386_v35 = vld [vmem:[%s4610_s1 + $0x320] ss:$12 sps:$4 sm:$0xff]  }
  0x5c   :  { %2183 = vmatpush1.bf16.msra.mxu0 %v3305_v34  ;;  %3002 = vmatprep.subr.bf16.mxu1 %v3313_v37  ;;  %v3382_v34 = vld [vmem:[%s4610_s1 + $0x4f8] ss:$12 sps:$4 sm:$0xff]  }
  0x5d   :  { %2184 = vmatprep.subr.bf16.mxu0 %v3312_v36  ;;  %v4107_v36 = vld [vmem:[%s4611_s0 + $0x18] sm:$0xff] }
  0x5e   :  { %v3390_v37 = vld [vmem:[%s4610_s1 + $0x3f8] ss:$12 sps:$4 sm:$0xff]  }
  0x5f   :  { %3003 = vmatpush3.bf16.msra.mxu1 %v3314_v39  ;;  %v3387_v39 = vld [vmem:[%s4610_s1 + $0x510] ss:$12 sps:$4 sm:$0xff]  }
  0x60   :  { %2185 = vmatpush1.bf16.msra.mxu0 %v3310_v38  ;;  %3004 = vmatprep.subr.bf16.mxu1 %v3318_v41  ;;  %v4117_v38 = vcombine.high %v4107_v36, %v4107_v36  ;;  %v3394_v41 = vld [vmem:[%s4610_s1 + $0x52c] ss:$12 sps:$4 sm:$0xff]  }
  0x61   :  { %2186 = vmatprep.subr.bf16.mxu0 %v3317_v40  ;;  %v3391_v40 = vld [vmem:[%s4610_s1 + $0x338] ss:$12 sps:$4 sm:$0xff]  }
  0x63   :  { %3005 = vmatpush3.bf16.msra.mxu1 %v3319_v44  ;;  %v3396_v44 = vld [vmem:[%s4610_s1 + $0x350] ss:$12 sps:$4 sm:$0xff]  }
  0x64   :  { %2187 = vmatpush1.bf16.msra.mxu0 %v3315_v42  ;;  %3006 = vmatprep.subr.bf16.mxu1 %v3323_v47  ;;  %v3395_v42 = vld [vmem:[%s4610_s1 + $0x410] ss:$12 sps:$4 sm:$0xff]   ;;  %v3397_v47 = vld [vmem:[%s4610_s1 + $0x540] ss:$12 sps:$4 sm:$0xff]  }
  0x65   :  { %2188 = vmatprep.subr.bf16.mxu0 %v3322_v46  ;;  %v3400_v46 = vld [vmem:[%s4610_s1 + $0x428] ss:$12 sps:$4 sm:$0xff]  }
  0x67   :  { %3007 = vmatpush3.bf16.msra.mxu1 %v3324_v49  ;;  %v3404_v49 = vld [vmem:[%s4610_s1 + $0x55c] ss:$12 sps:$4 sm:$0xff]  }
  0x68   :  { %2189 = vmatpush1.bf16.msra.mxu0 %v3320_v48  ;;  %3008 = vmatprep.subr.bf16.mxu1 %v3328_v52  ;;  %v3401_v48 = vld [vmem:[%s4610_s1 + $0x368] ss:$12 sps:$4 sm:$0xff]   ;;  %v3402_v52 = vld [vmem:[%s4610_s1 + $0x558] ss:$12 sps:$4 sm:$0xff]  }
  0x69   :  { %2190 = vmatprep.subr.bf16.mxu0 %v3327_v50  ;;  %v3405_v50 = vld [vmem:[%s4610_s1 + $0x440] ss:$12 sps:$4 sm:$0xff]  }
  0x6b   :  { %3009 = vmatpush3.bf16.msra.mxu1 %v3329_v54  ;;  %v3409_v54 = vld [vmem:[%s4610_s1 + $0x574] ss:$12 sps:$4 sm:$0xff]  }
  0x6c   :  { %2191 = vmatpush1.bf16.msra.mxu0 %v3325_v53  ;;  %3010 = vmatprep.subr.bf16.mxu1 %v3333_v56  ;;  %v3406_v53 = vld [vmem:[%s4610_s1 + $0x380] ss:$12 sps:$4 sm:$0xff]   ;;  %v3407_v56 = vld [vmem:[%s4610_s1 + $0x570] ss:$12 sps:$4 sm:$0xff]  }
  0x6d   :  { %2192 = vmatprep.subr.bf16.mxu0 %v3332_v55  ;;  %v3410_v55 = vld [vmem:[%s4610_s1 + $0x458] ss:$12 sps:$4 sm:$0xff]  }
  0x6f   :  { %3011 = vmatpush3.bf16.msra.mxu1 %v3334_v58  ;;  %v3414_v58 = vld [vmem:[%s4610_s1 + $0x58c] ss:$12 sps:$4 sm:$0xff]  }
  0x70   :  { %2193 = vmatpush1.bf16.msra.mxu0 %v3330_v57  ;;  %3018 = vmatprep.subr.bf16.mxu1 %v3338_v60  ;;  %v3411_v57 = vld [vmem:[%s4610_s1 + $0x398] ss:$12 sps:$4 sm:$0xff]   ;;  %v3412_v60 = vld [vmem:[%s4610_s1 + $0x588] ss:$12 sps:$4 sm:$0xff]  }
  0x71   :  { %2194 = vmatprep.subr.bf16.mxu0 %v3337_v59  ;;  %v3415_v59 = vld [vmem:[%s4610_s1 + $0x470] ss:$12 sps:$4 sm:$0xff]  }
  0x72   :  { %2408 = vmatmul.mubr.bf16.vlgmr.msra.gmra.mrb[8].mxu1 %v3817_v6  ;;  %v3349_v6 = vld [vmem:[%s4610_s1 + $0x1b8] ss:$12 sps:$4 sm:$0xff]  }
  0x73   :  { %3019 = vmatpush3.bf16.msra.mxu1 %v3339_v62  ;;  %2447 = vmatprep.mubr.bf16.mxu1 %v3759_v51  ;;  %v3353_v51 = vld [vmem:[%s4610_s1 + $0x290] ss:$12 sps:$4 sm:$0xff]  }
  0x74   :  { %2195 = vmatpush1.bf16.msra.mxu0 %v3335_v61  ;;  %3020 = vmatprep.subr.bf16.mxu1 %v3343_v0  ;;  %v3416_v61 = vld [vmem:[%s4610_s1 + $0x3b0] ss:$12 sps:$4 sm:$0xff]   ;;  %v3417_v0 = vld [vmem:[%s4610_s1 + $0x5a0] ss:$12 sps:$4 sm:$0xff]  }
  0x75   :  { %2196 = vmatprep.subr.bf16.mxu0 %v3342_v63  ;;  %v3419_v62 = vld [vmem:[%s4610_s1 + $0x5a4] ss:$12 sps:$4 sm:$0xff]   ;;  %v3420_v63 = vld [vmem:[%s4610_s1 + $0x548] ss:$12 sps:$4 sm:$0xff]  }
  0x77   :  { %3021 = vmatpush3.bf16.msra.mxu1 %v3344_v2  ;;  %v3424_v2 = vld [vmem:[%s4610_s1 + $0x5bc] ss:$12 sps:$4 sm:$0xff]  }
  0x78   :  { %2197 = vmatpush1.bf16.msra.mxu0 %v3340_v1  ;;  %3022 = vmatprep.subr.bf16.mxu1 %v3348_v4  ;;  %v3421_v1 = vld [vmem:[%s4610_s1 + $0x488] ss:$12 sps:$4 sm:$0xff]   ;;  %v3422_v4 = vld [vmem:[%s4610_s1 + $0x5b8] ss:$12 sps:$4 sm:$0xff]  }
  0x79   :  { %2198 = vmatprep.subr.bf16.mxu0 %v3347_v3  ;;  %v3425_v3 = vld [vmem:[%s4610_s1 + $0x560] ss:$12 sps:$4 sm:$0xff]  }
  0x7b   :  { %3023 = vmatpush3.bf16.msra.mxu1 %v3349_v6  ;;  %v3429_v6 = vld [vmem:[%s4610_s1 + $0x5d4] ss:$12 sps:$4 sm:$0xff]  }
  0x7c   :  { %2199 = vmatpush1.bf16.msra.mxu0 %v3345_v5  ;;  %3024 = vmatprep.subr.bf16.mxu1 %v3353_v51  ;;  %v3426_v5 = vld [vmem:[%s4610_s1 + $0x4a0] ss:$12 sps:$4 sm:$0xff]   ;;  %v3427_v51 = vld [vmem:[%s4610_s1 + $0x5d0] ss:$12 sps:$4 sm:$0xff]  }
  0x7d   :  { %2200 = vmatprep.subr.bf16.mxu0 %v3352_v8  ;;  %v3430_v8 = vld [vmem:[%s4610_s1 + $0x578] ss:$12 sps:$4 sm:$0xff]  }
  0x7f   :  { %3025 = vmatpush3.bf16.msra.mxu1 %v3354_v10  ;;  %v3434_v10 = vld [vmem:[%s4610_s1 + $0x5ec] ss:$12 sps:$4 sm:$0xff]  }
  0x80   :  { %2201 = vmatpush1.bf16.msra.mxu0 %v3350_v9  ;;  %3026 = vmatprep.subr.bf16.mxu1 %v3360_v12  ;;  %v3431_v9 = vld [vmem:[%s4610_s1 + $0x4b8] ss:$12 sps:$4 sm:$0xff]   ;;  %v3432_v12 = vld [vmem:[%s4610_s1 + $0x5e8] ss:$12 sps:$4 sm:$0xff]  }
  0x81   :  { %2211 = vmatprep.subr.bf16.mxu0 %v3359_v11  ;;  %v3435_v11 = vld [vmem:[%s4610_s1 + $0x590] ss:$12 sps:$4 sm:$0xff]  }
  0x83   :  { %2203 = vmatmul.mubr.bf16.vlgmr.msra.gmra.mrb[0].mxu0 %v4034_v13  ;;  %3027 = vmatpush3.bf16.msra.mxu1 %v3361_v15  ;;  %v3442_v15 = vld [vmem:[%s4610_s1 + $0x5a8] ss:$12 sps:$4 sm:$0xff]  }
  0x84   :  { %2212 = vmatpush1.bf16.msra.mxu0 %v3357_v14  ;;  %3028 = vmatprep.subr.bf16.mxu1 %v3365_v17  ;;  %v3441_v14 = vld [vmem:[%s4610_s1 + $0x604] ss:$12 sps:$4 sm:$0xff]   ;;  %v2683_v17 = vcombine.low %v4107_v36, %v4107_v36  ;;  %v3463_v36 = vld [vmem:[%s4610_s1 + $0x608] ss:$12 sps:$4 sm:$0xff]  }
  0x85   :  { %2213 = vmatprep.subr.bf16.mxu0 %v3364_v16  ;;  %2243 = vmatprep.mubr.bf16.mxu0 %v4117_v38  ;;  %v3439_v16 = vld [vmem:[%s4610_s1 + $0x600] ss:$12 sps:$4 sm:$0xff]  }
  0x87   :  { %3029 = vmatpush3.bf16.msra.mxu1 %v3366_v19  ;;  %v3446_v19 = vld [vmem:[%s4610_s1 + $0x61c] ss:$12 sps:$4 sm:$0xff]  }
  0x88   :  { %2214 = vmatpush1.bf16.msra.mxu0 %v3362_v18  ;;  %3030 = vmatprep.subr.bf16.mxu1 %v3370_v21  ;;  %v3443_v18 = vld [vmem:[%s4610_s1 + $0x4e8] ss:$12 sps:$4 sm:$0xff]   ;;  %v4260_v21 = vld [vmem:[%s4611_s0 + $0x20] sm:$0xff] }
  0x89   :  { %2215 = vmatprep.subr.bf16.mxu0 %v3369_v20  ;;  %v3447_v20 = vld [vmem:[%s4610_s1 + $0x5c0] ss:$12 sps:$4 sm:$0xff]  }
  0x8b   :  { %3031 = vmatpush3.bf16.msra.mxu1 %v3371_v23  ;;  %v3448_v23 = vld [vmem:[%s4610_s1 + $0x500] ss:$12 sps:$4 sm:$0xff]  }
  0x8c   :  { %2216 = vmatpush1.bf16.msra.mxu0 %v3367_v22  ;;  %3032 = vmatprep.subr.bf16.mxu1 %v3375_v25  ;;  %v3444_v22 = vld [vmem:[%s4610_s1 + $0x618] ss:$12 sps:$4 sm:$0xff]   ;;  %v2686_v25 = vcombine.high %v4260_v21, %v4260_v21 }
  0x8d   :  { %2217 = vmatprep.subr.bf16.mxu0 %v3374_v24  ;;  %v3451_v24 = vld [vmem:[%s4610_s1 + $0x634] ss:$12 sps:$4 sm:$0xff]  }
  0x8f   :  { %3033 = vmatpush3.bf16.msra.mxu1 %v3376_v27  ;;  %v3449_v27 = vld [vmem:[%s4610_s1 + $0x630] ss:$12 sps:$4 sm:$0xff]  }
  0x90   :  { %2218 = vmatpush1.bf16.msra.mxu0 %v3372_v26  ;;  %3040 = vmatprep.subr.bf16.mxu1 %v3380_v29  ;;  %v3452_v26 = vld [vmem:[%s4610_s1 + $0x5d8] ss:$12 sps:$4 sm:$0xff]  }
  0x91   :  { %2219 = vmatprep.subr.bf16.mxu0 %v3379_v28  ;;  %v3453_v28 = vld [vmem:[%s4610_s1 + $0x518] ss:$12 sps:$4 sm:$0xff]  }
  0x92   :  { %2448 = vmatmul.mubr.bf16.vlgmr.msra.gmra.mrb[12].mxu1 %v3819_v7  ;;  %v3389_v7 = vld [vmem:[%s4610_s1 + $0x514] ss:$12 sps:$4 sm:$0xff]   ;;  %v3456_v29 = vld [vmem:[%s4610_s1 + $0x64c] ss:$12 sps:$4 sm:$0xff]  }
  0x93   :  { %3041 = vmatpush3.bf16.msra.mxu1 %v3381_v31  ;;  %2487 = vmatprep.mubr.bf16.mxu1 %v3937_v45  ;;  %v3399_v45 = vld [vmem:[%s4610_s1 + $0x544] ss:$12 sps:$4 sm:$0xff]   ;;  %v3454_v31 = vld [vmem:[%s4610_s1 + $0x648] ss:$12 sps:$4 sm:$0xff]  }
  0x94   :  { %2220 = vmatpush1.bf16.msra.mxu0 %v3377_v30  ;;  %3042 = vmatprep.subr.bf16.mxu1 %v3385_v33  ;;  %v3457_v30 = vld [vmem:[%s4610_s1 + $0x5f0] ss:$12 sps:$4 sm:$0xff]  }
  0x95   :  { %2221 = vmatprep.subr.bf16.mxu0 %v3384_v32  ;;  %v3458_v32 = vld [vmem:[%s4610_s1 + $0x530] ss:$12 sps:$4 sm:$0xff]  }
  0x96   :  { %v3461_v33 = vld [vmem:[%s4610_s1 + $0x664] ss:$12 sps:$4 sm:$0xff]  }
  0x97   :  { %3043 = vmatpush3.bf16.msra.mxu1 %v3386_v35  ;;  %v3459_v35 = vld [vmem:[%s4610_s1 + $0x660] ss:$12 sps:$4 sm:$0xff]  }
  0x98   :  { %2222 = vmatpush1.bf16.msra.mxu0 %v3382_v34  ;;  %3044 = vmatprep.subr.bf16.mxu1 %v3390_v37  ;;  %v3462_v34 = vld [vmem:[%s4610_s1 + $0x6c8] ss:$12 sps:$4 sm:$0xff]   ;;  %v3467_v37 = vld [vmem:[%s4610_s1 + $0x6e0] ss:$12 sps:$4 sm:$0xff]  }
  0x99   :  { %2223 = vmatprep.subr.bf16.mxu0 %v3389_v7  ;;  %v3466_v7 = vld [vmem:[%s4610_s1 + $0x67c] ss:$12 sps:$4 sm:$0xff]  }
  0x9b   :  { %3045 = vmatpush3.bf16.msra.mxu1 %v3391_v40  ;;  %v3471_v40 = vld [vmem:[%s4610_s1 + $0x694] ss:$12 sps:$4 sm:$0xff]  }
  0x9c   :  { %2224 = vmatpush1.bf16.msra.mxu0 %v3387_v39  ;;  %3046 = vmatprep.subr.bf16.mxu1 %v3395_v42  ;;  %v3468_v39 = vld [vmem:[%s4610_s1 + $0x620] ss:$12 sps:$4 sm:$0xff]   ;;  %v3469_v42 = vld [vmem:[%s4610_s1 + $0x690] ss:$12 sps:$4 sm:$0xff]  }
  0x9d   :  { %2225 = vmatprep.subr.bf16.mxu0 %v3394_v41  ;;  %v3472_v41 = vld [vmem:[%s4610_s1 + $0x6f8] ss:$12 sps:$4 sm:$0xff]  }
  0x9f   :  { %3047 = vmatpush3.bf16.msra.mxu1 %v3396_v44  ;;  %v3476_v44 = vld [vmem:[%s4610_s1 + $0x6ac] ss:$12 sps:$4 sm:$0xff]  }
  0xa0   :  { %2226 = vmatpush1.bf16.msra.mxu0 %v3392_v43  ;;  %3048 = vmatprep.subr.bf16.mxu1 %v3400_v46  ;;  %v3473_v43 = vld [vmem:[%s4610_s1 + $0x638] ss:$12 sps:$4 sm:$0xff]   ;;  %v3474_v46 = vld [vmem:[%s4610_s1 + $0x6a8] ss:$12 sps:$4 sm:$0xff]  }
  0xa1   :  { %2227 = vmatprep.subr.bf16.mxu0 %v3399_v45  ;;  %v3477_v45 = vld [vmem:[%s4610_s1 + $0x710] ss:$12 sps:$4 sm:$0xff]  }
  0xa3   :  { %3049 = vmatpush3.bf16.msra.mxu1 %v3401_v48  ;;  %v3481_v48 = vld [vmem:[%s4610_s1 + $0x6c4] ss:$12 sps:$4 sm:$0xff]  }
  0xa4   :  { %2228 = vmatpush1.bf16.msra.mxu0 %v3397_v47  ;;  %3050 = vmatprep.subr.bf16.mxu1 %v3405_v50  ;;  %v3478_v47 = vld [vmem:[%s4610_s1 + $0x650] ss:$12 sps:$4 sm:$0xff]   ;;  %v3479_v50 = vld [vmem:[%s4610_s1 + $0x6c0] ss:$12 sps:$4 sm:$0xff]  }
  0xa5   :  { %2229 = vmatprep.subr.bf16.mxu0 %v3404_v49  ;;  %v3482_v49 = vld [vmem:[%s4610_s1 + $0x728] ss:$12 sps:$4 sm:$0xff]  }
  0xa7   :  { %3051 = vmatpush3.bf16.msra.mxu1 %v3406_v53  ;;  %v3486_v53 = vld [vmem:[%s4610_s1 + $0x6dc] ss:$12 sps:$4 sm:$0xff]  }
  0xa8   :  { %2230 = vmatpush1.bf16.msra.mxu0 %v3402_v52  ;;  %3052 = vmatprep.subr.bf16.mxu1 %v3410_v55  ;;  %v3483_v52 = vld [vmem:[%s4610_s1 + $0x668] ss:$12 sps:$4 sm:$0xff]   ;;  %v3484_v55 = vld [vmem:[%s4610_s1 + $0x6d8] ss:$12 sps:$4 sm:$0xff]  }
  0xa9   :  { %2231 = vmatprep.subr.bf16.mxu0 %v3409_v54  ;;  %v3487_v54 = vld [vmem:[%s4610_s1 + $0x740] ss:$12 sps:$4 sm:$0xff]  }
  0xab   :  { %3053 = vmatpush3.bf16.msra.mxu1 %v3411_v57  ;;  %v3491_v57 = vld [vmem:[%s4610_s1 + $0x6f4] ss:$12 sps:$4 sm:$0xff]  }
  0xac   :  { %2232 = vmatpush1.bf16.msra.mxu0 %v3407_v56  ;;  %3054 = vmatprep.subr.bf16.mxu1 %v3415_v59  ;;  %v3488_v56 = vld [vmem:[%s4610_s1 + $0x680] ss:$12 sps:$4 sm:$0xff]   ;;  %v3489_v59 = vld [vmem:[%s4610_s1 + $0x6f0] ss:$12 sps:$4 sm:$0xff]  }
  0xad   :  { %2233 = vmatprep.subr.bf16.mxu0 %v3414_v58  ;;  %v3492_v58 = vld [vmem:[%s4610_s1 + $0x758] ss:$12 sps:$4 sm:$0xff]  }
  0xaf   :  { %3055 = vmatpush3.bf16.msra.mxu1 %v3416_v61  ;;  %v3496_v61 = vld [vmem:[%s4610_s1 + $0x70c] ss:$12 sps:$4 sm:$0xff]  }
  0xb0   :  { %2234 = vmatpush1.bf16.msra.mxu0 %v3412_v60  ;;  %3062 = vmatprep.subr.bf16.mxu1 %v3420_v63  ;;  %v3493_v60 = vld [vmem:[%s4610_s1 + $0x698] ss:$12 sps:$4 sm:$0xff]   ;;  %v3494_v63 = vld [vmem:[%s4610_s1 + $0x708] ss:$12 sps:$4 sm:$0xff]  }
  0xb1   :  { %2235 = vmatprep.subr.bf16.mxu0 %v3419_v62  ;;  %v3497_v62 = vld [vmem:[%s4610_s1 + $0x770] ss:$12 sps:$4 sm:$0xff]  }
  0xb2   :  { %2488 = vmatmul.mubr.bf16.vlgmr.msra.gmra.mrb[16].mxu1 %v4034_v13  ;;  %v3436_v13 = vld [vmem:[%s4610_s1 + $0x4d0] ss:$12 sps:$4 sm:$0xff]  }
  0xb3   :  { %3063 = vmatpush3.bf16.msra.mxu1 %v3421_v1  ;;  %2527 = vmatprep.mubr.bf16.mxu1 %v4117_v38  ;;  %v3464_v38 = vld [vmem:[%s4610_s1 + $0x678] ss:$12 sps:$4 sm:$0xff]  }
  0xb4   :  { %2236 = vmatpush1.bf16.msra.mxu0 %v3417_v0  ;;  %3064 = vmatprep.subr.bf16.mxu1 %v3425_v3  ;;  %v3498_v0 = vld [vmem:[%s4610_s1 + $0x6b0] ss:$12 sps:$4 sm:$0xff]   ;;  %v2685_v3 = vcombine.low %v4260_v21, %v4260_v21  ;;  %v3524_v21 = vld [vmem:[%s4610_s1 + $0x8a8] ss:$12 sps:$4 sm:$0xff]  }
  0xb5   :  { %2237 = vmatprep.subr.bf16.mxu0 %v3424_v2  ;;  %v3503_v1 = vld [vmem:[%s4610_s1 + $0x724] ss:$12 sps:$4 sm:$0xff]   ;;  %v3504_v2 = vld [vmem:[%s4610_s1 + $0x848] ss:$12 sps:$4 sm:$0xff]  }
  0xb7   :  { %3065 = vmatpush3.bf16.msra.mxu1 %v3426_v5  ;;  %v3501_v5 = vld [vmem:[%s4610_s1 + $0x720] ss:$12 sps:$4 sm:$0xff]  }
  0xb8   :  { %2238 = vmatpush1.bf16.msra.mxu0 %v3422_v4  ;;  %3066 = vmatprep.subr.bf16.mxu1 %v3430_v8  ;;  %v4401_v4 = vld [vmem:[%s4611_s0 + $0x28] sm:$0xff] }
  0xb9   :  { %2239 = vmatprep.subr.bf16.mxu0 %v3429_v6  ;;  %v3505_v6 = vld [vmem:[%s4610_s1 + $0x788] ss:$12 sps:$4 sm:$0xff]  }
  0xba   :  { %v3508_v8 = vld [vmem:[%s4610_s1 + $0x73c] ss:$12 sps:$4 sm:$0xff]  }
  0xbb   :  { %3067 = vmatpush3.bf16.msra.mxu1 %v3431_v9  ;;  %v2688_v9 = vcombine.high %v4401_v4, %v4401_v4 }
  0xbc   :  { %2240 = vmatpush1.bf16.msra.mxu0 %v3427_v51  ;;  %3068 = vmatprep.subr.bf16.mxu1 %v3435_v11  ;;  %v3509_v51 = vld [vmem:[%s4610_s1 + $0x860] ss:$12 sps:$4 sm:$0xff]  }
  0xbd   :  { %2241 = vmatprep.subr.bf16.mxu0 %v3434_v10  ;;  %v3506_v10 = vld [vmem:[%s4610_s1 + $0x738] ss:$12 sps:$4 sm:$0xff]   ;;  %v3510_v11 = vld [vmem:[%s4610_s1 + $0x7a0] ss:$12 sps:$4 sm:$0xff]  }
  0xbf   :  { %3069 = vmatpush3.bf16.msra.mxu1 %v3436_v13  ;;  %v3514_v13 = vld [vmem:[%s4610_s1 + $0x878] ss:$12 sps:$4 sm:$0xff]  }
  0xc0   :  { %2242 = vmatpush1.bf16.msra.mxu0 %v3432_v12  ;;  %3070 = vmatprep.subr.bf16.mxu1 %v3442_v15  ;;  %v3513_v12 = vld [vmem:[%s4610_s1 + $0x754] ss:$12 sps:$4 sm:$0xff]   ;;  %v3515_v15 = vld [vmem:[%s4610_s1 + $0x7b8] ss:$12 sps:$4 sm:$0xff]  }
  0xc1   :  { %2252 = vmatprep.subr.bf16.mxu0 %v3441_v14  ;;  %v3511_v14 = vld [vmem:[%s4610_s1 + $0x750] ss:$12 sps:$4 sm:$0xff]  }
  0xc3   :  { %2244 = vmatmul.mubr.bf16.vlgmr.msra.gmra.mrb[0].mxu0 %v2683_v17  ;;  %3071 = vmatpush3.bf16.msra.mxu1 %v3443_v18  ;;  %v3516_v18 = vld [vmem:[%s4610_s1 + $0x768] ss:$12 sps:$4 sm:$0xff]  }
  0xc4   :  { %2253 = vmatpush1.bf16.msra.mxu0 %v3439_v16  ;;  %3072 = vmatprep.subr.bf16.mxu1 %v3447_v20  ;;  %v3518_v16 = vld [vmem:[%s4610_s1 + $0x76c] ss:$12 sps:$4 sm:$0xff]   ;;  %v3523_v20 = vld [vmem:[%s4610_s1 + $0x784] ss:$12 sps:$4 sm:$0xff]  }
  0xc5   :  { %2254 = vmatprep.subr.bf16.mxu0 %v3446_v19  ;;  %2284 = vmatprep.mubr.bf16.mxu0 %v2686_v25  ;;  %v3520_v19 = vld [vmem:[%s4610_s1 + $0x7d0] ss:$12 sps:$4 sm:$0xff]  }
  0xc7   :  { %3073 = vmatpush3.bf16.msra.mxu1 %v3448_v23  ;;  %v3525_v23 = vld [vmem:[%s4610_s1 + $0x7e8] ss:$12 sps:$4 sm:$0xff]  }
  0xc8   :  { %2255 = vmatpush1.bf16.msra.mxu0 %v3444_v22  ;;  %3074 = vmatprep.subr.bf16.mxu1 %v3452_v26  ;;  %v3521_v22 = vld [vmem:[%s4610_s1 + $0x780] ss:$12 sps:$4 sm:$0xff]   ;;  %v3526_v26 = vld [vmem:[%s4610_s1 + $0x798] ss:$12 sps:$4 sm:$0xff]  }
  0xc9   :  { %2256 = vmatprep.subr.bf16.mxu0 %v3451_v24  ;;  %v3528_v24 = vld [vmem:[%s4610_s1 + $0x79c] ss:$12 sps:$4 sm:$0xff]  }
  0xcb   :  { %3075 = vmatpush3.bf16.msra.mxu1 %v3453_v28  ;;  %v3533_v28 = vld [vmem:[%s4610_s1 + $0x7b4] ss:$12 sps:$4 sm:$0xff]  }
  0xcc   :  { %2257 = vmatpush1.bf16.msra.mxu0 %v3449_v27  ;;  %3076 = vmatprep.subr.bf16.mxu1 %v3457_v30  ;;  %v3530_v27 = vld [vmem:[%s4610_s1 + $0x800] ss:$12 sps:$4 sm:$0xff]   ;;  %v3531_v30 = vld [vmem:[%s4610_s1 + $0x7b0] ss:$12 sps:$4 sm:$0xff]  }
  0xcd   :  { %2258 = vmatprep.subr.bf16.mxu0 %v3456_v29  ;;  %v3534_v29 = vld [vmem:[%s4610_s1 + $0x8d8] ss:$12 sps:$4 sm:$0xff]  }
  0xcf   :  { %3077 = vmatpush3.bf16.msra.mxu1 %v3458_v32  ;;  %v3538_v32 = vld [vmem:[%s4610_s1 + $0x7cc] ss:$12 sps:$4 sm:$0xff]  }
  0xd0   :  { %2259 = vmatpush1.bf16.msra.mxu0 %v3454_v31  ;;  %3084 = vmatprep.subr.bf16.mxu1 %v3462_v34  ;;  %v3535_v31 = vld [vmem:[%s4610_s1 + $0x818] ss:$12 sps:$4 sm:$0xff]   ;;  %v3536_v34 = vld [vmem:[%s4610_s1 + $0x7c8] ss:$12 sps:$4 sm:$0xff]  }
  0xd1   :  { %2260 = vmatprep.subr.bf16.mxu0 %v3461_v33  ;;  %v3539_v33 = vld [vmem:[%s4610_s1 + $0x8f0] ss:$12 sps:$4 sm:$0xff]  }
  0xd2   :  { %2528 = vmatmul.mubr.bf16.vlgmr.msra.gmra.mrb[20].mxu1 %v2683_v17  ;;  %v3519_v17 = vld [vmem:[%s4610_s1 + $0x890] ss:$12 sps:$4 sm:$0xff]  }
  0xd3   :  { %3085 = vmatpush3.bf16.msra.mxu1 %v3463_v36  ;;  %2567 = vmatprep.mubr.bf16.mxu1 %v2686_v25  ;;  %v3529_v25 = vld [vmem:[%s4610_s1 + $0x8c0] ss:$12 sps:$4 sm:$0xff]   ;;  %v3545_v36 = vld [vmem:[%s4610_s1 + $0x7e4] ss:$12 sps:$4 sm:$0xff]  }
  0xd4   :  { %2261 = vmatpush1.bf16.msra.mxu0 %v3459_v35  ;;  %3086 = vmatprep.subr.bf16.mxu1 %v3467_v37  ;;  %v3540_v35 = vld [vmem:[%s4610_s1 + $0x830] ss:$12 sps:$4 sm:$0xff]   ;;  %v3543_v37 = vld [vmem:[%s4610_s1 + $0x7e0] ss:$12 sps:$4 sm:$0xff]  }
  0xd5   :  { %2262 = vmatprep.subr.bf16.mxu0 %v3466_v7  ;;  %v4500_v7 = vcombine.low %v4401_v4, %v4401_v4  ;;  %v3571_v4 = vld [vmem:[%s4610_s1 + $0x8a0] ss:$12 sps:$4 sm:$0xff]  }
  0xd7   :  { %3087 = vmatpush3.bf16.msra.mxu1 %v3468_v39  ;;  %v3585_v39 = vmov 0.0  }
  0xd8   :  { %2263 = vmatpush1.bf16.msra.mxu0 %v3464_v38  ;;  %3088 = vmatprep.subr.bf16.mxu1 %v3472_v41  ;;  %v3546_v38 = vld [vmem:[%s4610_s1 + $0x908] ss:$12 sps:$4 sm:$0xff]   ;;  %v3547_v41 = vld [vmem:[%s4610_s1 + $0x7f8] ss:$12 sps:$4 sm:$0xff]  }
  0xd9   :  { %2264 = vmatprep.subr.bf16.mxu0 %v3471_v40  ;;  %v3549_v40 = vld [vmem:[%s4610_s1 + $0x7fc] ss:$12 sps:$4 sm:$0xff]  }
  0xdb   :  { %3089 = vmatpush3.bf16.msra.mxu1 %v3473_v43  ;;  %v3553_v43 = vld [vmem:[%s4610_s1 + $0x814] ss:$12 sps:$4 sm:$0xff]  }
  0xdc   :  { %2265 = vmatpush1.bf16.msra.mxu0 %v3469_v42  ;;  %3090 = vmatprep.subr.bf16.mxu1 %v3477_v45  ;;  %v3550_v42 = vld [vmem:[%s4610_s1 + $0x920] ss:$12 sps:$4 sm:$0xff]  }
  0xdd   :  { %2266 = vmatprep.subr.bf16.mxu0 %v3476_v44 }
  0xdf   :  { %3091 = vmatpush3.bf16.msra.mxu1 %v3478_v47  ;;  %v3554_v47 = vld [vmem:[%s4610_s1 + $0x938] ss:$12 sps:$4 sm:$0xff]  }
  0xe0   :  { %2267 = vmatpush1.bf16.msra.mxu0 %v3474_v46  ;;  %3092 = vmatprep.subr.bf16.mxu1 %v3482_v49  ;;  %v3551_v46 = vld [vmem:[%s4610_s1 + $0x810] ss:$12 sps:$4 sm:$0xff]   ;;  %v3557_v49 = vld [vmem:[%s4610_s1 + $0x82c] ss:$12 sps:$4 sm:$0xff]  }
  0xe1   :  { %2268 = vmatprep.subr.bf16.mxu0 %v3481_v48 }
  0xe3   :  { %3093 = vmatpush3.bf16.msra.mxu1 %v3483_v52  ;;  %v3555_v52 = vld [vmem:[%s4610_s1 + $0x828] ss:$12 sps:$4 sm:$0xff]  }
  0xe4   :  { %2269 = vmatpush1.bf16.msra.mxu0 %v3479_v50  ;;  %3094 = vmatprep.subr.bf16.mxu1 %v3487_v54  ;;  %v3561_v54 = vld [vmem:[%s4610_s1 + $0x844] ss:$12 sps:$4 sm:$0xff]  }
  0xe5   :  { %2270 = vmatprep.subr.bf16.mxu0 %v3486_v53  ;;  %v3558_v53 = vld [vmem:[%s4610_s1 + $0x950] ss:$12 sps:$4 sm:$0xff]  }
  0xe7   :  { %3095 = vmatpush3.bf16.msra.mxu1 %v3488_v56  ;;  %v3564_v56 = vld [vmem:[%s4610_s1 + $0x85c] ss:$12 sps:$4 sm:$0xff]  }
  0xe8   :  { %2271 = vmatpush1.bf16.msra.mxu0 %v3484_v55  ;;  %3096 = vmatprep.subr.bf16.mxu1 %v3492_v58  ;;  %v3559_v55 = vld [vmem:[%s4610_s1 + $0x840] ss:$12 sps:$4 sm:$0xff]   ;;  %v3562_v58 = vld [vmem:[%s4610_s1 + $0x858] ss:$12 sps:$4 sm:$0xff]  }
  0xe9   :  { %2272 = vmatprep.subr.bf16.mxu0 %v3491_v57  ;;  %v3583_v57 = vld [vmem:[%s4611_s0 + $0x30] ss:$0 sps:$4 sm:$0xff]  }
  0xeb   :  { %3097 = vmatpush3.bf16.msra.mxu1 %v3493_v60 }
  0xec   :  { %2273 = vmatpush1.bf16.msra.mxu0 %v3489_v59  ;;  %3098 = vmatprep.subr.bf16.mxu1 %v3497_v62  ;;  %v3567_v59 = vld [vmem:[%s4610_s1 + $0x874] ss:$12 sps:$4 sm:$0xff]   ;;  %v3565_v62 = vld [vmem:[%s4610_s1 + $0x870] ss:$12 sps:$4 sm:$0xff]  }
  0xed   :  { %2274 = vmatprep.subr.bf16.mxu0 %v3496_v61 }
  0xef   :  { %3099 = vmatpush3.bf16.msra.mxu1 %v3498_v0  ;;  %v3570_v0 = vld [vmem:[%s4610_s1 + $0x88c] ss:$12 sps:$4 sm:$0xff]  }
  0xf0   :  { %2275 = vmatpush1.bf16.msra.mxu0 %v3494_v63  ;;  %3106 = vmatprep.subr.bf16.mxu1 %v3504_v2  ;;  %v3568_v2 = vld [vmem:[%s4610_s1 + $0x888] ss:$12 sps:$4 sm:$0xff]  }
  0xf1   :  { %2276 = vmatprep.subr.bf16.mxu0 %v3503_v1 }
  0xf2   :  { %2568 = vmatmul.mubr.bf16.vlgmr.msra.gmra.mrb[24].mxu1 %v2685_v3 }
  0xf3   :  { %3107 = vmatpush3.bf16.msra.mxu1 %v3505_v6  ;;  %2607 = vmatprep.mubr.bf16.mxu1 %v2688_v9  ;;  %v3574_v6 = vld [vmem:[%s4610_s1 + $0x8b8] ss:$12 sps:$4 sm:$0xff]  }
  0xf4   :  { %2277 = vmatpush1.bf16.msra.mxu0 %v3501_v5  ;;  %3108 = vmatprep.subr.bf16.mxu1 %v3509_v51  ;;  %v3576_v5 = vld [vmem:[%s4610_s1 + $0x8bc] ss:$12 sps:$4 sm:$0xff]  }
  0xf5   :  { %2278 = vmatprep.subr.bf16.mxu0 %v3508_v8  ;;  %v3579_v8 = vld [vmem:[%s4610_s1 + $0x8d4] ss:$12 sps:$4 sm:$0xff]   ;;  %v3577_v51 = vld [vmem:[%s4610_s1 + $0x8d0] ss:$12 sps:$4 sm:$0xff]  }
  0xf7   :  { %3109 = vmatpush3.bf16.msra.mxu1 %v3510_v11 }
  0xf8   :  { %2279 = vmatpush1.bf16.msra.mxu0 %v3506_v10  ;;  %3110 = vmatprep.subr.bf16.mxu1 %v3514_v13  ;;  %v3580_v10 = vld [vmem:[%s4610_s1 + $0x8e8] ss:$12 sps:$4 sm:$0xff]  }
  0xf9   :  { %2280 = vmatprep.subr.bf16.mxu0 %v3513_v12 }
  0xfb   :  { %3111 = vmatpush3.bf16.msra.mxu1 %v3515_v15 }
  0xfc   :  { %2281 = vmatpush1.bf16.msra.mxu0 %v3511_v14  ;;  %3112 = vmatprep.subr.bf16.mxu1 %v3519_v17 }
  0xfd   :  { %2282 = vmatprep.subr.bf16.mxu0 %v3518_v16  ;;  %v424_v16 = vlaneseq }
  0xff   :  { %3113 = vmatpush3.bf16.msra.mxu1 %v3520_v19  ;;  %v425_v17 = vshrl.u32 %v424_v16, 7  ;;  %v422_v19 = vld [vmem:[%s4612_s2] sm:$0x7] }
 0x100   :  { %2283 = vmatpush1.bf16.msra.mxu0 %v3516_v18  ;;  %3114 = vmatprep.subr.bf16.mxu1 %v3524_v21 }
 0x101   :  { %2293 = vmatprep.subr.bf16.mxu0 %v3523_v20  ;;  %v434_v18 = vsub.s32 2, %v425_v17 }
 0x103   :  { %2285 = vmatmul.mubr.bf16.vlgmr.msra.gmra.mrb[0].mxu0 %v2685_v3  ;;  %3115 = vmatpush3.bf16.msra.mxu1 %v3525_v23  ;;  %v3573_v3 = vld [vmem:[%s4610_s1 + $0x8a4] ss:$12 sps:$4 sm:$0xff]   ;;  %v435_v20 = vrot.slane %v422_v19, %v434_v18 }
 0x104   :  { %2294 = vmatpush1.bf16.msra.mxu0 %v3521_v22  ;;  %3116 = vmatprep.subr.bf16.mxu1 %v3529_v25 }
 0x105   :  { %2295 = vmatprep.subr.bf16.mxu0 %v3528_v24  ;;  %2325 = vmatprep.mubr.bf16.mxu0 %v2688_v9  ;;  %v3582_v9 = vld [vmem:[%s4610_s1 + $0x8ec] ss:$12 sps:$4 sm:$0xff]  }
 0x107   :  { %3117 = vmatpush3.bf16.msra.mxu1 %v3530_v27 }
 0x108   :  { %2296 = vmatpush1.bf16.msra.mxu0 %v3526_v26  ;;  %3118 = vmatprep.subr.bf16.mxu1 %v3534_v29 }
 0x109   :  { %2297 = vmatprep.subr.bf16.mxu0 %v3533_v28 }
 0x10b   :  { %3119 = vmatpush3.bf16.msra.mxu1 %v3535_v31 }
 0x10c   :  { %2298 = vmatpush1.bf16.msra.mxu0 %v3531_v30  ;;  %3120 = vmatprep.subr.bf16.mxu1 %v3539_v33 }
 0x10d   :  { %2299 = vmatprep.subr.bf16.mxu0 %v3538_v32 }
 0x10f   :  { %3121 = vmatpush3.bf16.msra.mxu1 %v3540_v35 }
 0x110   :  { %2300 = vmatpush1.bf16.msra.mxu0 %v3536_v34  ;;  %3133 = vmatprep.subr.bf16.mxu1 %v3585_v39 }
 0x111   :  { %2301 = vmatprep.subr.bf16.mxu0 %v3545_v36 }
 0x112   :  { %2608 = vmatmul.mubr.bf16.vlgmr.msra.gmra.mrb[28].mxu1 %v4500_v7 }
 0x113   :  { %3134 = vmatpush3.bf16.msra.mxu1 %v3546_v38  ;;  %3141 = vmatprep.mubr.msk.bf16.mxu1 %vm3586_vm1, %v3585_v39 }
 0x114   :  { %2302 = vmatpush1.bf16.msra.mxu0 %v3543_v37  ;;  %3135 = vmatprep.subr.bf16.mxu1 %v3585_v39 }
 0x115   :  { %2303 = vmatprep.subr.bf16.mxu0 %v3549_v40  ;;  %v4521_v44 = vpop.f32.mrb[0].mxu1 }
 0x116   :  { %v4523_v45 = vpop.f32.mrb[1].mxu1 }
 0x117   :  { %3136 = vmatpush3.bf16.msra.mxu1 %v3550_v42  ;;  %v2126_v48 = vpop.f32.mrb[2].mxu1 }
 0x118   :  { %2304 = vmatpush1.bf16.msra.mxu0 %v3547_v41  ;;  %3137 = vmatprep.subr.bf16.mxu1 %v3585_v39  ;;  %v2127_v50 = vpop.f32.mrb[3].mxu1 }
 0x119   :  { %2305 = vmatprep.subr.bf16.mxu0 %v3553_v43 }
 0x11b   :  { %3138 = vmatpush3.bf16.msra.mxu1 %v3554_v47 }
 0x11c   :  { %2306 = vmatpush1.bf16.msra.mxu0 %v3551_v46  ;;  %3139 = vmatprep.subr.bf16.mxu1 %v3585_v39 }
 0x11d   :  { %2307 = vmatprep.subr.bf16.mxu0 %v3557_v49 }
 0x11f   :  { %3140 = vmatpush3.bf16.msra.mxu1 %v3558_v53 }
 0x120   :  { %2308 = vmatpush1.bf16.msra.mxu0 %v3555_v52 }
 0x121   :  { %2309 = vmatprep.subr.bf16.mxu0 %v3561_v54 }
 0x122   :  { %3142 = vmatmul.mubr.msk.bf16.vlgmr.msra.gmra.mrb[32].mxu1 %vm2084_vm0, %v3583_v57 }
 0x124   :  { %2310 = vmatpush1.bf16.msra.mxu0 %v3559_v55 }
 0x125   :  { %2311 = vmatprep.subr.bf16.mxu0 %v3564_v56  ;;  %v4559_v60 = vpop.f32.mrb[4].mxu1 }
 0x126   :  { %v4561_v61 = vpop.f32.mrb[5].mxu1 }
 0x127   :  { %v2372_v63 = vpop.f32.mrb[6].mxu1 }
 0x128   :  { %2312 = vmatpush1.bf16.msra.mxu0 %v3562_v58  ;;  %v2373_v1 = vpop.f32.mrb[7].mxu1  ;;  %v426_v63 = vsub.s32 0, %v425_v17 }
 0x129   :  { %2313 = vmatprep.subr.bf16.mxu0 %v3567_v59 }
 0x12a   :  { %v427_v1 = vrot.slane %v422_v19, %v426_v63 }
 0x12c   :  { %2314 = vmatpush1.bf16.msra.mxu0 %v3565_v62 }
 0x12d   :  { %2315 = vmatprep.subr.bf16.mxu0 %v3570_v0  ;;  %v430_v0 = vsub.s32 1, %v425_v17 }
 0x130   :  { %2316 = vmatpush1.bf16.msra.mxu0 %v3568_v2  ;;  %v431_v2 = vrot.slane %v422_v19, %v430_v0 }
 0x131   :  { %2317 = vmatprep.subr.bf16.mxu0 %v3573_v3  ;;  %v2123_v3 = vadd.f32 %v4521_v44, %v427_v1 }
 0x134   :  { %2318 = vmatpush1.bf16.msra.mxu0 %v3571_v4  ;;  %v2125_v4 = vadd.f32 %v4523_v45, %v431_v2 }
 0x135   :  { %2319 = vmatprep.subr.bf16.mxu0 %v3576_v5 }
 0x138   :  { %2320 = vmatpush1.bf16.msra.mxu0 %v3574_v6 }
 0x139   :  { %2321 = vmatprep.subr.bf16.mxu0 %v3579_v8 }
 0x13c   :  { %2322 = vmatpush1.bf16.msra.mxu0 %v3577_v51 }
 0x13d   :  { %2323 = vmatprep.subr.bf16.mxu0 %v3582_v9 }
 0x140   :  { %2324 = vmatpush1.bf16.msra.mxu0 %v3580_v10 }
 0x143   :  { %2326 = vmatmul.mubr.bf16.vlgmr.msra.gmra.mrb[0].mxu0 %v4500_v7 }
 0x145   :  { %v3012_v11 = vpop.f32.mrb[8].mxu1 }
 0x146   :  { %v3013_v12 = vpop.f32.mrb[9].mxu1 }
 0x147   :  { %v3014_v13 = vadd.f32 %v3013_v12, %v3012_v11  ;;  %v3015_v14 = vpop.f32.mrb[10].mxu1 }
 0x148   :  { %v3016_v15 = vpop.f32.mrb[11].mxu1 }
 0x149   :  { %v2410_v21 = vadd.f32 %v3014_v13, %v435_v20 }
 0x165   :  { %v3034_v22 = vpop.f32.mrb[12].mxu1 }
 0x166   :  { %v3035_v23 = vpop.f32.mrb[13].mxu1 }
 0x167   :  { %v3036_v24 = vadd.f32 %v3035_v23, %v3034_v22  ;;  %v3037_v25 = vpop.f32.mrb[14].mxu1 }
 0x168   :  { %v3038_v26 = vpop.f32.mrb[15].mxu1 }
 0x169   :  { %v2450_v27 = vadd.f32 %v3036_v24, %v2410_v21 }
 0x185   :  { %v3056_v28 = vpop.f32.mrb[16].mxu1 }
 0x186   :  { %v3057_v29 = vpop.f32.mrb[17].mxu1 }
 0x187   :  { %v3058_v30 = vadd.f32 %v3057_v29, %v3056_v28  ;;  %v3059_v31 = vpop.f32.mrb[18].mxu1 }
 0x188   :  { %v3060_v32 = vpop.f32.mrb[19].mxu1 }
 0x189   :  { %v2490_v33 = vadd.f32 %v3058_v30, %v2450_v27 }
 0x1a5   :  { %v3078_v34 = vpop.f32.mrb[20].mxu1 }
 0x1a6   :  { %v3079_v35 = vpop.f32.mrb[21].mxu1 }
 0x1a7   :  { %v3080_v36 = vadd.f32 %v3079_v35, %v3078_v34  ;;  %v3081_v7 = vpop.f32.mrb[22].mxu1 }
 0x1a8   :  { %v3082_v37 = vpop.f32.mrb[23].mxu1 }
 0x1a9   :  { %v2530_v38 = vadd.f32 %v3080_v36, %v2490_v33 }
 0x1c5   :  { %v3100_v39 = vpop.f32.mrb[24].mxu1 }
 0x1c6   :  { %v3101_v40 = vpop.f32.mrb[25].mxu1 }
 0x1c7   :  { %v3102_v41 = vadd.f32 %v3101_v40, %v3100_v39  ;;  %v3103_v42 = vpop.f32.mrb[26].mxu1 }
 0x1c8   :  { %v3104_v43 = vpop.f32.mrb[27].mxu1 }
 0x1c9   :  { %v2570_v46 = vadd.f32 %v3102_v41, %v2530_v38 }
 0x1e5   :  { %v3122_v47 = vpop.f32.mrb[28].mxu1 }
 0x1e6   :  { %v3123_v48 = vpop.f32.mrb[29].mxu1 }
 0x1e7   :  { %v3124_v49 = vadd.f32 %v3123_v48, %v3122_v47  ;;  %v3125_v50 = vpop.f32.mrb[30].mxu1 }
 0x1e8   :  { %v3126_v52 = vpop.f32.mrb[31].mxu1 }
 0x1e9   :  { %v2610_v53 = vadd.f32 %v3124_v49, %v2570_v46 }
 0x1f5   :  { %v2649_v54 = vpop.f32.mrb[32].mxu1 }
 0x1f6   :  { %v2650_v55 = vadd.f32 %v2649_v54, %v2610_v53  ;;  %v3143_v56 = vpop.f32.mrb[33].mxu1 }
 0x1f7   :  { %v2652_v57 = vpop.f32.mrb[34].mxu1 }
 0x1f8   :  { %v2657_v58 = vmax.f32 %v2650_v55, 0.0  ;;  %v3144_v59 = vpop.f32.mrb[35].mxu1 }
 0x1fa   :  { %v2995_v62 = vpack.c.bf16 %v2657_v58, %v2657_v58 }
 0x1fc   :  { %2672 = vst [vmem:[%s4613_s3 + $0x8] sm:$0xf] %v2995_v62 }
 0x216   :  { %v2327_v5 = vpop.f32.mrb[0].mxu0 }
 0x217   :  { %v3146_v6 = vadd.f32 %v2327_v5, %v2123_v3  ;;  %v2329_v8 = vpop.f32.mrb[1].mxu0 }
 0x218   :  { %v3149_v51 = vadd.f32 %v2329_v8, %v2125_v4  ;;  %v2331_v9 = vpop.f32.mrb[2].mxu0 }
 0x219   :  { %v3147_v10 = vadd.f32 %v3146_v6, %v4559_v60  ;;  %v2332_v11 = vpop.f32.mrb[3].mxu0 }
 0x21a   :  { %v3150_v12 = vadd.f32 %v3149_v51, %v4561_v61 }
 0x21b   :  { %v2655_v13 = vmax.f32 %v3147_v10, 0.0 }
 0x21c   :  { %v2656_v14 = vmax.f32 %v3150_v12, 0.0 }
 0x21e   :  { %v2994_v15 = vpack.c.bf16 %v2656_v14, %v2655_v13 }
 0x220   :  { %2671 = vst [vmem:[%s4613_s3] sm:$0xff] %v2994_v15 }

// kernel: lenet5_forward.12
= control target key start
LH: loop header
LB: loop body
LE: loop exit
PB: predicated region body
PF: predicated region fallthrough
CT: control target
= control target key end

     0   :  { %v561_v1 = vmov 0   ;;  %v67_v57 = vlaneseq  ;;  %vm420_vm0 = vcmask 1043456   ;;  %vm421_vm1 = vcmask 523268   ;;  %s738_s1 = inlined_call_operand.vmem [shape: bf16[384,192], index: 1, kind: input, shape index: {}]   ;;  %s739_s0 = inlined_call_operand.vmem [shape: bf16[8,384], index: 0, kind: input, shape index: {}]   ;;  %s740_s2 = inlined_call_operand.vmem [shape: f32[1,192], index: 2, kind: input, shape index: {}]   ;;  %s741_s3 = inlined_call_operand.vmem [shape: bf16[8,192], index: 3, kind: output, shape index: {}]  }
   0x1   :  { %v486_v0 = vld [vmem:[%s738_s1 + $0x4] ss:$8 sps:$4 sm:$0xff]   ;;  %401 = vmatprep.mubr.bf16.mxu0 %v561_v1  ;;  %v488_v2 = vld [vmem:[%s738_s1] ss:$8 sps:$4 sm:$0xff]   ;;  %v489_v3 = vld [vmem:[%s738_s1 + $0x14] ss:$8 sps:$4 sm:$0xff]  }
   0x2   :  { %328 = vmatprep.subr.bf16.mxu1 %v486_v0  ;;  %v491_v4 = vld [vmem:[%s738_s1 + $0x10] ss:$8 sps:$4 sm:$0xff]   ;;  %v492_v5 = vld [vmem:[%s738_s1 + $0x24] ss:$8 sps:$4 sm:$0xff]   ;;  %v494_v6 = vld [vmem:[%s738_s1 + $0x20] ss:$8 sps:$4 sm:$0xff]  }
   0x3   :  { %329 = vmatpush1.bf16.msra.mxu1 %v488_v2  ;;  %v495_v7 = vld [vmem:[%s738_s1 + $0x34] ss:$8 sps:$4 sm:$0xff]   ;;  %v497_v8 = vld [vmem:[%s738_s1 + $0x30] ss:$8 sps:$4 sm:$0xff]   ;;  %v510_v9 = vld [vmem:[%s738_s1 + $0x104] ss:$8 sps:$4 sm:$0xff]  }
   0x4   :  { %330 = vmatprep.subr.bf16.mxu1 %v489_v3  ;;  %v498_v10 = vld [vmem:[%s738_s1 + $0x44] ss:$8 sps:$4 sm:$0xff]   ;;  %v514_v11 = vld [vmem:[%s738_s1 + $0x100] ss:$8 sps:$4 sm:$0xff]   ;;  %369 = vmatprep.subr.bf16.mxu0 %v510_v9  ;;  %v516_v12 = vld [vmem:[%s738_s1 + $0x114] ss:$8 sps:$4 sm:$0xff]  }
   0x5   :  { %370 = vmatpush1.bf16.msra.mxu0 %v514_v11  ;;  %v500_v13 = vld [vmem:[%s738_s1 + $0x40] ss:$8 sps:$4 sm:$0xff]   ;;  %v501_v14 = vld [vmem:[%s738_s1 + $0x54] ss:$8 sps:$4 sm:$0xff]   ;;  %v520_v15 = vld [vmem:[%s738_s1 + $0x110] ss:$8 sps:$4 sm:$0xff]  }
   0x6   :  { %371 = vmatprep.subr.bf16.mxu0 %v516_v12  ;;  %v522_v16 = vld [vmem:[%s738_s1 + $0x124] ss:$8 sps:$4 sm:$0xff]   ;;  %v503_v17 = vld [vmem:[%s738_s1 + $0x50] ss:$8 sps:$4 sm:$0xff]   ;;  %v526_v18 = vld [vmem:[%s738_s1 + $0x120] ss:$8 sps:$4 sm:$0xff]  }
   0x7   :  { %331 = vmatpush1.bf16.msra.mxu1 %v491_v4  ;;  %v528_v19 = vld [vmem:[%s738_s1 + $0x134] ss:$8 sps:$4 sm:$0xff]   ;;  %v504_v20 = vld [vmem:[%s738_s1 + $0x64] ss:$8 sps:$4 sm:$0xff]   ;;  %v532_v21 = vld [vmem:[%s738_s1 + $0x130] ss:$8 sps:$4 sm:$0xff]  }
   0x8   :  { %332 = vmatprep.subr.bf16.mxu1 %v492_v5  ;;  %v506_v22 = vld [vmem:[%s738_s1 + $0x60] ss:$8 sps:$4 sm:$0xff]   ;;  %v534_v23 = vld [vmem:[%s738_s1 + $0x144] ss:$8 sps:$4 sm:$0xff]   ;;  %v507_v24 = vld [vmem:[%s738_s1 + $0x74] ss:$8 sps:$4 sm:$0xff]  }
   0x9   :  { %372 = vmatpush1.bf16.msra.mxu0 %v520_v15  ;;  %v509_v25 = vld [vmem:[%s738_s1 + $0x70] ss:$8 sps:$4 sm:$0xff]   ;;  %v538_v26 = vld [vmem:[%s738_s1 + $0x140] ss:$8 sps:$4 sm:$0xff]   ;;  %v540_v27 = vld [vmem:[%s738_s1 + $0x154] ss:$8 sps:$4 sm:$0xff]  }
   0xa   :  { %373 = vmatprep.subr.bf16.mxu0 %v522_v16  ;;  %v512_v28 = vld [vmem:[%s738_s1 + $0x84] ss:$8 sps:$4 sm:$0xff]   ;;  %v544_v29 = vld [vmem:[%s738_s1 + $0x150] ss:$8 sps:$4 sm:$0xff]   ;;  %v515_v30 = vld [vmem:[%s738_s1 + $0x80] ss:$8 sps:$4 sm:$0xff]  }
   0xb   :  { %333 = vmatpush1.bf16.msra.mxu1 %v494_v6  ;;  %v546_v31 = vld [vmem:[%s738_s1 + $0x164] ss:$8 sps:$4 sm:$0xff]   ;;  %v518_v32 = vld [vmem:[%s738_s1 + $0x94] ss:$8 sps:$4 sm:$0xff]   ;;  %v550_v35 = vld [vmem:[%s738_s1 + $0x160] ss:$8 sps:$4 sm:$0xff]  }
   0xc   :  { %334 = vmatprep.subr.bf16.mxu1 %v495_v7  ;;  %v15_v33 = vld [vmem:[%s739_s0] sm:$0xff]  ;;  %v521_v36 = vld [vmem:[%s738_s1 + $0x90] ss:$8 sps:$4 sm:$0xff]   ;;  %v552_v37 = vld [vmem:[%s738_s1 + $0x174] ss:$8 sps:$4 sm:$0xff]   ;;  %v68_v58 = vshrl.u32 %v67_v57, 7 }
   0xd   :  { %374 = vmatpush1.bf16.msra.mxu0 %v526_v18  ;;  %v429_v34 = vcombine.high %v15_v33, %v15_v33  ;;  %v524_v38 = vld [vmem:[%s738_s1 + $0xa4] ss:$8 sps:$4 sm:$0xff]   ;;  %v556_v39 = vld [vmem:[%s738_s1 + $0x170] ss:$8 sps:$4 sm:$0xff]   ;;  %v527_v40 = vld [vmem:[%s738_s1 + $0xa0] ss:$8 sps:$4 sm:$0xff]   ;;  %v428_v52 = vcombine.low %v15_v33, %v15_v33 }
   0xe   :  { %375 = vmatprep.subr.bf16.mxu0 %v528_v19  ;;  %v530_v41 = vld [vmem:[%s738_s1 + $0xb4] ss:$8 sps:$4 sm:$0xff]   ;;  %v560_v42 = vld [vmem:[%s739_s0 + $0x8] ss:$0 sps:$4 sm:$0xff]   ;;  %v533_v43 = vld [vmem:[%s738_s1 + $0xb0] ss:$8 sps:$4 sm:$0xff]  }
   0xf   :  { %335 = vmatpush1.bf16.msra.mxu1 %v497_v8  ;;  %360 = vmatprep.mubr.bf16.mxu1 %v429_v34  ;;  %v536_v44 = vld [vmem:[%s738_s1 + $0xc4] ss:$8 sps:$4 sm:$0xff]   ;;  %v539_v45 = vld [vmem:[%s738_s1 + $0xc0] ss:$8 sps:$4 sm:$0xff]   ;;  %v542_v46 = vld [vmem:[%s738_s1 + $0xd4] ss:$8 sps:$4 sm:$0xff]  }
  0x10   :  { %336 = vmatprep.subr.bf16.mxu1 %v498_v10  ;;  %v545_v47 = vld [vmem:[%s738_s1 + $0xd0] ss:$8 sps:$4 sm:$0xff]   ;;  %v548_v48 = vld [vmem:[%s738_s1 + $0xe4] ss:$8 sps:$4 sm:$0xff]   ;;  %v551_v49 = vld [vmem:[%s738_s1 + $0xe0] ss:$8 sps:$4 sm:$0xff]  }
  0x11   :  { %376 = vmatpush1.bf16.msra.mxu0 %v532_v21  ;;  %v554_v50 = vld [vmem:[%s738_s1 + $0xf4] ss:$8 sps:$4 sm:$0xff]   ;;  %v557_v51 = vld [vmem:[%s738_s1 + $0xf0] ss:$8 sps:$4 sm:$0xff]   ;;  %v69_v59 = vsub.s32 0, %v68_v58  ;;  %v73_v61 = vsub.s32 1, %v68_v58  ;;  %vm422_vm2 = vmor %vm421_vm1, %vm420_vm0 }
  0x12   :  { %377 = vmatprep.subr.bf16.mxu0 %v534_v23  ;;  %v65_v60 = vld [vmem:[%s740_s2] sm:$0x3] }
  0x13   :  { %337 = vmatpush1.bf16.msra.mxu1 %v500_v13  ;;  %v70_v62 = vrot.slane %v65_v60, %v69_v59  ;;  %v74_v63 = vrot.slane %v65_v60, %v73_v61 }
  0x14   :  { %338 = vmatprep.subr.bf16.mxu1 %v501_v14 }
  0x15   :  { %378 = vmatpush1.bf16.msra.mxu0 %v538_v26 }
  0x16   :  { %379 = vmatprep.subr.bf16.mxu0 %v540_v27 }
  0x17   :  { %339 = vmatpush1.bf16.msra.mxu1 %v503_v17 }
  0x18   :  { %340 = vmatprep.subr.bf16.mxu1 %v504_v20 }
  0x19   :  { %380 = vmatpush1.bf16.msra.mxu0 %v544_v29 }
  0x1a   :  { %381 = vmatprep.subr.bf16.mxu0 %v546_v31 }
  0x1b   :  { %341 = vmatpush1.bf16.msra.mxu1 %v506_v22 }
  0x1c   :  { %342 = vmatprep.subr.bf16.mxu1 %v507_v24 }
  0x1d   :  { %382 = vmatpush1.bf16.msra.mxu0 %v550_v35 }
  0x1e   :  { %383 = vmatprep.subr.bf16.mxu0 %v552_v37 }
  0x1f   :  { %343 = vmatpush1.bf16.msra.mxu1 %v509_v25 }
  0x20   :  { %344 = vmatprep.subr.bf16.mxu1 %v512_v28 }
  0x21   :  { %384 = vmatpush1.bf16.msra.mxu0 %v556_v39 }
  0x23   :  { %345 = vmatpush1.bf16.msra.mxu1 %v515_v30 }
  0x24   :  { %346 = vmatprep.subr.bf16.mxu1 %v518_v32  ;;  %402 = vmatmul.mubr.bf16.vlgmr.msra.gmra.mrb[0].mxu0 %v560_v42 }
  0x27   :  { %347 = vmatpush1.bf16.msra.mxu1 %v521_v36 }
  0x28   :  { %348 = vmatprep.subr.bf16.mxu1 %v524_v38 }
  0x2b   :  { %349 = vmatpush1.bf16.msra.mxu1 %v527_v40 }
  0x2c   :  { %350 = vmatprep.subr.bf16.mxu1 %v530_v41 }
  0x2f   :  { %351 = vmatpush1.bf16.msra.mxu1 %v533_v43 }
  0x30   :  { %352 = vmatprep.subr.bf16.mxu1 %v536_v44 }
  0x33   :  { %353 = vmatpush1.bf16.msra.mxu1 %v539_v45 }
  0x34   :  { %354 = vmatprep.subr.bf16.mxu1 %v542_v46 }
  0x37   :  { %355 = vmatpush1.bf16.msra.mxu1 %v545_v47 }
  0x38   :  { %356 = vmatprep.subr.bf16.mxu1 %v548_v48 }
  0x3b   :  { %357 = vmatpush1.bf16.msra.mxu1 %v551_v49 }
  0x3c   :  { %358 = vmatprep.subr.bf16.mxu1 %v554_v50 }
  0x3f   :  { %359 = vmatpush1.bf16.msra.mxu1 %v557_v51 }
  0x42   :  { %361 = vmatmul.mubr.bf16.vlgmr.msra.gmra.mrb[0].mxu1 %v428_v52 }
  0xf7   :  { %v403_v53 = vpop.f32.mrb[0].mxu0 }
  0xf8   :  { %v405_v54 = vpop.f32.mrb[1].mxu0 }
  0xf9   :  { %v407_v55 = vpop.f32.mrb[2].mxu0 }
  0xfa   :  { %v408_v56 = vpop.f32.mrb[3].mxu0 }
 0x115   :  { %v362_v0 = vpop.f32.mrb[0].mxu1 }
 0x116   :  { %v363_v1 = vadd.f32 %v362_v0, %v70_v62  ;;  %v364_v2 = vpop.f32.mrb[1].mxu1 }
 0x117   :  { %v365_v3 = vadd.f32 %v364_v2, %v74_v63  ;;  %v366_v4 = vpop.f32.mrb[2].mxu1 }
 0x118   :  { %v404_v5 = vadd.f32 %v403_v53, %v363_v1  ;;  %v367_v6 = vpop.f32.mrb[3].mxu1 }
 0x119   :  { %v406_v7 = vadd.f32 %v405_v54, %v365_v3 }
 0x11a   :  { %v410_v8 = vmax.f32 %v404_v5, 0.0 }
 0x11b   :  { %v411_v9 = vmax.f32 %v406_v7, 0.0 }
 0x11d   :  { %v480_v10 = vpack.c.bf16 %v411_v9, %v410_v8 }
 0x11f   :  { %423 = vst.msk [vmem:[%s741_s3] sm:$0xff] %vm422_vm2, %v480_v10 }

// kernel: lenet5_forward.13
= control target key start
LH: loop header
LB: loop body
LE: loop exit
PB: predicated region body
PF: predicated region fallthrough
CT: control target
= control target key end

     0   :  { %v225_v0 = vmov 0   ;;  %vm125_vm0 = vcmask 523264   ;;  %v169_v16 = vlaneseq  ;;  %s291_s1 = inlined_call_operand.vmem [shape: bf16[192,128], index: 1, kind: input, shape index: {}]   ;;  %s292_s0 = inlined_call_operand.vmem [shape: bf16[8,192], index: 0, kind: input, shape index: {}]   ;;  %s293_s2 = inlined_call_operand.vmem [shape: f32[1,128], index: 2, kind: input, shape index: {}]   ;;  %s294_s3 = inlined_call_operand.vmem [shape: f32[8,128], index: 3, kind: output, shape index: {}]  }
   0x1   :  { %129 = vmatprep.subr.bf16.mxu0 %v225_v0  ;;  %v207_v1 = vld [vmem:[%s291_s1] sm:$0xff]   ;;  %v208_v2 = vld [vmem:[%s291_s1 + $0x8] sm:$0xff]   ;;  %v209_v3 = vld [vmem:[%s291_s1 + $0x10] sm:$0xff]  }
   0x2   :  { %130 = vmatpush1.bf16.msra.mxu0 %v207_v1  ;;  %v210_v4 = vld [vmem:[%s291_s1 + $0x18] sm:$0xff]   ;;  %v15_v5 = vld [vmem:[%s292_s0] sm:$0xff]  ;;  %v212_v8 = vld [vmem:[%s291_s1 + $0x28] sm:$0xff]   ;;  %v170_v17 = vand.u32 127, %v169_v16 }
   0x3   :  { %131 = vmatprep.subr.bf16.mxu0 %v225_v0  ;;  %v192_v6 = vcombine.high %v15_v5, %v15_v5  ;;  %v211_v7 = vld [vmem:[%s291_s1 + $0x20] sm:$0xff]   ;;  %v213_v9 = vld [vmem:[%s291_s1 + $0x30] sm:$0xff]   ;;  %v214_v10 = vld [vmem:[%s291_s1 + $0x38] sm:$0xff]   ;;  %v191_v15 = vcombine.low %v15_v5, %v15_v5 }
   0x4   :  { %v215_v11 = vld [vmem:[%s291_s1 + $0x40] sm:$0xff]   ;;  %v216_v12 = vld [vmem:[%s291_s1 + $0x48] sm:$0xff]   ;;  %v217_v13 = vld [vmem:[%s291_s1 + $0x50] sm:$0xff]   ;;  %vm171_vm1 = vcmp.lt.s32.totalorder %v170_v17, 10 }
   0x5   :  { %205 = vmatprep.mubr.msk.bf16.mxu0 %vm125_vm0, %v192_v6  ;;  %v218_v14 = vld [vmem:[%s291_s1 + $0x58] sm:$0xff]   ;;  %v190_v18 = vld [vmem:[%s293_s2] ss:$0 sm:$0xff] }
   0x6   :  { %132 = vmatpush1.bf16.msra.mxu0 %v208_v2 }
   0x7   :  { %133 = vmatprep.subr.bf16.mxu0 %v225_v0 }
   0xa   :  { %134 = vmatpush1.bf16.msra.mxu0 %v209_v3 }
   0xb   :  { %135 = vmatprep.subr.bf16.mxu0 %v225_v0 }
   0xe   :  { %136 = vmatpush1.bf16.msra.mxu0 %v210_v4 }
   0xf   :  { %137 = vmatprep.subr.bf16.mxu0 %v225_v0 }
  0x12   :  { %138 = vmatpush1.bf16.msra.mxu0 %v211_v7 }
  0x13   :  { %139 = vmatprep.subr.bf16.mxu0 %v225_v0 }
  0x16   :  { %140 = vmatpush1.bf16.msra.mxu0 %v212_v8 }
  0x17   :  { %141 = vmatprep.subr.bf16.mxu0 %v225_v0 }
  0x1a   :  { %142 = vmatpush1.bf16.msra.mxu0 %v213_v9 }
  0x1b   :  { %143 = vmatprep.subr.bf16.mxu0 %v225_v0 }
  0x1e   :  { %144 = vmatpush1.bf16.msra.mxu0 %v214_v10 }
  0x1f   :  { %145 = vmatprep.subr.bf16.mxu0 %v225_v0 }
  0x22   :  { %146 = vmatpush1.bf16.msra.mxu0 %v215_v11 }
  0x23   :  { %147 = vmatprep.subr.bf16.mxu0 %v225_v0 }
  0x26   :  { %148 = vmatpush1.bf16.msra.mxu0 %v216_v12 }
  0x27   :  { %149 = vmatprep.subr.bf16.mxu0 %v225_v0 }
  0x2a   :  { %150 = vmatpush1.bf16.msra.mxu0 %v217_v13 }
  0x2b   :  { %151 = vmatprep.subr.bf16.mxu0 %v225_v0 }
  0x2e   :  { %152 = vmatpush1.bf16.msra.mxu0 %v218_v14 }
  0x31   :  { %162 = vmatmul.mubr.bf16.vlgmr.msra.gmra.mrb[0].mxu0 %v191_v15 }
 0x104   :  { %v163_v19 = vpop.f32.mrb[0].mxu0 }
 0x105   :  { %v164_v20 = vadd.f32 %v190_v18, %v163_v19  ;;  %v165_v21 = vpop.f32.mrb[1].mxu0 }
 0x106   :  { %v166_v22 = vpop.f32.mrb[2].mxu0 }
 0x107   :  { %v167_v23 = vpop.f32.mrb[3].mxu0  ;;  %v172_v24 = vsel %vm171_vm1, %v164_v20, -inf }
 0x108   :  { %173 = vmax.xlane.f32.xlu0 %v172_v24 }
 0x195   :  { %v174_v25 = vpop.xlane.xlu0 %173 }
 0x196   :  { %v175_v26 = vsub.f32 %v164_v20, %v174_v25 }
 0x198   :  { %v176_v27 = vmul.f32 1.442695, %v175_v26 }
 0x19a   :  { %221 = vpow2.f32 %v176_v27 }
 0x1a4   :  { %v222_v28 = vpop.eup %221 }
 0x1a5   :  { %v178_v29 = vsel %vm171_vm1, %v222_v28, 0.0 }
 0x1a6   :  { %179 = vadd.xlane.f32.xlu0 %v178_v29 }
 0x233   :  { %v180_v30 = vpop.xlane.xlu0 %179 }
 0x234   :  { %223 = vlog2.f32 %v180_v30 }
 0x23e   :  { %v224_v31 = vpop.eup %223 }
 0x23f   :  { %v182_v32 = vmul.f32 0.6931472, %v224_v31 }
 0x241   :  { %v183_v33 = vadd.f32 %v182_v32, %v174_v25 }
 0x243   :  { %v184_v34 = vsub.f32 %v164_v20, %v183_v33 }
 0x245   :  { %185 = vst [vmem:[%s294_s3] sm:$0xff] %v184_v34 }

</bundles_post_ra>
